<compile_context>
chip_gen: v7x
topology: tpu7x:2x2x1
jax: 0.10.0
libtpu: 0.0.40
codegen_flags: <defaults>
</compile_context>

<pallas_src>
import jax
import jax.numpy as jnp
from jax.experimental import pallas as pl
from jax.experimental.pallas import tpu as pltpu


def _make_fused_up_kernel(NB, C2, C1, Cmid, Cout, H, W, slope=0.01):
    """Fused (pad -> conv3x3 -> LeakyReLU) x2 over NB images per grid step."""
    Cin = C2 + C1
    Hp, Wp = H + 2, W + 2
    L = H * Wp              # "wide" conv output length (2 junk cols per row, dropped later)

    def pad_flat(src, row_stride):
        # src: (c, >= H*row_stride); valid row r occupies cols [r*row_stride, r*row_stride+W).
        # Returns (c, Hp*Wp + 2): the zero-ring-padded flat image plus 2 trailing zero
        # lanes so all nine tap slices of length L stay in bounds.
        c = src.shape[0]
        pieces = [jnp.zeros((c, Wp + 1), jnp.float32)]        # top zero row + left pad of row 1
        for r in range(H):
            pieces.append(src[:, r * row_stride: r * row_stride + W])
            if r < H - 1:
                pieces.append(jnp.zeros((c, 2), jnp.float32))  # right pad + next left pad
            else:
                pieces.append(jnp.zeros((c, Wp + 3), jnp.float32))  # right pad + bottom row + 2 extra
        return jnp.concatenate(pieces, axis=1)                 # (c, Hp*Wp + 2)

    def taps(xpad):
        # (c, Hp*Wp+2) -> (9c, L): the nine 3x3 taps are contiguous lane slices at
        # offsets dy*Wp+dx, stacked on the sublane axis -> one K=9c matmul on the MXU.
        return jnp.concatenate(
            [xpad[:, dy * Wp + dx: dy * Wp + dx + L]
             for dy in range(3) for dx in range(3)], axis=0)

    def leaky(a):
        return jnp.where(a > 0, a, slope * a)                  # LeakyReLU(0.01), f32 on VPU

    def kernel(xa_ref, xb_ref, w1_ref, w2_ref, o_ref):
        # xa_ref: (NB, C2, H*W)  skip connection x2, unpadded, spatial flattened
        # xb_ref: (NB, C1, H*W)  upsampled x1, same layout
        # w1_ref: (Cmid, 9*Cin); w2_ref: (Cout, 9*Cmid)
        # o_ref : (NB, Cout, H*W)  valid (junk-free) flat output, lane-dense
        t1 = []
        for b in range(NB):
            x = jnp.concatenate([xa_ref[b].astype(jnp.float32),
                                 xb_ref[b].astype(jnp.float32)], axis=0)   # cat([x2, x1])
            t1.append(taps(pad_flat(x, W)))                                # (9*Cin, L)
        h = leaky(jnp.dot(w1_ref[...], jnp.concatenate(t1, axis=1),
                          preferred_element_type=jnp.float32,
                          precision=jax.lax.Precision.HIGHEST))            # (Cmid, NB*L)

        t2 = []
        for b in range(NB):
            hb = h[:, b * L:(b + 1) * L]
            # Re-embed the wide intermediate as a padded flat image (junk cols dropped).
            t2.append(taps(pad_flat(hb, Wp)))                              # (9*Cmid, L)
        y = leaky(jnp.dot(w2_ref[...], jnp.concatenate(t2, axis=1),
                          preferred_element_type=jnp.float32,
                          precision=jax.lax.Precision.HIGHEST))            # (Cout, NB*L)

        for b in range(NB):
            yb = y[:, b * L:(b + 1) * L]
            valid = jnp.concatenate([yb[:, r * Wp: r * Wp + W] for r in range(H)],
                                    axis=1)                                # (Cout, H*W)
            o_ref[b] = valid.astype(o_ref.dtype)

    return kernel


def _interp_matrix_align_corners(n_in, n_out, dtype=jnp.float32):
    """Row-stochastic 1D linear interpolation matrix (n_out, n_in), align_corners=True."""
    if n_in == 1:
        return jnp.ones((n_out, 1), dtype)
    src = jnp.arange(n_out, dtype=jnp.float32) * (n_in - 1) / max(n_out - 1, 1)
    lo = jnp.clip(jnp.floor(src), 0, n_in - 2)
    frac = src - lo
    lo_i = lo.astype(jnp.int32)
    cols = jnp.arange(n_in, dtype=jnp.int32)[None, :]
    a = ((cols == lo_i[:, None]).astype(jnp.float32) * (1.0 - frac)[:, None]
         + (cols == lo_i[:, None] + 1).astype(jnp.float32) * frac[:, None])
    return a.astype(dtype)


def bilinear_upsample_2x_align_corners(x):
    """NCHW bilinear x2 upsample (align_corners=True) as two dense interpolation matmuls."""
    _, _, H, W = x.shape
    Ah = _interp_matrix_align_corners(H, 2 * H, x.dtype)
    Aw = _interp_matrix_align_corners(W, 2 * W, x.dtype)
    return jnp.einsum('oh,nchw,pw->ncop', Ah, x, Aw)


def up_forward(x1, x2, w1_torch, w2_torch, *, images_per_step=4):
    """Forward of up(in_ch, out_ch, 'bilinear', dropout=None).

    x1: (N, in_ch//2, H/2, W/2), x2: (N, in_ch//2, H, W)   -- NCHW, like PyTorch
    w1_torch: (out_ch, in_ch, 3, 3), w2_torch: (out_ch, out_ch, 3, 3) (no bias)
    Returns (N, out_ch, H, W) in NCHW.
    """
    N, C1, _, _ = x1.shape
    _, C2, H, W = x2.shape
    Cin = C1 + C2
    Cmid = w1_torch.shape[0]
    Cout = w2_torch.shape[0]

    # Bilinear x2 upsample + the F.pad(diff) alignment (diff is 0 for even sizes).
    x1u = bilinear_upsample_2x_align_corners(x1)
    diffY = H - x1u.shape[2]
    diffX = W - x1u.shape[3]
    if diffY or diffX:
        x1u = jnp.pad(x1u, ((0, 0), (0, 0),
                            (diffY // 2, diffY - diffY // 2),
                            (diffX // 2, diffX - diffX // 2)))

    # Free reshapes (contiguous): spatial flattened onto the lane axis, no zero pad in HBM.
    HW = H * W
    xa = x2.reshape(N, C2, HW)
    xb = x1u.reshape(N, C1, HW)

    # Weight matrices (cout, 9*cin) matching the in-kernel tap order (dy, dx, ci).
    w1m = jnp.transpose(w1_torch, (0, 2, 3, 1)).reshape(Cmid, 9 * Cin)
    w2m = jnp.transpose(w2_torch, (0, 2, 3, 1)).reshape(Cout, 9 * Cmid)

    # Process several images per grid step to amortize the ~0.35us/step overhead.
    NB = 1
    for d in (images_per_step, 8, 4, 2, 1):
        if d is not None and 1 <= d <= N and N % d == 0:
            NB = d
            break

    kernel = _make_fused_up_kernel(NB, C2, C1, Cmid, Cout, H, W)

    out_flat = pl.pallas_call(
        kernel,
        out_shape=jax.ShapeDtypeStruct((N, Cout, HW), x2.dtype),
        grid=(N // NB,),
        in_specs=[
            pl.BlockSpec((NB, C2, HW), lambda g: (g, 0, 0)),
            pl.BlockSpec((NB, C1, HW), lambda g: (g, 0, 0)),
            pl.BlockSpec((Cmid, 9 * Cin), lambda g: (0, 0)),
            pl.BlockSpec((Cout, 9 * Cmid), lambda g: (0, 0)),
        ],
        out_specs=pl.BlockSpec((NB, Cout, HW), lambda g: (g, 0, 0)),
        compiler_params=pltpu.CompilerParams(
            # Batch-group grid axis shards across the 2 TensorCores on v7x.
            dimension_semantics=("parallel",),
            vmem_limit_bytes=32 * 1024 * 1024,
        ),
    )(xa, xb, w1m, w2m)

    # Contiguous reshape back to NCHW: free in XLA (no extra HBM round trip).
    return out_flat.reshape(N, Cout, H, W)


def _reference_up_forward(x1, x2, w1, w2):
    """Pure-XLA reference (same semantics) for a correctness check."""
    x1u = bilinear_upsample_2x_align_corners(x1)
    diffY = x2.shape[2] - x1u.shape[2]
    diffX = x2.shape[3] - x1u.shape[3]
    x1u = jnp.pad(x1u, ((0, 0), (0, 0),
                        (diffY // 2, diffY - diffY // 2),
                        (diffX // 2, diffX - diffX // 2)))
    x = jnp.concatenate([x2, x1u], axis=1)

    def conv_lrelu(h, w):
        y = jax.lax.conv_general_dilated(
            h, w, window_strides=(1, 1), padding=((1, 1), (1, 1)),
            dimension_numbers=('NCHW', 'OIHW', 'NCHW'),
            precision=jax.lax.Precision.HIGHEST)
        return jnp.where(y > 0, y, 0.01 * y)

    return conv_lrelu(conv_lrelu(x, w1), w2)


if __name__ == "__main__":
    key = jax.random.PRNGKey(0)
    k1, k2, k3, k4 = jax.random.split(key, 4)

    in_ch, out_ch = 8, 4
    N, H, W = 2, 16, 16

    # x1: low-res decoder feature (in_ch//2 channels, half spatial size);
    # x2: skip connection (in_ch//2 channels, full spatial size).
    x1 = jax.random.normal(k1, (N, in_ch // 2, H // 2, W // 2), jnp.float32)
    x2 = jax.random.normal(k2, (N, in_ch // 2, H, W), jnp.float32)

    # Conv weights in PyTorch layout (Cout, Cin, 3, 3), no bias.
    w1 = jax.random.normal(k3, (out_ch, in_ch, 3, 3), jnp.float32) / jnp.sqrt(9.0 * in_ch)
    w2 = jax.random.normal(k4, (out_ch, out_ch, 3, 3), jnp.float32) / jnp.sqrt(9.0 * out_ch)

    out = jax.jit(up_forward)(x1, x2, w1, w2)
    jax.block_until_ready(out)
    assert out.shape == (N, out_ch, H, W), out.shape

    ref = jax.jit(_reference_up_forward)(x1, x2, w1, w2)
    jax.block_until_ready(ref)
    max_err = float(jnp.max(jnp.abs(out - ref)))
    assert max_err < 5e-3, f"max abs error vs reference: {max_err}"

    print("KERNEL_OK")
</pallas_src>

<mosaic_0001>
module attributes {stable_mosaic.version = 11 : i64} {
  func.func @kernel(%arg0: i32, %arg1: memref<2x4x256xf32, #tpu.memory_space<vmem>>, %arg2: memref<2x4x256xf32, #tpu.memory_space<vmem>>, %arg3: memref<4x72xf32, #tpu.memory_space<vmem>>, %arg4: memref<4x36xf32, #tpu.memory_space<vmem>>, %arg5: memref<2x4x256xf32, #tpu.memory_space<vmem>>) attributes {dimension_semantics = [#tpu.dimension_semantics<parallel>], iteration_bounds = array<i64: 1>, scalar_prefetch = 0 : i64, scratch_operands = 0 : i64, tpu.core_type = #tpu.core_type<tc>, window_params = [{transform_indices = @transform_0, window_bounds = array<i64: 2, 4, 256>}, {transform_indices = @transform_1, window_bounds = array<i64: 2, 4, 256>}, {pipeline_mode = #tpu.pipeline_mode<synchronous>, transform_indices = @transform_2, window_bounds = array<i64: 4, 72>}, {pipeline_mode = #tpu.pipeline_mode<synchronous>, transform_indices = @transform_3, window_bounds = array<i64: 4, 36>}, {transform_indices = @transform_4, window_bounds = array<i64: 2, 4, 256>}]} {
    %c0 = arith.constant 0 : index
    %c0_0 = arith.constant 0 : index
    %c0_1 = arith.constant 0 : index
    %0 = vector.load %arg1[%c0, %c0_0, %c0_1] : memref<2x4x256xf32, #tpu.memory_space<vmem>>, vector<1x4x256xf32>
    %1 = vector.shape_cast %0 : vector<1x4x256xf32> to vector<4x256xf32>
    %c0_2 = arith.constant 0 : index
    %c0_3 = arith.constant 0 : index
    %c0_4 = arith.constant 0 : index
    %2 = vector.load %arg2[%c0_2, %c0_3, %c0_4] : memref<2x4x256xf32, #tpu.memory_space<vmem>>, vector<1x4x256xf32>
    %3 = vector.shape_cast %2 : vector<1x4x256xf32> to vector<4x256xf32>
    %4 = tpu.concatenate %1, %3 in 0 : vector<4x256xf32>, vector<4x256xf32> -> vector<8x256xf32>
    %cst = arith.constant 0.000000e+00 : f32
    %5 = vector.broadcast %cst : f32 to vector<8x19xf32>
    %6 = vector.extract_strided_slice %4 {offsets = [0, 0], sizes = [8, 16], strides = [1, 1]} : vector<8x256xf32> to vector<8x16xf32>
    %cst_5 = arith.constant 0.000000e+00 : f32
    %7 = vector.broadcast %cst_5 : f32 to vector<8x2xf32>
    %8 = vector.extract_strided_slice %4 {offsets = [0, 16], sizes = [8, 16], strides = [1, 1]} : vector<8x256xf32> to vector<8x16xf32>
    %cst_6 = arith.constant 0.000000e+00 : f32
    %9 = vector.broadcast %cst_6 : f32 to vector<8x2xf32>
    %10 = vector.extract_strided_slice %4 {offsets = [0, 32], sizes = [8, 16], strides = [1, 1]} : vector<8x256xf32> to vector<8x16xf32>
    %cst_7 = arith.constant 0.000000e+00 : f32
    %11 = vector.broadcast %cst_7 : f32 to vector<8x2xf32>
    %12 = vector.extract_strided_slice %4 {offsets = [0, 48], sizes = [8, 16], strides = [1, 1]} : vector<8x256xf32> to vector<8x16xf32>
    %cst_8 = arith.constant 0.000000e+00 : f32
    %13 = vector.broadcast %cst_8 : f32 to vector<8x2xf32>
    %14 = vector.extract_strided_slice %4 {offsets = [0, 64], sizes = [8, 16], strides = [1, 1]} : vector<8x256xf32> to vector<8x16xf32>
    %cst_9 = arith.constant 0.000000e+00 : f32
    %15 = vector.broadcast %cst_9 : f32 to vector<8x2xf32>
    %16 = vector.extract_strided_slice %4 {offsets = [0, 80], sizes = [8, 16], strides = [1, 1]} : vector<8x256xf32> to vector<8x16xf32>
    %cst_10 = arith.constant 0.000000e+00 : f32
    %17 = vector.broadcast %cst_10 : f32 to vector<8x2xf32>
    %18 = vector.extract_strided_slice %4 {offsets = [0, 96], sizes = [8, 16], strides = [1, 1]} : vector<8x256xf32> to vector<8x16xf32>
    %cst_11 = arith.constant 0.000000e+00 : f32
    %19 = vector.broadcast %cst_11 : f32 to vector<8x2xf32>
    %20 = vector.extract_strided_slice %4 {offsets = [0, 112], sizes = [8, 16], strides = [1, 1]} : vector<8x256xf32> to vector<8x16xf32>
    %cst_12 = arith.constant 0.000000e+00 : f32
    %21 = vector.broadcast %cst_12 : f32 to vector<8x2xf32>
    %22 = vector.extract_strided_slice %4 {offsets = [0, 128], sizes = [8, 16], strides = [1, 1]} : vector<8x256xf32> to vector<8x16xf32>
    %cst_13 = arith.constant 0.000000e+00 : f32
    %23 = vector.broadcast %cst_13 : f32 to vector<8x2xf32>
    %24 = vector.extract_strided_slice %4 {offsets = [0, 144], sizes = [8, 16], strides = [1, 1]} : vector<8x256xf32> to vector<8x16xf32>
    %cst_14 = arith.constant 0.000000e+00 : f32
    %25 = vector.broadcast %cst_14 : f32 to vector<8x2xf32>
    %26 = vector.extract_strided_slice %4 {offsets = [0, 160], sizes = [8, 16], strides = [1, 1]} : vector<8x256xf32> to vector<8x16xf32>
    %cst_15 = arith.constant 0.000000e+00 : f32
    %27 = vector.broadcast %cst_15 : f32 to vector<8x2xf32>
    %28 = vector.extract_strided_slice %4 {offsets = [0, 176], sizes = [8, 16], strides = [1, 1]} : vector<8x256xf32> to vector<8x16xf32>
    %cst_16 = arith.constant 0.000000e+00 : f32
    %29 = vector.broadcast %cst_16 : f32 to vector<8x2xf32>
    %30 = vector.extract_strided_slice %4 {offsets = [0, 192], sizes = [8, 16], strides = [1, 1]} : vector<8x256xf32> to vector<8x16xf32>
    %cst_17 = arith.constant 0.000000e+00 : f32
    %31 = vector.broadcast %cst_17 : f32 to vector<8x2xf32>
    %32 = vector.extract_strided_slice %4 {offsets = [0, 208], sizes = [8, 16], strides = [1, 1]} : vector<8x256xf32> to vector<8x16xf32>
    %cst_18 = arith.constant 0.000000e+00 : f32
    %33 = vector.broadcast %cst_18 : f32 to vector<8x2xf32>
    %34 = vector.extract_strided_slice %4 {offsets = [0, 224], sizes = [8, 16], strides = [1, 1]} : vector<8x256xf32> to vector<8x16xf32>
    %cst_19 = arith.constant 0.000000e+00 : f32
    %35 = vector.broadcast %cst_19 : f32 to vector<8x2xf32>
    %36 = vector.extract_strided_slice %4 {offsets = [0, 240], sizes = [8, 16], strides = [1, 1]} : vector<8x256xf32> to vector<8x16xf32>
    %cst_20 = arith.constant 0.000000e+00 : f32
    %37 = vector.broadcast %cst_20 : f32 to vector<8x21xf32>
    %38 = tpu.concatenate %5, %6, %7, %8, %9, %10, %11, %12, %13, %14, %15, %16, %17, %18, %19, %20 in 1 : vector<8x19xf32>, vector<8x16xf32>, vector<8x2xf32>, vector<8x16xf32>, vector<8x2xf32>, vector<8x16xf32>, vector<8x2xf32>, vector<8x16xf32>, vector<8x2xf32>, vector<8x16xf32>, vector<8x2xf32>, vector<8x16xf32>, vector<8x2xf32>, vector<8x16xf32>, vector<8x2xf32>, vector<8x16xf32> -> vector<8x161xf32>
    %39 = tpu.concatenate %21, %22, %23, %24, %25, %26, %27, %28, %29, %30, %31, %32, %33, %34, %35, %36 in 1 : vector<8x2xf32>, vector<8x16xf32>, vector<8x2xf32>, vector<8x16xf32>, vector<8x2xf32>, vector<8x16xf32>, vector<8x2xf32>, vector<8x16xf32>, vector<8x2xf32>, vector<8x16xf32>, vector<8x2xf32>, vector<8x16xf32>, vector<8x2xf32>, vector<8x16xf32>, vector<8x2xf32>, vector<8x16xf32> -> vector<8x144xf32>
    %40 = tpu.concatenate %38, %39, %37 in 1 : vector<8x161xf32>, vector<8x144xf32>, vector<8x21xf32> -> vector<8x326xf32>
    %41 = vector.extract_strided_slice %40 {offsets = [0, 0], sizes = [8, 288], strides = [1, 1]} : vector<8x326xf32> to vector<8x288xf32>
    %42 = vector.extract_strided_slice %40 {offsets = [0, 1], sizes = [8, 288], strides = [1, 1]} : vector<8x326xf32> to vector<8x288xf32>
    %43 = vector.extract_strided_slice %40 {offsets = [0, 2], sizes = [8, 288], strides = [1, 1]} : vector<8x326xf32> to vector<8x288xf32>
    %44 = vector.extract_strided_slice %40 {offsets = [0, 18], sizes = [8, 288], strides = [1, 1]} : vector<8x326xf32> to vector<8x288xf32>
    %45 = vector.extract_strided_slice %40 {offsets = [0, 19], sizes = [8, 288], strides = [1, 1]} : vector<8x326xf32> to vector<8x288xf32>
    %46 = vector.extract_strided_slice %40 {offsets = [0, 20], sizes = [8, 288], strides = [1, 1]} : vector<8x326xf32> to vector<8x288xf32>
    %47 = vector.extract_strided_slice %40 {offsets = [0, 36], sizes = [8, 288], strides = [1, 1]} : vector<8x326xf32> to vector<8x288xf32>
    %48 = vector.extract_strided_slice %40 {offsets = [0, 37], sizes = [8, 288], strides = [1, 1]} : vector<8x326xf32> to vector<8x288xf32>
    %49 = vector.extract_strided_slice %40 {offsets = [0, 38], sizes = [8, 288], strides = [1, 1]} : vector<8x326xf32> to vector<8x288xf32>
    %50 = tpu.concatenate %41, %42, %43, %44, %45, %46, %47, %48, %49 in 0 : vector<8x288xf32>, vector<8x288xf32>, vector<8x288xf32>, vector<8x288xf32>, vector<8x288xf32>, vector<8x288xf32>, vector<8x288xf32>, vector<8x288xf32>, vector<8x288xf32> -> vector<72x288xf32>
    %c1 = arith.constant 1 : index
    %c0_21 = arith.constant 0 : index
    %c0_22 = arith.constant 0 : index
    %51 = vector.load %arg1[%c1, %c0_21, %c0_22] : memref<2x4x256xf32, #tpu.memory_space<vmem>>, vector<1x4x256xf32>
    %52 = vector.shape_cast %51 : vector<1x4x256xf32> to vector<4x256xf32>
    %c1_23 = arith.constant 1 : index
    %c0_24 = arith.constant 0 : index
    %c0_25 = arith.constant 0 : index
    %53 = vector.load %arg2[%c1_23, %c0_24, %c0_25] : memref<2x4x256xf32, #tpu.memory_space<vmem>>, vector<1x4x256xf32>
    %54 = vector.shape_cast %53 : vector<1x4x256xf32> to vector<4x256xf32>
    %55 = tpu.concatenate %52, %54 in 0 : vector<4x256xf32>, vector<4x256xf32> -> vector<8x256xf32>
    %cst_26 = arith.constant 0.000000e+00 : f32
    %56 = vector.broadcast %cst_26 : f32 to vector<8x19xf32>
    %57 = vector.extract_strided_slice %55 {offsets = [0, 0], sizes = [8, 16], strides = [1, 1]} : vector<8x256xf32> to vector<8x16xf32>
    %cst_27 = arith.constant 0.000000e+00 : f32
    %58 = vector.broadcast %cst_27 : f32 to vector<8x2xf32>
    %59 = vector.extract_strided_slice %55 {offsets = [0, 16], sizes = [8, 16], strides = [1, 1]} : vector<8x256xf32> to vector<8x16xf32>
    %cst_28 = arith.constant 0.000000e+00 : f32
    %60 = vector.broadcast %cst_28 : f32 to vector<8x2xf32>
    %61 = vector.extract_strided_slice %55 {offsets = [0, 32], sizes = [8, 16], strides = [1, 1]} : vector<8x256xf32> to vector<8x16xf32>
    %cst_29 = arith.constant 0.000000e+00 : f32
    %62 = vector.broadcast %cst_29 : f32 to vector<8x2xf32>
    %63 = vector.extract_strided_slice %55 {offsets = [0, 48], sizes = [8, 16], strides = [1, 1]} : vector<8x256xf32> to vector<8x16xf32>
    %cst_30 = arith.constant 0.000000e+00 : f32
    %64 = vector.broadcast %cst_30 : f32 to vector<8x2xf32>
    %65 = vector.extract_strided_slice %55 {offsets = [0, 64], sizes = [8, 16], strides = [1, 1]} : vector<8x256xf32> to vector<8x16xf32>
    %cst_31 = arith.constant 0.000000e+00 : f32
    %66 = vector.broadcast %cst_31 : f32 to vector<8x2xf32>
    %67 = vector.extract_strided_slice %55 {offsets = [0, 80], sizes = [8, 16], strides = [1, 1]} : vector<8x256xf32> to vector<8x16xf32>
    %cst_32 = arith.constant 0.000000e+00 : f32
    %68 = vector.broadcast %cst_32 : f32 to vector<8x2xf32>
    %69 = vector.extract_strided_slice %55 {offsets = [0, 96], sizes = [8, 16], strides = [1, 1]} : vector<8x256xf32> to vector<8x16xf32>
    %cst_33 = arith.constant 0.000000e+00 : f32
    %70 = vector.broadcast %cst_33 : f32 to vector<8x2xf32>
    %71 = vector.extract_strided_slice %55 {offsets = [0, 112], sizes = [8, 16], strides = [1, 1]} : vector<8x256xf32> to vector<8x16xf32>
    %cst_34 = arith.constant 0.000000e+00 : f32
    %72 = vector.broadcast %cst_34 : f32 to vector<8x2xf32>
    %73 = vector.extract_strided_slice %55 {offsets = [0, 128], sizes = [8, 16], strides = [1, 1]} : vector<8x256xf32> to vector<8x16xf32>
    %cst_35 = arith.constant 0.000000e+00 : f32
    %74 = vector.broadcast %cst_35 : f32 to vector<8x2xf32>
    %75 = vector.extract_strided_slice %55 {offsets = [0, 144], sizes = [8, 16], strides = [1, 1]} : vector<8x256xf32> to vector<8x16xf32>
    %cst_36 = arith.constant 0.000000e+00 : f32
    %76 = vector.broadcast %cst_36 : f32 to vector<8x2xf32>
    %77 = vector.extract_strided_slice %55 {offsets = [0, 160], sizes = [8, 16], strides = [1, 1]} : vector<8x256xf32> to vector<8x16xf32>
    %cst_37 = arith.constant 0.000000e+00 : f32
    %78 = vector.broadcast %cst_37 : f32 to vector<8x2xf32>
    %79 = vector.extract_strided_slice %55 {offsets = [0, 176], sizes = [8, 16], strides = [1, 1]} : vector<8x256xf32> to vector<8x16xf32>
    %cst_38 = arith.constant 0.000000e+00 : f32
    %80 = vector.broadcast %cst_38 : f32 to vector<8x2xf32>
    %81 = vector.extract_strided_slice %55 {offsets = [0, 192], sizes = [8, 16], strides = [1, 1]} : vector<8x256xf32> to vector<8x16xf32>
    %cst_39 = arith.constant 0.000000e+00 : f32
    %82 = vector.broadcast %cst_39 : f32 to vector<8x2xf32>
    %83 = vector.extract_strided_slice %55 {offsets = [0, 208], sizes = [8, 16], strides = [1, 1]} : vector<8x256xf32> to vector<8x16xf32>
    %cst_40 = arith.constant 0.000000e+00 : f32
    %84 = vector.broadcast %cst_40 : f32 to vector<8x2xf32>
    %85 = vector.extract_strided_slice %55 {offsets = [0, 224], sizes = [8, 16], strides = [1, 1]} : vector<8x256xf32> to vector<8x16xf32>
    %cst_41 = arith.constant 0.000000e+00 : f32
    %86 = vector.broadcast %cst_41 : f32 to vector<8x2xf32>
    %87 = vector.extract_strided_slice %55 {offsets = [0, 240], sizes = [8, 16], strides = [1, 1]} : vector<8x256xf32> to vector<8x16xf32>
    %cst_42 = arith.constant 0.000000e+00 : f32
    %88 = vector.broadcast %cst_42 : f32 to vector<8x21xf32>
    %89 = tpu.concatenate %56, %57, %58, %59, %60, %61, %62, %63, %64, %65, %66, %67, %68, %69, %70, %71 in 1 : vector<8x19xf32>, vector<8x16xf32>, vector<8x2xf32>, vector<8x16xf32>, vector<8x2xf32>, vector<8x16xf32>, vector<8x2xf32>, vector<8x16xf32>, vector<8x2xf32>, vector<8x16xf32>, vector<8x2xf32>, vector<8x16xf32>, vector<8x2xf32>, vector<8x16xf32>, vector<8x2xf32>, vector<8x16xf32> -> vector<8x161xf32>
    %90 = tpu.concatenate %72, %73, %74, %75, %76, %77, %78, %79, %80, %81, %82, %83, %84, %85, %86, %87 in 1 : vector<8x2xf32>, vector<8x16xf32>, vector<8x2xf32>, vector<8x16xf32>, vector<8x2xf32>, vector<8x16xf32>, vector<8x2xf32>, vector<8x16xf32>, vector<8x2xf32>, vector<8x16xf32>, vector<8x2xf32>, vector<8x16xf32>, vector<8x2xf32>, vector<8x16xf32>, vector<8x2xf32>, vector<8x16xf32> -> vector<8x144xf32>
    %91 = tpu.concatenate %89, %90, %88 in 1 : vector<8x161xf32>, vector<8x144xf32>, vector<8x21xf32> -> vector<8x326xf32>
    %92 = vector.extract_strided_slice %91 {offsets = [0, 0], sizes = [8, 288], strides = [1, 1]} : vector<8x326xf32> to vector<8x288xf32>
    %93 = vector.extract_strided_slice %91 {offsets = [0, 1], sizes = [8, 288], strides = [1, 1]} : vector<8x326xf32> to vector<8x288xf32>
    %94 = vector.extract_strided_slice %91 {offsets = [0, 2], sizes = [8, 288], strides = [1, 1]} : vector<8x326xf32> to vector<8x288xf32>
    %95 = vector.extract_strided_slice %91 {offsets = [0, 18], sizes = [8, 288], strides = [1, 1]} : vector<8x326xf32> to vector<8x288xf32>
    %96 = vector.extract_strided_slice %91 {offsets = [0, 19], sizes = [8, 288], strides = [1, 1]} : vector<8x326xf32> to vector<8x288xf32>
    %97 = vector.extract_strided_slice %91 {offsets = [0, 20], sizes = [8, 288], strides = [1, 1]} : vector<8x326xf32> to vector<8x288xf32>
    %98 = vector.extract_strided_slice %91 {offsets = [0, 36], sizes = [8, 288], strides = [1, 1]} : vector<8x326xf32> to vector<8x288xf32>
    %99 = vector.extract_strided_slice %91 {offsets = [0, 37], sizes = [8, 288], strides = [1, 1]} : vector<8x326xf32> to vector<8x288xf32>
    %100 = vector.extract_strided_slice %91 {offsets = [0, 38], sizes = [8, 288], strides = [1, 1]} : vector<8x326xf32> to vector<8x288xf32>
    %101 = tpu.concatenate %92, %93, %94, %95, %96, %97, %98, %99, %100 in 0 : vector<8x288xf32>, vector<8x288xf32>, vector<8x288xf32>, vector<8x288xf32>, vector<8x288xf32>, vector<8x288xf32>, vector<8x288xf32>, vector<8x288xf32>, vector<8x288xf32> -> vector<72x288xf32>
    %c0_43 = arith.constant 0 : index
    %c0_44 = arith.constant 0 : index
    %102 = vector.load %arg3[%c0_43, %c0_44] : memref<4x72xf32, #tpu.memory_space<vmem>>, vector<4x72xf32>
    %103 = tpu.concatenate %50, %101 in 1 : vector<72x288xf32>, vector<72x288xf32> -> vector<72x576xf32>
    %cst_45 = arith.constant dense<0.000000e+00> : vector<4x576xf32>
    %104 = tpu.matmul %102, %103, %cst_45 {dimension_numbers = #tpu.dot_dimension_numbers<[1], [0], [0], [1], [0, 0, 1, 1], [], []>, precision = #tpu.contract_precision<fp32>} : vector<4x72xf32>, vector<72x576xf32>, vector<4x576xf32> -> vector<4x576xf32>
    %cst_46 = arith.constant 0.000000e+00 : f32
    %105 = vector.broadcast %cst_46 : f32 to vector<4x576xf32>
    %106 = arith.cmpf ogt, %104, %105 : vector<4x576xf32>
    %cst_47 = arith.constant 0.00999999977 : f32
    %107 = vector.broadcast %cst_47 : f32 to vector<4x576xf32>
    %108 = arith.mulf %107, %104 : vector<4x576xf32>
    %109 = arith.select %106, %104, %108 : vector<4x576xi1>, vector<4x576xf32>
    %110 = vector.extract_strided_slice %109 {offsets = [0, 0], sizes = [4, 288], strides = [1, 1]} : vector<4x576xf32> to vector<4x288xf32>
    %cst_48 = arith.constant 0.000000e+00 : f32
    %111 = vector.broadcast %cst_48 : f32 to vector<4x19xf32>
    %112 = vector.extract_strided_slice %110 {offsets = [0, 0], sizes = [4, 16], strides = [1, 1]} : vector<4x288xf32> to vector<4x16xf32>
    %cst_49 = arith.constant 0.000000e+00 : f32
    %113 = vector.broadcast %cst_49 : f32 to vector<4x2xf32>
    %114 = vector.extract_strided_slice %110 {offsets = [0, 18], sizes = [4, 16], strides = [1, 1]} : vector<4x288xf32> to vector<4x16xf32>
    %cst_50 = arith.constant 0.000000e+00 : f32
    %115 = vector.broadcast %cst_50 : f32 to vector<4x2xf32>
    %116 = vector.extract_strided_slice %110 {offsets = [0, 36], sizes = [4, 16], strides = [1, 1]} : vector<4x288xf32> to vector<4x16xf32>
    %cst_51 = arith.constant 0.000000e+00 : f32
    %117 = vector.broadcast %cst_51 : f32 to vector<4x2xf32>
    %118 = vector.extract_strided_slice %110 {offsets = [0, 54], sizes = [4, 16], strides = [1, 1]} : vector<4x288xf32> to vector<4x16xf32>
    %cst_52 = arith.constant 0.000000e+00 : f32
    %119 = vector.broadcast %cst_52 : f32 to vector<4x2xf32>
    %120 = vector.extract_strided_slice %110 {offsets = [0, 72], sizes = [4, 16], strides = [1, 1]} : vector<4x288xf32> to vector<4x16xf32>
    %cst_53 = arith.constant 0.000000e+00 : f32
    %121 = vector.broadcast %cst_53 : f32 to vector<4x2xf32>
    %122 = vector.extract_strided_slice %110 {offsets = [0, 90], sizes = [4, 16], strides = [1, 1]} : vector<4x288xf32> to vector<4x16xf32>
    %cst_54 = arith.constant 0.000000e+00 : f32
    %123 = vector.broadcast %cst_54 : f32 to vector<4x2xf32>
    %124 = vector.extract_strided_slice %110 {offsets = [0, 108], sizes = [4, 16], strides = [1, 1]} : vector<4x288xf32> to vector<4x16xf32>
    %cst_55 = arith.constant 0.000000e+00 : f32
    %125 = vector.broadcast %cst_55 : f32 to vector<4x2xf32>
    %126 = vector.extract_strided_slice %110 {offsets = [0, 126], sizes = [4, 16], strides = [1, 1]} : vector<4x288xf32> to vector<4x16xf32>
    %cst_56 = arith.constant 0.000000e+00 : f32
    %127 = vector.broadcast %cst_56 : f32 to vector<4x2xf32>
    %128 = vector.extract_strided_slice %110 {offsets = [0, 144], sizes = [4, 16], strides = [1, 1]} : vector<4x288xf32> to vector<4x16xf32>
    %cst_57 = arith.constant 0.000000e+00 : f32
    %129 = vector.broadcast %cst_57 : f32 to vector<4x2xf32>
    %130 = vector.extract_strided_slice %110 {offsets = [0, 162], sizes = [4, 16], strides = [1, 1]} : vector<4x288xf32> to vector<4x16xf32>
    %cst_58 = arith.constant 0.000000e+00 : f32
    %131 = vector.broadcast %cst_58 : f32 to vector<4x2xf32>
    %132 = vector.extract_strided_slice %110 {offsets = [0, 180], sizes = [4, 16], strides = [1, 1]} : vector<4x288xf32> to vector<4x16xf32>
    %cst_59 = arith.constant 0.000000e+00 : f32
    %133 = vector.broadcast %cst_59 : f32 to vector<4x2xf32>
    %134 = vector.extract_strided_slice %110 {offsets = [0, 198], sizes = [4, 16], strides = [1, 1]} : vector<4x288xf32> to vector<4x16xf32>
    %cst_60 = arith.constant 0.000000e+00 : f32
    %135 = vector.broadcast %cst_60 : f32 to vector<4x2xf32>
    %136 = vector.extract_strided_slice %110 {offsets = [0, 216], sizes = [4, 16], strides = [1, 1]} : vector<4x288xf32> to vector<4x16xf32>
    %cst_61 = arith.constant 0.000000e+00 : f32
    %137 = vector.broadcast %cst_61 : f32 to vector<4x2xf32>
    %138 = vector.extract_strided_slice %110 {offsets = [0, 234], sizes = [4, 16], strides = [1, 1]} : vector<4x288xf32> to vector<4x16xf32>
    %cst_62 = arith.constant 0.000000e+00 : f32
    %139 = vector.broadcast %cst_62 : f32 to vector<4x2xf32>
    %140 = vector.extract_strided_slice %110 {offsets = [0, 252], sizes = [4, 16], strides = [1, 1]} : vector<4x288xf32> to vector<4x16xf32>
    %cst_63 = arith.constant 0.000000e+00 : f32
    %141 = vector.broadcast %cst_63 : f32 to vector<4x2xf32>
    %142 = vector.extract_strided_slice %110 {offsets = [0, 270], sizes = [4, 16], strides = [1, 1]} : vector<4x288xf32> to vector<4x16xf32>
    %cst_64 = arith.constant 0.000000e+00 : f32
    %143 = vector.broadcast %cst_64 : f32 to vector<4x21xf32>
    %144 = tpu.concatenate %111, %112, %113, %114, %115, %116, %117, %118, %119, %120, %121, %122, %123, %124, %125, %126 in 1 : vector<4x19xf32>, vector<4x16xf32>, vector<4x2xf32>, vector<4x16xf32>, vector<4x2xf32>, vector<4x16xf32>, vector<4x2xf32>, vector<4x16xf32>, vector<4x2xf32>, vector<4x16xf32>, vector<4x2xf32>, vector<4x16xf32>, vector<4x2xf32>, vector<4x16xf32>, vector<4x2xf32>, vector<4x16xf32> -> vector<4x161xf32>
    %145 = tpu.concatenate %127, %128, %129, %130, %131, %132, %133, %134, %135, %136, %137, %138, %139, %140, %141, %142 in 1 : vector<4x2xf32>, vector<4x16xf32>, vector<4x2xf32>, vector<4x16xf32>, vector<4x2xf32>, vector<4x16xf32>, vector<4x2xf32>, vector<4x16xf32>, vector<4x2xf32>, vector<4x16xf32>, vector<4x2xf32>, vector<4x16xf32>, vector<4x2xf32>, vector<4x16xf32>, vector<4x2xf32>, vector<4x16xf32> -> vector<4x144xf32>
    %146 = tpu.concatenate %144, %145, %143 in 1 : vector<4x161xf32>, vector<4x144xf32>, vector<4x21xf32> -> vector<4x326xf32>
    %147 = vector.extract_strided_slice %146 {offsets = [0, 0], sizes = [4, 288], strides = [1, 1]} : vector<4x326xf32> to vector<4x288xf32>
    %148 = vector.extract_strided_slice %146 {offsets = [0, 1], sizes = [4, 288], strides = [1, 1]} : vector<4x326xf32> to vector<4x288xf32>
    %149 = vector.extract_strided_slice %146 {offsets = [0, 2], sizes = [4, 288], strides = [1, 1]} : vector<4x326xf32> to vector<4x288xf32>
    %150 = vector.extract_strided_slice %146 {offsets = [0, 18], sizes = [4, 288], strides = [1, 1]} : vector<4x326xf32> to vector<4x288xf32>
    %151 = vector.extract_strided_slice %146 {offsets = [0, 19], sizes = [4, 288], strides = [1, 1]} : vector<4x326xf32> to vector<4x288xf32>
    %152 = vector.extract_strided_slice %146 {offsets = [0, 20], sizes = [4, 288], strides = [1, 1]} : vector<4x326xf32> to vector<4x288xf32>
    %153 = vector.extract_strided_slice %146 {offsets = [0, 36], sizes = [4, 288], strides = [1, 1]} : vector<4x326xf32> to vector<4x288xf32>
    %154 = vector.extract_strided_slice %146 {offsets = [0, 37], sizes = [4, 288], strides = [1, 1]} : vector<4x326xf32> to vector<4x288xf32>
    %155 = vector.extract_strided_slice %146 {offsets = [0, 38], sizes = [4, 288], strides = [1, 1]} : vector<4x326xf32> to vector<4x288xf32>
    %156 = tpu.concatenate %147, %148, %149, %150, %151, %152, %153, %154, %155 in 0 : vector<4x288xf32>, vector<4x288xf32>, vector<4x288xf32>, vector<4x288xf32>, vector<4x288xf32>, vector<4x288xf32>, vector<4x288xf32>, vector<4x288xf32>, vector<4x288xf32> -> vector<36x288xf32>
    %157 = vector.extract_strided_slice %109 {offsets = [0, 288], sizes = [4, 288], strides = [1, 1]} : vector<4x576xf32> to vector<4x288xf32>
    %cst_65 = arith.constant 0.000000e+00 : f32
    %158 = vector.broadcast %cst_65 : f32 to vector<4x19xf32>
    %159 = vector.extract_strided_slice %157 {offsets = [0, 0], sizes = [4, 16], strides = [1, 1]} : vector<4x288xf32> to vector<4x16xf32>
    %cst_66 = arith.constant 0.000000e+00 : f32
    %160 = vector.broadcast %cst_66 : f32 to vector<4x2xf32>
    %161 = vector.extract_strided_slice %157 {offsets = [0, 18], sizes = [4, 16], strides = [1, 1]} : vector<4x288xf32> to vector<4x16xf32>
    %cst_67 = arith.constant 0.000000e+00 : f32
    %162 = vector.broadcast %cst_67 : f32 to vector<4x2xf32>
    %163 = vector.extract_strided_slice %157 {offsets = [0, 36], sizes = [4, 16], strides = [1, 1]} : vector<4x288xf32> to vector<4x16xf32>
    %cst_68 = arith.constant 0.000000e+00 : f32
    %164 = vector.broadcast %cst_68 : f32 to vector<4x2xf32>
    %165 = vector.extract_strided_slice %157 {offsets = [0, 54], sizes = [4, 16], strides = [1, 1]} : vector<4x288xf32> to vector<4x16xf32>
    %cst_69 = arith.constant 0.000000e+00 : f32
    %166 = vector.broadcast %cst_69 : f32 to vector<4x2xf32>
    %167 = vector.extract_strided_slice %157 {offsets = [0, 72], sizes = [4, 16], strides = [1, 1]} : vector<4x288xf32> to vector<4x16xf32>
    %cst_70 = arith.constant 0.000000e+00 : f32
    %168 = vector.broadcast %cst_70 : f32 to vector<4x2xf32>
    %169 = vector.extract_strided_slice %157 {offsets = [0, 90], sizes = [4, 16], strides = [1, 1]} : vector<4x288xf32> to vector<4x16xf32>
    %cst_71 = arith.constant 0.000000e+00 : f32
    %170 = vector.broadcast %cst_71 : f32 to vector<4x2xf32>
    %171 = vector.extract_strided_slice %157 {offsets = [0, 108], sizes = [4, 16], strides = [1, 1]} : vector<4x288xf32> to vector<4x16xf32>
    %cst_72 = arith.constant 0.000000e+00 : f32
    %172 = vector.broadcast %cst_72 : f32 to vector<4x2xf32>
    %173 = vector.extract_strided_slice %157 {offsets = [0, 126], sizes = [4, 16], strides = [1, 1]} : vector<4x288xf32> to vector<4x16xf32>
    %cst_73 = arith.constant 0.000000e+00 : f32
    %174 = vector.broadcast %cst_73 : f32 to vector<4x2xf32>
    %175 = vector.extract_strided_slice %157 {offsets = [0, 144], sizes = [4, 16], strides = [1, 1]} : vector<4x288xf32> to vector<4x16xf32>
    %cst_74 = arith.constant 0.000000e+00 : f32
    %176 = vector.broadcast %cst_74 : f32 to vector<4x2xf32>
    %177 = vector.extract_strided_slice %157 {offsets = [0, 162], sizes = [4, 16], strides = [1, 1]} : vector<4x288xf32> to vector<4x16xf32>
    %cst_75 = arith.constant 0.000000e+00 : f32
    %178 = vector.broadcast %cst_75 : f32 to vector<4x2xf32>
    %179 = vector.extract_strided_slice %157 {offsets = [0, 180], sizes = [4, 16], strides = [1, 1]} : vector<4x288xf32> to vector<4x16xf32>
    %cst_76 = arith.constant 0.000000e+00 : f32
    %180 = vector.broadcast %cst_76 : f32 to vector<4x2xf32>
    %181 = vector.extract_strided_slice %157 {offsets = [0, 198], sizes = [4, 16], strides = [1, 1]} : vector<4x288xf32> to vector<4x16xf32>
    %cst_77 = arith.constant 0.000000e+00 : f32
    %182 = vector.broadcast %cst_77 : f32 to vector<4x2xf32>
    %183 = vector.extract_strided_slice %157 {offsets = [0, 216], sizes = [4, 16], strides = [1, 1]} : vector<4x288xf32> to vector<4x16xf32>
    %cst_78 = arith.constant 0.000000e+00 : f32
    %184 = vector.broadcast %cst_78 : f32 to vector<4x2xf32>
    %185 = vector.extract_strided_slice %157 {offsets = [0, 234], sizes = [4, 16], strides = [1, 1]} : vector<4x288xf32> to vector<4x16xf32>
    %cst_79 = arith.constant 0.000000e+00 : f32
    %186 = vector.broadcast %cst_79 : f32 to vector<4x2xf32>
    %187 = vector.extract_strided_slice %157 {offsets = [0, 252], sizes = [4, 16], strides = [1, 1]} : vector<4x288xf32> to vector<4x16xf32>
    %cst_80 = arith.constant 0.000000e+00 : f32
    %188 = vector.broadcast %cst_80 : f32 to vector<4x2xf32>
    %189 = vector.extract_strided_slice %157 {offsets = [0, 270], sizes = [4, 16], strides = [1, 1]} : vector<4x288xf32> to vector<4x16xf32>
    %cst_81 = arith.constant 0.000000e+00 : f32
    %190 = vector.broadcast %cst_81 : f32 to vector<4x21xf32>
    %191 = tpu.concatenate %158, %159, %160, %161, %162, %163, %164, %165, %166, %167, %168, %169, %170, %171, %172, %173 in 1 : vector<4x19xf32>, vector<4x16xf32>, vector<4x2xf32>, vector<4x16xf32>, vector<4x2xf32>, vector<4x16xf32>, vector<4x2xf32>, vector<4x16xf32>, vector<4x2xf32>, vector<4x16xf32>, vector<4x2xf32>, vector<4x16xf32>, vector<4x2xf32>, vector<4x16xf32>, vector<4x2xf32>, vector<4x16xf32> -> vector<4x161xf32>
    %192 = tpu.concatenate %174, %175, %176, %177, %178, %179, %180, %181, %182, %183, %184, %185, %186, %187, %188, %189 in 1 : vector<4x2xf32>, vector<4x16xf32>, vector<4x2xf32>, vector<4x16xf32>, vector<4x2xf32>, vector<4x16xf32>, vector<4x2xf32>, vector<4x16xf32>, vector<4x2xf32>, vector<4x16xf32>, vector<4x2xf32>, vector<4x16xf32>, vector<4x2xf32>, vector<4x16xf32>, vector<4x2xf32>, vector<4x16xf32> -> vector<4x144xf32>
    %193 = tpu.concatenate %191, %192, %190 in 1 : vector<4x161xf32>, vector<4x144xf32>, vector<4x21xf32> -> vector<4x326xf32>
    %194 = vector.extract_strided_slice %193 {offsets = [0, 0], sizes = [4, 288], strides = [1, 1]} : vector<4x326xf32> to vector<4x288xf32>
    %195 = vector.extract_strided_slice %193 {offsets = [0, 1], sizes = [4, 288], strides = [1, 1]} : vector<4x326xf32> to vector<4x288xf32>
    %196 = vector.extract_strided_slice %193 {offsets = [0, 2], sizes = [4, 288], strides = [1, 1]} : vector<4x326xf32> to vector<4x288xf32>
    %197 = vector.extract_strided_slice %193 {offsets = [0, 18], sizes = [4, 288], strides = [1, 1]} : vector<4x326xf32> to vector<4x288xf32>
    %198 = vector.extract_strided_slice %193 {offsets = [0, 19], sizes = [4, 288], strides = [1, 1]} : vector<4x326xf32> to vector<4x288xf32>
    %199 = vector.extract_strided_slice %193 {offsets = [0, 20], sizes = [4, 288], strides = [1, 1]} : vector<4x326xf32> to vector<4x288xf32>
    %200 = vector.extract_strided_slice %193 {offsets = [0, 36], sizes = [4, 288], strides = [1, 1]} : vector<4x326xf32> to vector<4x288xf32>
    %201 = vector.extract_strided_slice %193 {offsets = [0, 37], sizes = [4, 288], strides = [1, 1]} : vector<4x326xf32> to vector<4x288xf32>
    %202 = vector.extract_strided_slice %193 {offsets = [0, 38], sizes = [4, 288], strides = [1, 1]} : vector<4x326xf32> to vector<4x288xf32>
    %203 = tpu.concatenate %194, %195, %196, %197, %198, %199, %200, %201, %202 in 0 : vector<4x288xf32>, vector<4x288xf32>, vector<4x288xf32>, vector<4x288xf32>, vector<4x288xf32>, vector<4x288xf32>, vector<4x288xf32>, vector<4x288xf32>, vector<4x288xf32> -> vector<36x288xf32>
    %c0_82 = arith.constant 0 : index
    %c0_83 = arith.constant 0 : index
    %204 = vector.load %arg4[%c0_82, %c0_83] : memref<4x36xf32, #tpu.memory_space<vmem>>, vector<4x36xf32>
    %205 = tpu.concatenate %156, %203 in 1 : vector<36x288xf32>, vector<36x288xf32> -> vector<36x576xf32>
    %cst_84 = arith.constant dense<0.000000e+00> : vector<4x576xf32>
    %206 = tpu.matmul %204, %205, %cst_84 {dimension_numbers = #tpu.dot_dimension_numbers<[1], [0], [0], [1], [0, 0, 1, 1], [], []>, precision = #tpu.contract_precision<fp32>} : vector<4x36xf32>, vector<36x576xf32>, vector<4x576xf32> -> vector<4x576xf32>
    %cst_85 = arith.constant 0.000000e+00 : f32
    %207 = vector.broadcast %cst_85 : f32 to vector<4x576xf32>
    %208 = arith.cmpf ogt, %206, %207 : vector<4x576xf32>
    %cst_86 = arith.constant 0.00999999977 : f32
    %209 = vector.broadcast %cst_86 : f32 to vector<4x576xf32>
    %210 = arith.mulf %209, %206 : vector<4x576xf32>
    %211 = arith.select %208, %206, %210 : vector<4x576xi1>, vector<4x576xf32>
    %212 = vector.extract_strided_slice %211 {offsets = [0, 0], sizes = [4, 288], strides = [1, 1]} : vector<4x576xf32> to vector<4x288xf32>
    %213 = vector.extract_strided_slice %212 {offsets = [0, 0], sizes = [4, 16], strides = [1, 1]} : vector<4x288xf32> to vector<4x16xf32>
    %214 = vector.extract_strided_slice %212 {offsets = [0, 18], sizes = [4, 16], strides = [1, 1]} : vector<4x288xf32> to vector<4x16xf32>
    %215 = vector.extract_strided_slice %212 {offsets = [0, 36], sizes = [4, 16], strides = [1, 1]} : vector<4x288xf32> to vector<4x16xf32>
    %216 = vector.extract_strided_slice %212 {offsets = [0, 54], sizes = [4, 16], strides = [1, 1]} : vector<4x288xf32> to vector<4x16xf32>
    %217 = vector.extract_strided_slice %212 {offsets = [0, 72], sizes = [4, 16], strides = [1, 1]} : vector<4x288xf32> to vector<4x16xf32>
    %218 = vector.extract_strided_slice %212 {offsets = [0, 90], sizes = [4, 16], strides = [1, 1]} : vector<4x288xf32> to vector<4x16xf32>
    %219 = vector.extract_strided_slice %212 {offsets = [0, 108], sizes = [4, 16], strides = [1, 1]} : vector<4x288xf32> to vector<4x16xf32>
    %220 = vector.extract_strided_slice %212 {offsets = [0, 126], sizes = [4, 16], strides = [1, 1]} : vector<4x288xf32> to vector<4x16xf32>
    %221 = vector.extract_strided_slice %212 {offsets = [0, 144], sizes = [4, 16], strides = [1, 1]} : vector<4x288xf32> to vector<4x16xf32>
    %222 = vector.extract_strided_slice %212 {offsets = [0, 162], sizes = [4, 16], strides = [1, 1]} : vector<4x288xf32> to vector<4x16xf32>
    %223 = vector.extract_strided_slice %212 {offsets = [0, 180], sizes = [4, 16], strides = [1, 1]} : vector<4x288xf32> to vector<4x16xf32>
    %224 = vector.extract_strided_slice %212 {offsets = [0, 198], sizes = [4, 16], strides = [1, 1]} : vector<4x288xf32> to vector<4x16xf32>
    %225 = vector.extract_strided_slice %212 {offsets = [0, 216], sizes = [4, 16], strides = [1, 1]} : vector<4x288xf32> to vector<4x16xf32>
    %226 = vector.extract_strided_slice %212 {offsets = [0, 234], sizes = [4, 16], strides = [1, 1]} : vector<4x288xf32> to vector<4x16xf32>
    %227 = vector.extract_strided_slice %212 {offsets = [0, 252], sizes = [4, 16], strides = [1, 1]} : vector<4x288xf32> to vector<4x16xf32>
    %228 = vector.extract_strided_slice %212 {offsets = [0, 270], sizes = [4, 16], strides = [1, 1]} : vector<4x288xf32> to vector<4x16xf32>
    %229 = tpu.concatenate %213, %214, %215, %216, %217, %218, %219, %220, %221, %222, %223, %224, %225, %226, %227, %228 in 1 : vector<4x16xf32>, vector<4x16xf32>, vector<4x16xf32>, vector<4x16xf32>, vector<4x16xf32>, vector<4x16xf32>, vector<4x16xf32>, vector<4x16xf32>, vector<4x16xf32>, vector<4x16xf32>, vector<4x16xf32>, vector<4x16xf32>, vector<4x16xf32>, vector<4x16xf32>, vector<4x16xf32>, vector<4x16xf32> -> vector<4x256xf32>
    %c0_87 = arith.constant 0 : index
    %c0_88 = arith.constant 0 : index
    %c0_89 = arith.constant 0 : index
    %230 = vector.load %arg5[%c0_87, %c0_88, %c0_89] : memref<2x4x256xf32, #tpu.memory_space<vmem>>, vector<1x4x256xf32>
    %231 = vector.shape_cast %230 : vector<1x4x256xf32> to vector<4x256xf32>
    %232 = vector.shape_cast %229 : vector<4x256xf32> to vector<1x4x256xf32>
    tpu.vector_store %arg5[%c0_87, %c0_88, %c0_89], %232 {strides = array<i32>} : memref<2x4x256xf32, #tpu.memory_space<vmem>>, vector<1x4x256xf32>,
    %233 = vector.extract_strided_slice %211 {offsets = [0, 288], sizes = [4, 288], strides = [1, 1]} : vector<4x576xf32> to vector<4x288xf32>
    %234 = vector.extract_strided_slice %233 {offsets = [0, 0], sizes = [4, 16], strides = [1, 1]} : vector<4x288xf32> to vector<4x16xf32>
    %235 = vector.extract_strided_slice %233 {offsets = [0, 18], sizes = [4, 16], strides = [1, 1]} : vector<4x288xf32> to vector<4x16xf32>
    %236 = vector.extract_strided_slice %233 {offsets = [0, 36], sizes = [4, 16], strides = [1, 1]} : vector<4x288xf32> to vector<4x16xf32>
    %237 = vector.extract_strided_slice %233 {offsets = [0, 54], sizes = [4, 16], strides = [1, 1]} : vector<4x288xf32> to vector<4x16xf32>
    %238 = vector.extract_strided_slice %233 {offsets = [0, 72], sizes = [4, 16], strides = [1, 1]} : vector<4x288xf32> to vector<4x16xf32>
    %239 = vector.extract_strided_slice %233 {offsets = [0, 90], sizes = [4, 16], strides = [1, 1]} : vector<4x288xf32> to vector<4x16xf32>
    %240 = vector.extract_strided_slice %233 {offsets = [0, 108], sizes = [4, 16], strides = [1, 1]} : vector<4x288xf32> to vector<4x16xf32>
    %241 = vector.extract_strided_slice %233 {offsets = [0, 126], sizes = [4, 16], strides = [1, 1]} : vector<4x288xf32> to vector<4x16xf32>
    %242 = vector.extract_strided_slice %233 {offsets = [0, 144], sizes = [4, 16], strides = [1, 1]} : vector<4x288xf32> to vector<4x16xf32>
    %243 = vector.extract_strided_slice %233 {offsets = [0, 162], sizes = [4, 16], strides = [1, 1]} : vector<4x288xf32> to vector<4x16xf32>
    %244 = vector.extract_strided_slice %233 {offsets = [0, 180], sizes = [4, 16], strides = [1, 1]} : vector<4x288xf32> to vector<4x16xf32>
    %245 = vector.extract_strided_slice %233 {offsets = [0, 198], sizes = [4, 16], strides = [1, 1]} : vector<4x288xf32> to vector<4x16xf32>
    %246 = vector.extract_strided_slice %233 {offsets = [0, 216], sizes = [4, 16], strides = [1, 1]} : vector<4x288xf32> to vector<4x16xf32>
    %247 = vector.extract_strided_slice %233 {offsets = [0, 234], sizes = [4, 16], strides = [1, 1]} : vector<4x288xf32> to vector<4x16xf32>
    %248 = vector.extract_strided_slice %233 {offsets = [0, 252], sizes = [4, 16], strides = [1, 1]} : vector<4x288xf32> to vector<4x16xf32>
    %249 = vector.extract_strided_slice %233 {offsets = [0, 270], sizes = [4, 16], strides = [1, 1]} : vector<4x288xf32> to vector<4x16xf32>
    %250 = tpu.concatenate %234, %235, %236, %237, %238, %239, %240, %241, %242, %243, %244, %245, %246, %247, %248, %249 in 1 : vector<4x16xf32>, vector<4x16xf32>, vector<4x16xf32>, vector<4x16xf32>, vector<4x16xf32>, vector<4x16xf32>, vector<4x16xf32>, vector<4x16xf32>, vector<4x16xf32>, vector<4x16xf32>, vector<4x16xf32>, vector<4x16xf32>, vector<4x16xf32>, vector<4x16xf32>, vector<4x16xf32>, vector<4x16xf32> -> vector<4x256xf32>
    %c1_90 = arith.constant 1 : index
    %c0_91 = arith.constant 0 : index
    %c0_92 = arith.constant 0 : index
    %251 = vector.load %arg5[%c1_90, %c0_91, %c0_92] : memref<2x4x256xf32, #tpu.memory_space<vmem>>, vector<1x4x256xf32>
    %252 = vector.shape_cast %251 : vector<1x4x256xf32> to vector<4x256xf32>
    %253 = vector.shape_cast %250 : vector<4x256xf32> to vector<1x4x256xf32>
    tpu.vector_store %arg5[%c1_90, %c0_91, %c0_92], %253 {strides = array<i32>} : memref<2x4x256xf32, #tpu.memory_space<vmem>>, vector<1x4x256xf32>,
    return
  }
  func.func @transform_0(%arg0: i32) -> (i32, i32, i32) {
    %c0_i32 = arith.constant 0 : i32
    %c0_i32_0 = arith.constant 0 : i32
    %c0_i32_1 = arith.constant 0 : i32
    return %arg0, %c0_i32, %c0_i32_0 : i32, i32, i32
  }
  func.func @transform_1(%arg0: i32) -> (i32, i32, i32) {
    %c0_i32 = arith.constant 0 : i32
    %c0_i32_0 = arith.constant 0 : i32
    %c0_i32_1 = arith.constant 0 : i32
    return %arg0, %c0_i32, %c0_i32_0 : i32, i32, i32
  }
  func.func @transform_2(%arg0: i32) -> (i32, i32) {
    %c0_i32 = arith.constant 0 : i32
    %c0_i32_0 = arith.constant 0 : i32
    %c0_i32_1 = arith.constant 0 : i32
    return %c0_i32, %c0_i32_0 : i32, i32
  }
  func.func @transform_3(%arg0: i32) -> (i32, i32) {
    %c0_i32 = arith.constant 0 : i32
    %c0_i32_0 = arith.constant 0 : i32
    %c0_i32_1 = arith.constant 0 : i32
    return %c0_i32, %c0_i32_0 : i32, i32
  }
  func.func @transform_4(%arg0: i32) -> (i32, i32, i32) {
    %c0_i32 = arith.constant 0 : i32
    %c0_i32_0 = arith.constant 0 : i32
    %c0_i32_1 = arith.constant 0 : i32
    return %arg0, %c0_i32, %c0_i32_0 : i32, i32, i32
  }
}

</mosaic_0001>

<bundles_post_ra>
// kernel: up_forward.1
= control target key start
LH: loop header
LB: loop body
LE: loop exit
PB: predicated region body
PF: predicated region fallthrough
CT: control target
= control target key end

     0   :  { %vm7534_vm0 = vcmask 1043456   ;;  %s5466_s19 = smov 2   ;;  %s5467_s20 = smov 6   ;;  %vm7536_vm1 = vcmask 15360   ;;  %vm7538_vm2 = vcmask 146432   ;;  %vm7539_vm3 = vcmask 162816   ;;  %s7529_s0 = inlined_call_operand.vmem [shape: f32[2,4,256], index: 0, kind: input, shape index: {}]   ;;  %s7530_s1 = inlined_call_operand.vmem [shape: f32[2,4,256], index: 1, kind: input, shape index: {}]   ;;  %s7531_s2 = inlined_call_operand.vmem [shape: f32[4,72], index: 2, kind: input, shape index: {}]   ;;  %s7532_s3 = inlined_call_operand.vmem [shape: f32[4,36], index: 3, kind: input, shape index: {}]   ;;  %s7533_s4 = inlined_call_operand.vmem [shape: f32[2,4,256], index: 4, kind: output, shape index: {}]  }
   0x1   :  { %v17_v0 = vld [vmem:[%s7529_s0] sm:$0xff]  ;;  %s5468_s21 = smov 4   ;;  %s5469_s22 = smov 8   ;;  %v4649_v4 = vld [vmem:[%s7529_s0 + $0x8] sm:$0xff]  ;;  %vm7541_vm4 = vcmask 293888   ;;  %vm7543_vm5 = vcmask 310272  }
   0x2   :  { %v18_v1 = vld [vmem:[%s7530_s1] sm:$0xff]  ;;  %v20_v2 = vcombine.high %v17_v0, %v17_v0  ;;  %s5470_s25 = smov 10   ;;  %s5471_s26 = smov 12   ;;  %v243_v5 = vcombine.high %v4649_v4, %v4649_v4  ;;  %v4650_v6 = vld [vmem:[%s7530_s1 + $0x8] sm:$0xff]  ;;  %vm7548_vm6 = vcmask 441344   ;;  %vm7547_vm7 = vcmask 457728  }
   0x3   :  { %s5472_s29 = smov 14   ;;  %s5473_s30 = smov 16   ;;  %v23_v8 = vcombine.low %v18_v1, %v18_v1  ;;  %v246_v10 = vcombine.low %v4650_v6, %v4650_v6  ;;  %vm7551_vm8 = vcmask 588800   ;;  %vm7546_vm9 = vcmask 605184  }
   0x4   :  { %v27_v3 = vsel %vm7534_vm0, %v20_v2, %v18_v1  ;;  %v249_v7 = vsel %vm7534_vm0, %v243_v5, %v4650_v6  ;;  %s5474_s0 = smov 19   ;;  %s5475_s1 = smov 21   ;;  %vm7549_vm10 = vcmask 736256   ;;  %vm7550_vm11 = vcmask 752640  }
   0x5   :  { %84 = vrot.lane.b32.xlu0 %v27_v3, %s5466_s19  ;;  %90 = vrot.lane.b32.xlu1 %v27_v3, %s5467_s20  ;;  %v26_v9 = vsel %vm7534_vm0, %v17_v0, %v23_v8  ;;  %s5476_s5 = smov 23   ;;  %s5477_s6 = smov 25   ;;  %v248_v11 = vsel %vm7534_vm0, %v4649_v4, %v246_v10  ;;  %vm7540_vm12 = vcmask 883712   ;;  %vm7537_vm13 = vcmask 900096  }
   0x6   :  { %s5478_s7 = smov 27   ;;  %s5479_s8 = smov 31   ;;  %vm7535_vm14 = vcmask 1031168   ;;  %vm7607_vm15 = vcmask 154624   ;;  %vm55_vm0 = vcmask 285696  }
   0x7   :  { %s5480_s9 = smov 29   ;;  %s5481_s10 = smov 33  }
   0x8   :  { %s5482_s11 = smov 126   ;;  %s5483_s12 = smov 127  }
   0x9   :  { %87 = vrot.lane.b32.xlu0 %v27_v3, %s5468_s21  ;;  %93 = vrot.lane.b32.xlu1 %v27_v3, %s5469_s22  ;;  %s5484_s13 = smov 109   ;;  %s5485_s14 = smov 110  }
   0xa   :  { %s5486_s15 = smov 92   ;;  %s5487_s16 = smov 108  }
   0xb   :  { %s5488_s17 = smov 91   ;;  %s5489_s18 = smov 90  }
   0xc   :  { %s5496_s23 = smov 115   ;;  %s5499_s27 = smov 122  }
   0xd   :  { %96 = vrot.lane.b32.xlu0 %v27_v3, %s5470_s25  ;;  %99 = vrot.lane.b32.xlu1 %v27_v3, %s5471_s26  ;;  %s5500_s28 = smov 120  }
  0x11   :  { %102 = vrot.lane.b32.xlu0 %v27_v3, %s5472_s29  ;;  %105 = vrot.lane.b32.xlu1 %v27_v3, %s5473_s30 }
  0x15   :  { %291 = vrot.lane.b32.xlu0 %v249_v7, %s5466_s19  ;;  %294 = vrot.lane.b32.xlu1 %v249_v7, %s5468_s21  ;;  %s5491_s19 = smov 32  }
  0x19   :  { %297 = vrot.lane.b32.xlu0 %v249_v7, %s5467_s20  ;;  %300 = vrot.lane.b32.xlu1 %v249_v7, %s5469_s22  ;;  %s5495_s22 = smov 82   ;;  %s5520_s20 = smov 66  }
  0x1d   :  { %303 = vrot.lane.b32.xlu0 %v249_v7, %s5470_s25  ;;  %306 = vrot.lane.b32.xlu1 %v249_v7, %s5471_s26  ;;  %s5498_s26 = smov 118  }
  0x21   :  { %309 = vrot.lane.b32.xlu0 %v249_v7, %s5472_s29  ;;  %312 = vrot.lane.b32.xlu1 %v249_v7, %s5473_s30  ;;  %s5501_s29 = smov 112   ;;  %s5502_s30 = smov 116  }
  0x25   :  { %29 = vrot.lane.b32.xlu0 %v26_v9, %s5474_s0  ;;  %32 = vrot.lane.b32.xlu1 %v26_v9, %s5475_s1 }
  0x29   :  { %35 = vrot.lane.b32.xlu0 %v26_v9, %s5476_s5  ;;  %38 = vrot.lane.b32.xlu1 %v26_v9, %s5477_s6 }
  0x2d   :  { %41 = vrot.lane.b32.xlu0 %v26_v9, %s5478_s7  ;;  %47 = vrot.lane.b32.xlu1 %v26_v9, %s5479_s8 }
  0x31   :  { %44 = vrot.lane.b32.xlu0 %v26_v9, %s5480_s9  ;;  %50 = vrot.lane.b32.xlu1 %v26_v9, %s5481_s10 }
  0x35   :  { %251 = vrot.lane.b32.xlu0 %v248_v11, %s5474_s0  ;;  %254 = vrot.lane.b32.xlu1 %v248_v11, %s5475_s1  ;;  %s5504_s1 = smov 102  }
  0x39   :  { %257 = vrot.lane.b32.xlu0 %v248_v11, %s5476_s5  ;;  %s5505_s5 = smov 104  }
  0x77   :  { %v85_v12 = vpop.permute.xlu0 %84  ;;  %v91_v13 = vpop.permute.xlu1 %90 }
  0x78   :  { %v108_v14 = vsel %vm7536_vm1, 0.0, %v85_v12 }
  0x79   :  { %v110_v15 = vsel %vm7538_vm2, %v108_v14, 0.0 }
  0x7b   :  { %v88_v16 = vpop.permute.xlu0 %87  ;;  %v94_v17 = vpop.permute.xlu1 %93 }
  0x7c   :  { %v112_v18 = vsel %vm7539_vm3, %v110_v15, %v88_v16 }
  0x7d   :  { %v114_v19 = vsel %vm7541_vm4, %v112_v18, 0.0 }
  0x7e   :  { %v116_v20 = vsel %vm7543_vm5, %v114_v19, %v91_v13 }
  0x7f   :  { %v118_v21 = vsel %vm7548_vm6, %v116_v20, 0.0  ;;  %v97_v22 = vpop.permute.xlu0 %96  ;;  %v100_v23 = vpop.permute.xlu1 %99 }
  0x80   :  { %v120_v24 = vsel %vm7547_vm7, %v118_v21, %v94_v17 }
  0x81   :  { %v122_v25 = vsel %vm7551_vm8, %v120_v24, 0.0 }
  0x82   :  { %v124_v26 = vsel %vm7546_vm9, %v122_v25, %v97_v22 }
  0x83   :  { %v126_v27 = vsel %vm7549_vm10, %v124_v26, 0.0  ;;  %v103_v28 = vpop.permute.xlu0 %102  ;;  %v106_v29 = vpop.permute.xlu1 %105 }
  0x84   :  { %v128_v30 = vsel %vm7550_vm11, %v126_v27, %v100_v23  ;;  %138 = vrot.lane.b32.xlu1 %v106_v29, %s5481_s10 }
  0x85   :  { %v130_v31 = vsel %vm7540_vm12, %v128_v30, 0.0  ;;  %vm67_vm12 = vcmask 728064  }
  0x86   :  { %v132_v32 = vsel %vm7537_vm13, %v130_v31, %v103_v28  ;;  %vm7545_vm13 = vcmask 449536  }
  0x87   :  { %v292_v33 = vpop.permute.xlu0 %291  ;;  %v134_v34 = vsel %vm7535_vm14, %v132_v32, 0.0  ;;  %v295_v35 = vpop.permute.xlu1 %294  ;;  %vm7542_vm14 = vcmask 302080  }
  0x88   :  { %136 = vrot.lane.b32.xlu0 %v134_v34, %s5481_s10  ;;  %260 = vrot.lane.b32.xlu1 %v248_v11, %s5477_s6  ;;  %v314_v38 = vsel %vm7536_vm1, 0.0, %v292_v33  ;;  %vm7544_vm1 = vcmask 433152   ;;  %s5506_s6 = smov 100  }
  0x89   :  { %v315_v41 = vsel %vm7538_vm2, %v314_v38, 0.0  ;;  %vm63_vm2 = vcmask 580608  }
  0x8a   :  { %v316_v44 = vsel %vm7539_vm3, %v315_v41, %v295_v35  ;;  %vm65_vm3 = vcmask 596992  }
  0x8b   :  { %v298_v36 = vpop.permute.xlu0 %297  ;;  %v301_v37 = vpop.permute.xlu1 %300  ;;  %v317_v47 = vsel %vm7541_vm4, %v316_v44, 0.0  ;;  %vm69_vm4 = vcmask 744448  }
  0x8c   :  { %266 = vrot.lane.b32.xlu1 %v248_v11, %s5480_s9  ;;  %263 = vrot.lane.b32.xlu0 %v248_v11, %s5478_s7  ;;  %v318_v51 = vsel %vm7543_vm5, %v317_v47, %v298_v36  ;;  %vm73_vm5 = vcmask 891904   ;;  %s5507_s7 = smov 94   ;;  %s5509_s9 = smov 86  }
  0x8d   :  { %v319_v57 = vsel %vm7548_vm6, %v318_v51, 0.0  ;;  %vm7611_vm6 = vcmask 1031168  }
  0x8e   :  { %v320_v62 = vsel %vm7547_vm7, %v319_v57, %v301_v37  ;;  %vm7610_vm7 = vcmask 900096  }
  0x8f   :  { %v304_v39 = vpop.permute.xlu0 %303  ;;  %v307_v40 = vpop.permute.xlu1 %306  ;;  %v321_v1 = vsel %vm7551_vm8, %v320_v62, 0.0  ;;  %vm7600_vm8 = vcmask 269312  }
  0x90   :  { %272 = vrot.lane.b32.xlu1 %v248_v11, %s5481_s10  ;;  %269 = vrot.lane.b32.xlu0 %v248_v11, %s5479_s8  ;;  %v322_v6 = vsel %vm7546_vm9, %v321_v1, %v304_v39  ;;  %vm7609_vm9 = vcmask 883712   ;;  %s5508_s8 = smov 96  }
  0x91   :  { %v323_v7 = vsel %vm7549_vm10, %v322_v6, 0.0  ;;  %vm7612_vm10 = vcmask 302080  }
  0x92   :  { %v324_v8 = vsel %vm7550_vm11, %v323_v7, %v307_v40  ;;  %vm7614_vm11 = vcmask 449536  }
  0x93   :  { %v310_v42 = vpop.permute.xlu0 %309  ;;  %v313_v43 = vpop.permute.xlu1 %312  ;;  %v325_v9 = vsel %vm7609_vm9, %v324_v8, 0.0  ;;  %vm7613_vm9 = vcmask 433152  }
  0x94   :  { %331 = vrot.lane.b32.xlu1 %v313_v43, %s5481_s10  ;;  %v326_v10 = vsel %vm7610_vm7, %v325_v9, %v310_v42  ;;  %vm7604_vm7 = vcmask 121856  }
  0x95   :  { %v327_v11 = vsel %vm7611_vm6, %v326_v10, 0.0  ;;  %vm7603_vm6 = vcmask 138240  }
  0x97   :  { %v30_v45 = vpop.permute.xlu0 %29  ;;  %v33_v46 = vpop.permute.xlu1 %32 }
  0x98   :  { %v54_v48 = vsel %vm7607_vm15, 0.0, %v30_v45 }
  0x99   :  { %v56_v49 = vsel %vm55_vm0, %v54_v48, 0.0 }
  0x9a   :  { %v58_v50 = vsel %vm7542_vm14, %v56_v49, %v33_v46  ;;  %vm71_vm14 = vcmask 875520  }
  0x9b   :  { %v60_v52 = vsel %vm7544_vm1, %v58_v50, 0.0  ;;  %v36_v53 = vpop.permute.xlu0 %35  ;;  %v39_v54 = vpop.permute.xlu1 %38  ;;  %vm7606_vm1 = vcmask 1022976  }
  0x9c   :  { %v62_v55 = vsel %vm7545_vm13, %v60_v52, %v36_v53  ;;  %vm7605_vm13 = vcmask 1039360   ;;  %v7559_v52 = vmov 0.0  }
  0x9d   :  { %v64_v56 = vsel %vm63_vm2, %v62_v55, 0.0  ;;  %766 = vmatprep.mubr.f32.mxu0 %v7559_v52  ;;  %600 = vmatprep.mubr.f32.mxu1 %v7559_v52 }
  0x9e   :  { %v66_v58 = vsel %vm65_vm3, %v64_v56, %v39_v54 }
  0x9f   :  { %v68_v59 = vsel %vm67_vm12, %v66_v58, 0.0  ;;  %v42_v60 = vpop.permute.xlu0 %41  ;;  %v48_v3 = vpop.permute.xlu1 %47 }
  0xa0   :  { %v70_v61 = vsel %vm69_vm4, %v68_v59, %v42_v60  ;;  %v80_v22 = vsel %vm7604_vm7, %v48_v3, 0.0 }
  0xa1   :  { %v72_v63 = vsel %vm71_vm14, %v70_v61, 0.0 }
  0xa3   :  { %v45_v0 = vpop.permute.xlu0 %44  ;;  %v51_v14 = vpop.permute.xlu1 %50 }
  0xa4   :  { %v74_v2 = vsel %vm73_vm5, %v72_v63, %v45_v0  ;;  %v82_v24 = vsel %vm7603_vm6, %v80_v22, %v51_v14 }
  0xa5   :  { %v76_v4 = vsel %vm7606_vm1, %v74_v2, 0.0 }
  0xa6   :  { %v5612_v5 = vsel %vm7605_vm13, %v76_v4, %v48_v3 }
  0xa7   :  { %161 = vrot.lane.b32.xlu1 %v5612_v5, %s5482_s11  ;;  %150 = vrot.lane.b32.xlu0 %v5612_v5, %s5483_s12  ;;  %v252_v12 = vpop.permute.xlu0 %251  ;;  %v255_v16 = vpop.permute.xlu1 %254  ;;  %v520_v58 = vand.u32 4294901760, %v5612_v5 }
  0xa8   :  { %v275_v13 = vsel %vm7607_vm15, 0.0, %v252_v12 }
  0xa9   :  { %v276_v15 = vsel %vm55_vm0, %v275_v13, 0.0  ;;  %v5753_v1 = vsub.f32 %v5612_v5, %v520_v58 }
  0xaa   :  { %v277_v17 = vsel %vm7612_vm10, %v276_v15, %v255_v16  ;;  %vm7552_vm10 = vcmask 400384  }
  0xab   :  { %183 = vrot.lane.b32.xlu1 %v5612_v5, %s5484_s13  ;;  %172 = vrot.lane.b32.xlu0 %v5612_v5, %s5485_s14  ;;  %v278_v18 = vsel %vm7613_vm9, %v277_v17, 0.0  ;;  %v258_v19 = vpop.permute.xlu0 %257  ;;  %vm7616_vm9 = vcmask 900096  }
  0xac   :  { %v279_v20 = vsel %vm7614_vm11, %v278_v18, %v258_v19  ;;  %vm7615_vm11 = vcmask 1031168  }
  0xad   :  { %v280_v23 = vsel %vm63_vm2, %v279_v20, 0.0 }
  0xaf   :  { %205 = vrot.lane.b32.xlu1 %v5612_v5, %s5486_s15  ;;  %194 = vrot.lane.b32.xlu0 %v5612_v5, %s5487_s16 }
  0xb3   :  { %216 = vrot.lane.b32.xlu0 %v5612_v5, %s5488_s17 }
  0xb7   :  { %329 = vrot.lane.b32.xlu0 %v327_v11, %s5481_s10 }
  0xf6   :  { %v139_v21 = vpop.permute.xlu1 %138 }
  0xfa   :  { %v137_v25 = vpop.permute.xlu0 %136  ;;  %v261_v26 = vpop.permute.xlu1 %260 }
  0xfb   :  { %v5644_v27 = vsel %vm7600_vm8, %v82_v24, %v137_v25  ;;  %v281_v28 = vsel %vm65_vm3, %v280_v23, %v261_v26  ;;  %v141_v38 = vsel %vm7600_vm8, %v137_v25, %v139_v21 }
  0xfc   :  { %163 = vrot.lane.b32.xlu1 %v5644_v27, %s5482_s11  ;;  %152 = vrot.lane.b32.xlu0 %v5644_v27, %s5483_s12  ;;  %v282_v29 = vsel %vm67_vm12, %v281_v28, 0.0  ;;  %v5675_v39 = vsel %vm7552_vm10, %v141_v38, 0.0  ;;  %v518_v23 = vand.u32 4294901760, %v5644_v27 }
  0xfe   :  { %v264_v30 = vpop.permute.xlu0 %263  ;;  %v267_v32 = vpop.permute.xlu1 %266  ;;  %v5824_v25 = vsub.f32 %v5644_v27, %v518_v23 }
  0xff   :  { %v283_v31 = vsel %vm69_vm4, %v282_v29, %v264_v30 }
 0x100   :  { %174 = vrot.lane.b32.xlu1 %v5644_v27, %s5485_s14  ;;  %v284_v33 = vsel %vm71_vm14, %v283_v31, 0.0  ;;  %v7556_v31 = vand.u32 4294901760, %v5824_v25 }
 0x101   :  { %v285_v34 = vsel %vm73_vm5, %v284_v33, %v267_v32  ;;  %v7554_v32 = vand.u32 4294901760, %v5753_v1 }
 0x102   :  { %v286_v35 = vsel %vm7606_vm1, %v285_v34, 0.0  ;;  %v270_v36 = vpop.permute.xlu0 %269  ;;  %v273_v45 = vpop.permute.xlu1 %272  ;;  %vm7712_vm1 = vcmask 449536  }
 0x103   :  { %v5659_v37 = vsel %vm7605_vm13, %v286_v35, %v270_v36  ;;  %v288_v44 = vsel %vm7604_vm7, %v270_v36, 0.0  ;;  %v615_v36 = vsub.f32 %v5824_v25, %v7556_v31 }
 0x104   :  { %185 = vrot.lane.b32.xlu1 %v5644_v27, %s5484_s13  ;;  %341 = vrot.lane.b32.xlu0 %v5659_v37, %s5483_s12  ;;  %v289_v46 = vsel %vm7603_vm6, %v288_v44, %v273_v45  ;;  %vm7706_vm6 = vcmask 293888  }
 0x105   :  { %v616_v44 = vand.u32 4294901760, %v615_v36 }
 0x106   :  { %v332_v49 = vpop.permute.xlu1 %331 }
 0x108   :  { %196 = vrot.lane.b32.xlu1 %v5644_v27, %s5487_s16 }
 0x10c   :  { %207 = vrot.lane.b32.xlu1 %v5644_v27, %s5486_s15 }
 0x110   :  { %218 = vrot.lane.b32.xlu1 %v5644_v27, %s5488_s17 }
 0x114   :  { %229 = vrot.lane.b32.xlu1 %v5644_v27, %s5489_s18 }
 0x118   :  { %154 = vrot.lane.b32.xlu1 %v5675_v39, %s5483_s12 }
 0x119   :  { %v151_v40 = vpop.permute.xlu0 %150  ;;  %v162_v53 = vpop.permute.xlu1 %161 }
 0x11c   :  { %227 = vrot.lane.b32.xlu1 %v5612_v5, %s5489_s18 }
 0x11d   :  { %v173_v41 = vpop.permute.xlu0 %172  ;;  %v184_v54 = vpop.permute.xlu1 %183 }
 0x121   :  { %v5681_v42 = vpop.permute.xlu0 %194  ;;  %v5735_v55 = vpop.permute.xlu1 %205 }
 0x125   :  { %v5683_v43 = vpop.permute.xlu0 %216 }
 0x129   :  { %v330_v47 = vpop.permute.xlu0 %329 }
 0x12a   :  { %v336_v48 = vsel %vm7600_vm8, %v289_v46, %v330_v47  ;;  %v333_v50 = vsel %vm7600_vm8, %v330_v47, %v332_v49 }
 0x12b   :  { %351 = vrot.lane.b32.xlu0 %v336_v48, %s5482_s11  ;;  %343 = vrot.lane.b32.xlu1 %v336_v48, %s5483_s12  ;;  %v337_v51 = vsel %vm7552_vm10, %v333_v50, 0.0 }
 0x12f   :  { %357 = vrot.lane.b32.xlu0 %v5659_v37, %s5485_s14  ;;  %349 = vrot.lane.b32.xlu1 %v5659_v37, %s5482_s11 }
 0x133   :  { %367 = vrot.lane.b32.xlu0 %v336_v48, %s5484_s13  ;;  %359 = vrot.lane.b32.xlu1 %v336_v48, %s5485_s14 }
 0x137   :  { %165 = vrot.lane.b32.xlu0 %v5675_v39, %s5482_s11  ;;  %365 = vrot.lane.b32.xlu1 %v5659_v37, %s5484_s13 }
 0x13b   :  { %176 = vrot.lane.b32.xlu0 %v5675_v39, %s5485_s14  ;;  %375 = vrot.lane.b32.xlu1 %v336_v48, %s5487_s16 }
 0x13f   :  { %187 = vrot.lane.b32.xlu0 %v5675_v39, %s5484_s13  ;;  %381 = vrot.lane.b32.xlu1 %v5659_v37, %s5486_s15 }
 0x143   :  { %198 = vrot.lane.b32.xlu0 %v5675_v39, %s5487_s16  ;;  %391 = vrot.lane.b32.xlu1 %v336_v48, %s5488_s17 }
 0x147   :  { %209 = vrot.lane.b32.xlu0 %v5675_v39, %s5486_s15  ;;  %353 = vrot.lane.b32.xlu1 %v337_v51, %s5482_s11 }
 0x14b   :  { %220 = vrot.lane.b32.xlu0 %v5675_v39, %s5488_s17  ;;  %369 = vrot.lane.b32.xlu1 %v337_v51, %s5484_s13 }
 0x14f   :  { %231 = vrot.lane.b32.xlu0 %v5675_v39, %s5489_s18  ;;  %385 = vrot.lane.b32.xlu1 %v337_v51, %s5486_s15 }
 0x153   :  { %373 = vrot.lane.b32.xlu0 %v5659_v37, %s5487_s16  ;;  %397 = vrot.lane.b32.xlu1 %v5659_v37, %s5489_s18 }
 0x157   :  { %383 = vrot.lane.b32.xlu0 %v336_v48, %s5486_s15  ;;  %401 = vrot.lane.b32.xlu1 %v337_v51, %s5489_s18 }
 0x15b   :  { %389 = vrot.lane.b32.xlu0 %v5659_v37, %s5488_s17  ;;  %408 = vrot.lane.b32.xlu1 %v336_v48, %s5491_s19 }
 0x15f   :  { %345 = vrot.lane.b32.xlu0 %v337_v51, %s5483_s12 }
 0x163   :  { %361 = vrot.lane.b32.xlu0 %v337_v51, %s5485_s14 }
 0x167   :  { %377 = vrot.lane.b32.xlu0 %v337_v51, %s5487_s16 }
 0x16b   :  { %393 = vrot.lane.b32.xlu0 %v337_v51, %s5488_s17 }
 0x16e   :  { %v5738_v56 = vpop.permute.xlu1 %163  ;;  %v153_v57 = vpop.permute.xlu0 %152 }
 0x16f   :  { %v5743_v59 = vsel %vm7615_vm11, %v162_v53, %v5738_v56  ;;  %v156_v60 = vsel %vm7605_vm13, %v151_v40, %v153_v57  ;;  %399 = vrot.lane.b32.xlu0 %v336_v48, %s5489_s18  ;;  %vm7617_vm11 = vcmask 883712   ;;  %v621_v40 = vsub.f32 %v5753_v1, %v7554_v32 }
 0x170   :  { %v528_v61 = vand.u32 4294901760, %v5743_v59  ;;  %v524_v62 = vand.u32 4294901760, %v156_v60 }
 0x171   :  { %v622_v46 = vand.u32 4294901760, %v621_v40 }
 0x172   :  { %v5748_v63 = vsub.f32 %v156_v60, %v524_v62  ;;  %v5750_v0 = vpop.permute.xlu1 %174  ;;  %v5764_v3 = vsub.f32 %v5743_v59, %v528_v61  ;;  %v5837_v35 = vpack.c.bf16 %v524_v62, %v520_v58 }
 0x173   :  { %v5757_v2 = vsel %vm7616_vm9, %v173_v41, %v5750_v0  ;;  %406 = vrot.lane.b32.xlu0 %v5659_v37, %s5491_s19  ;;  %vm7618_vm9 = vcmask 1031168  }
 0x174   :  { %v532_v4 = vand.u32 4294901760, %v5757_v2  ;;  %v644_v10 = vand.u32 4294901760, %v5764_v3  ;;  %v7553_v29 = vand.u32 4294901760, %v5748_v63  ;;  %vm7620_vm10 = vmmov %vm7618_vm9 }
 0x176   :  { %v5772_v5 = vsub.f32 %v5757_v2, %v532_v4  ;;  %v5774_v7 = vpop.permute.xlu1 %185  ;;  %v633_v27 = vsub.f32 %v5748_v63, %v7553_v29  ;;  %v342_v49 = vpop.permute.xlu0 %341  ;;  %v645_v59 = vsub.f32 %v5764_v3, %v644_v10 }
 0x177   :  { %v5778_v8 = vsel %vm73_vm5, %v184_v54, %v5774_v7  ;;  %410 = vrot.lane.b32.xlu0 %v337_v51, %s5491_s19 }
 0x178   :  { %v536_v9 = vand.u32 4294901760, %v5778_v8  ;;  %v656_v11 = vand.u32 4294901760, %v5772_v5  ;;  %v646_v32 = vand.u32 4294901760, %v645_v59 }
 0x17a   :  { %v5784_v12 = vpop.permute.xlu1 %196  ;;  %v5790_v13 = vpack.c.bf16 %v656_v11, %v644_v10  ;;  %v5800_v15 = vsub.f32 %v5778_v8, %v536_v9 }
 0x17b   :  { %v5795_v14 = vsel %vm7617_vm11, %v5681_v42, %v5784_v12  ;;  %v634_v42 = vand.u32 4294901760, %v633_v27  ;;  %vm7619_vm11 = vcmask 900096  }
 0x17c   :  { %v540_v16 = vand.u32 4294901760, %v5795_v14  ;;  %v668_v19 = vand.u32 4294901760, %v5800_v15 }
 0x17d   :  { %v4970_v48 = vpack.c.bf16 %v634_v42, %v622_v46  ;;  %v405_v46 = vld [vmem:[%s7531_s2] sm:$0xf]  ;;  %s5494_s2 = smov 114  }
 0x17e   :  { %v5806_v17 = vsub.f32 %v5795_v14, %v540_v16  ;;  %v5808_v18 = vpop.permute.xlu1 %207 }
 0x180   :  { %v680_v20 = vand.u32 4294901760, %v5806_v17 }
 0x182   :  { %v5812_v21 = vpop.permute.xlu1 %218  ;;  %v5818_v22 = vpack.c.bf16 %v680_v20, %v668_v19  ;;  %v681_v59 = vsub.f32 %v5806_v17, %v680_v20 }
 0x186   :  { %v5821_v24 = vpop.permute.xlu1 %229 }
 0x18a   :  { %v5826_v26 = vpop.permute.xlu1 %154 }
 0x18b   :  { %v157_v28 = vsel %vm7605_vm13, %v153_v57, %v5826_v26 }
 0x18c   :  { %v522_v30 = vand.u32 4294901760, %v157_v28 }
 0x18e   :  { %v5833_v33 = vsub.f32 %v157_v28, %v522_v30  ;;  %v5835_v34 = vpack.c.bf16 %v522_v30, %v518_v23  ;;  %v5856_v50 = vpop.permute.xlu1 %227 }
 0x190   :  { %4953 = vmatprep.subr.bf16.mxu1 %v5835_v34  ;;  %v7555_v37 = vand.u32 4294901760, %v5833_v33 }
 0x191   :  { %4955 = vmatpush1.bf16.msra.mxu1 %v5837_v35 }
 0x192   :  { %v627_v41 = vsub.f32 %v5833_v33, %v7555_v37 }
 0x194   :  { %v628_v45 = vand.u32 4294901760, %v627_v41 }
 0x196   :  { %v4968_v47 = vpack.c.bf16 %v628_v45, %v616_v44 }
 0x198   :  { %4969 = vmatprep.subr.bf16.mxu0 %v4968_v47 }
 0x199   :  { %4971 = vmatpush1.bf16.msra.mxu0 %v4970_v48 }
 0x19d   :  { %v5858_v51 = vpop.permute.xlu1 %343  ;;  %v5860_v53 = vpop.permute.xlu0 %351 }
 0x19e   :  { %v347_v54 = vsel %vm7605_vm13, %v342_v49, %v5858_v51 }
 0x19f   :  { %412 = vrot.lane.b32.xlu0 %v347_v54, %s5491_s19 }
 0x1a1   :  { %v350_v57 = vpop.permute.xlu1 %349  ;;  %v358_v58 = vpop.permute.xlu0 %357 }
 0x1a2   :  { %v355_v60 = vsel %vm7618_vm9, %v350_v57, %v5860_v53  ;;  %vm7621_vm9 = vmmov %vm7619_vm11 }
 0x1a3   :  { %418 = vrot.lane.b32.xlu0 %v355_v60, %s5491_s19  ;;  %v657_v60 = vsub.f32 %v5772_v5, %v656_v11 }
 0x1a5   :  { %v5868_v62 = vpop.permute.xlu1 %359  ;;  %v5870_v23 = vpop.permute.xlu0 %367  ;;  %v658_v10 = vand.u32 4294901760, %v657_v60 }
 0x1a6   :  { %v363_v28 = vsel %vm7619_vm11, %v358_v58, %v5868_v62  ;;  %vm7623_vm11 = vcmask 752640  }
 0x1a7   :  { %424 = vrot.lane.b32.xlu0 %v363_v28, %s5491_s19  ;;  %v222_v28 = vsel %vm69_vm4, %v5683_v43, %v5812_v21 }
 0x1a9   :  { %v366_v30 = vpop.permute.xlu1 %365  ;;  %v5875_v27 = vpop.permute.xlu0 %165 }
 0x1aa   :  { %v168_v36 = vsel %vm7620_vm10, %v5738_v56, %v5875_v27  ;;  %v371_v40 = vsel %vm73_vm5, %v366_v30, %v5870_v23  ;;  %vm7622_vm10 = vcmask 588800  }
 0x1ab   :  { %v526_v41 = vand.u32 4294901760, %v168_v36  ;;  %430 = vrot.lane.b32.xlu0 %v371_v40, %s5491_s19  ;;  %v516_v57 = vsel %vm7622_vm10, %v405_v46, 0  ;;  %vm7625_vm10 = vmmov %vm7623_vm11 }
 0x1ac   :  { %v5933_v40 = vand.u32 4294901760, %v516_v57 }
 0x1ad   :  { %v5883_v42 = vsub.f32 %v168_v36, %v526_v41  ;;  %v5885_v44 = vpop.permute.xlu0 %176  ;;  %v5976_v20 = vpop.permute.xlu1 %375 }
 0x1ae   :  { %v179_v45 = vsel %vm7621_vm9, %v5750_v0, %v5885_v44  ;;  %v5908_v0 = vpack.c.bf16 %v532_v4, %v528_v61  ;;  %v211_v61 = vsel %vm7623_vm11, %v5735_v55, %v5808_v18  ;;  %vm7624_vm9 = vcmask 883712  }
 0x1af   :  { %v530_v47 = vand.u32 4294901760, %v179_v45  ;;  %v638_v56 = vand.u32 4294901760, %v5883_v42  ;;  %v5940_v37 = vsub.f32 %v516_v57, %v5933_v40  ;;  %vm7626_vm11 = vcmask 736256  }
 0x1b1   :  { %v5894_v48 = vsub.f32 %v179_v45, %v530_v47  ;;  %v5896_v49 = vpop.permute.xlu0 %187  ;;  %v5898_v54 = vpack.c.bf16 %v530_v47, %v526_v41  ;;  %v639_v36 = vsub.f32 %v5883_v42, %v638_v56  ;;  %v548_v41 = vand.u32 4294901760, %v222_v28 }
 0x1b2   :  { %v190_v58 = vsel %vm73_vm5, %v5774_v7, %v5896_v49 }
 0x1b3   :  { %v534_v30 = vand.u32 4294901760, %v190_v58  ;;  %4957 = vmatprep.subr.bf16.mxu1 %v5898_v54  ;;  %v650_v7 = vand.u32 4294901760, %v5894_v48  ;;  %v640_v47 = vand.u32 4294901760, %v639_v36  ;;  %v5954_v60 = vsub.f32 %v222_v28, %v548_v41 }
 0x1b4   :  { %4959 = vmatpush1.bf16.msra.mxu1 %v5908_v0  ;;  %v4974_v36 = vpack.c.bf16 %v658_v10, %v646_v32  ;;  %v5986_v28 = vand.u32 4294901760, %v5940_v37 }
 0x1b5   :  { %v5926_v2 = vsub.f32 %v190_v58, %v534_v30  ;;  %v5928_v43 = vpop.permute.xlu0 %198  ;;  %v651_v4 = vsub.f32 %v5894_v48, %v650_v7  ;;  %v5931_v11 = vpack.c.bf16 %v650_v7, %v638_v56  ;;  %v544_v58 = vand.u32 4294901760, %v211_v61 }
 0x1b6   :  { %v201_v45 = vsel %vm7624_vm9, %v5784_v12, %v5928_v43  ;;  %v5952_v12 = vpack.c.bf16 %v540_v16, %v536_v9  ;;  %7627 = vst [vmem:[#allocation2_spill] sm:$0xff] %v5986_v28  ;;  %vm7629_vm9 = vmmov %vm7626_vm11 }
 0x1b7   :  { %v538_v46 = vand.u32 4294901760, %v201_v45  ;;  %v652_v29 = vand.u32 4294901760, %v651_v4  ;;  %v7558_v55 = vand.u32 4294901760, %v5926_v2  ;;  %v5970_v16 = vsub.f32 %v211_v61, %v544_v58 }
 0x1b8   :  { %v7561_v4 = vand.u32 4294901760, %v5954_v60 }
 0x1b9   :  { %v5942_v56 = vsub.f32 %v201_v45, %v538_v46  ;;  %v5944_v7 = vpop.permute.xlu0 %209  ;;  %v5946_v31 = vpack.c.bf16 %v538_v46, %v534_v30  ;;  %v4972_v6 = vpack.c.bf16 %v652_v29, %v640_v47  ;;  %v233_v29 = vsel %vm7626_vm11, %v5856_v50, %v5821_v24 }
 0x1ba   :  { %v212_v57 = vsel %vm7625_vm10, %v5808_v18, %v5944_v7  ;;  %v663_v9 = vsub.f32 %v5926_v2, %v7558_v55  ;;  %v669_v18 = vsub.f32 %v5800_v15, %v668_v19  ;;  %v5988_v30 = vand.u32 4294901760, %v233_v29 }
 0x1bb   :  { %v542_v8 = vand.u32 4294901760, %v212_v57  ;;  %4961 = vmatprep.subr.bf16.mxu1 %v5946_v31  ;;  %4973 = vmatprep.subr.bf16.mxu0 %v4972_v6  ;;  %v7557_v14 = vand.u32 4294901760, %v5942_v56  ;;  %v682_v19 = vand.u32 4294901760, %v681_v59  ;;  %v604_v59 = vsub.f32 %v5940_v37, %v5986_v28 }
 0x1bc   :  { %4963 = vmatpush1.bf16.msra.mxu1 %v5952_v12  ;;  %4975 = vmatpush1.bf16.msra.mxu0 %v4974_v36  ;;  %v664_v10 = vand.u32 4294901760, %v663_v9  ;;  %v670_v36 = vand.u32 4294901760, %v669_v18  ;;  %v6007_v9 = vsub.f32 %v233_v29, %v5988_v30  ;;  %v705_v18 = vsub.f32 %v5954_v60, %v7561_v4 }
 0x1bd   :  { %v5978_v32 = vsub.f32 %v212_v57, %v542_v8  ;;  %v5980_v6 = vpop.permute.xlu0 %220  ;;  %v675_v50 = vsub.f32 %v5942_v56, %v7557_v14  ;;  %v5995_v57 = vpack.c.bf16 %v548_v41, %v544_v58  ;;  %v7562_v14 = vand.u32 4294901760, %v5970_v16 }
 0x1be   :  { %v223_v61 = vsel %vm69_vm4, %v5812_v21, %v5980_v6  ;;  %v4978_v58 = vpack.c.bf16 %v682_v19, %v670_v36  ;;  %vm7631_vm10 = vcmask 883712   ;;  %vm7632_vm11 = vcmask 752640  }
 0x1bf   :  { %v546_v45 = vand.u32 4294901760, %v223_v61  ;;  %v676_v46 = vand.u32 4294901760, %v675_v50  ;;  %v7563_v47 = vand.u32 4294901760, %v5978_v32  ;;  %v382_v50 = vpop.permute.xlu1 %381 }
 0x1c1   :  { %v5998_v55 = vsub.f32 %v223_v61, %v546_v45  ;;  %v6000_v38 = vpop.permute.xlu0 %231  ;;  %v6002_v52 = vpack.c.bf16 %v546_v45, %v542_v8  ;;  %v4976_v21 = vpack.c.bf16 %v676_v46, %v664_v10  ;;  %v687_v29 = vsub.f32 %v5978_v32, %v7563_v47 }
 0x1c2   :  { %7628 = vst [vmem:[#allocation3_spill] sm:$0xff] %v6000_v38  ;;  %v234_v41 = vsel %vm7629_vm9, %v5821_v24, %v6000_v38  ;;  %v693_v24 = vsub.f32 %v5970_v16, %v7562_v14  ;;  %v6033_v46 = vand.u32 4294901760, %v604_v59  ;;  %vm7636_vm9 = vcmask 1031168  }
 0x1c3   :  { %v6015_v61 = vand.u32 4294901760, %v234_v41  ;;  %4965 = vmatprep.subr.bf16.mxu1 %v6002_v52  ;;  %4977 = vmatprep.subr.bf16.mxu0 %v4976_v21  ;;  %v7565_v8 = vand.u32 4294901760, %v5998_v55  ;;  %v706_v21 = vand.u32 4294901760, %v705_v18  ;;  %v688_v4 = vand.u32 4294901760, %v687_v29  ;;  %v6041_v38 = vpop.permute.xlu1 %391 }
 0x1c4   :  { %4967 = vmatpush1.bf16.msra.mxu1 %v5995_v57  ;;  %4979 = vmatpush1.bf16.msra.mxu0 %v4978_v58  ;;  %7630 = vst [vmem:[#allocation4_spill] sm:$0xff] %v6033_v46  ;;  %v716_v58 = vand.u32 4294901760, %v6007_v9  ;;  %v694_v47 = vand.u32 4294901760, %v693_v24  ;;  %v7633_v24 = vmov 0.0  }
 0x1c5   :  { %v6027_v19 = vsub.f32 %v234_v41, %v6015_v61  ;;  %551 = vmatprep.subr.mxu1 %v6015_v61  ;;  %v374_v45 = vpop.permute.xlu0 %373  ;;  %v699_v10 = vsub.f32 %v5998_v55, %v7565_v8 }
 0x1c6   :  { %v379_v36 = vsel %vm7631_vm10, %v374_v45, %v5976_v20  ;;  %v4982_v45 = vpack.c.bf16 %v706_v21, %v694_v47  ;;  %v7634_v47 = vpack.c.bf16 %v5833_v33, %v5824_v25  ;;  %v4988_v21 = vpack.c.bf16 %v5894_v48, %v5883_v42 }
 0x1c7   :  { %436 = vrot.lane.b32.xlu0 %v379_v36, %s5491_s19  ;;  %v700_v41 = vand.u32 4294901760, %v699_v10  ;;  %v7566_v14 = vand.u32 4294901760, %v6027_v19  ;;  %v717_v10 = vsub.f32 %v6007_v9, %v716_v58  ;;  %v4994_v42 = vpack.c.bf16 %v5806_v17, %v5800_v15 }
 0x1c8   :  { %553 = vmatpush1.msra.mxu1 %v5988_v30  ;;  %vm7637_vm10 = vcmask 900096  }
 0x1c9   :  { %v6043_v8 = vpop.permute.xlu0 %383  ;;  %v4980_v59 = vpack.c.bf16 %v700_v41, %v688_v4  ;;  %v711_v18 = vsub.f32 %v6027_v19, %v7566_v14  ;;  %606 = vmatmul.mubr.f32.vlgmr.msra.gmra.mrb[0].mxu1 %v6033_v46  ;;  %v718_v14 = vand.u32 4294901760, %v717_v10  ;;  %v354_v46 = vpop.permute.xlu1 %353 }
 0x1ca   :  { %v387_v29 = vsel %vm7632_vm11, %v382_v50, %v6043_v8  ;;  %1273 = vmatprep.mubr.f32.mxu1 %v7633_v24  ;;  %vm7638_vm11 = vcmask 736256  }
 0x1cb   :  { %4981 = vmatprep.subr.bf16.mxu0 %v4980_v59  ;;  %442 = vrot.lane.b32.xlu0 %v387_v29, %s5491_s19  ;;  %v712_v4 = vand.u32 4294901760, %v711_v18  ;;  %v7635_v59 = vpack.c.bf16 %v5748_v63, %v5753_v1 }
 0x1cc   :  { %4983 = vmatpush1.bf16.msra.mxu0 %v4982_v45  ;;  %v4992_v45 = vpack.c.bf16 %v5942_v56, %v5926_v2 }
 0x1cd   :  { %713 = vmatprep.subr.mxu0 %v712_v4  ;;  %v390_v36 = vpop.permute.xlu0 %389  ;;  %v370_v18 = vpop.permute.xlu1 %369  ;;  %v4998_v4 = vpack.c.bf16 %v5954_v60, %v5970_v16 }
 0x1ce   :  { %v395_v41 = vsel %vm69_vm4, %v390_v36, %v6041_v38 }
 0x1cf   :  { %448 = vrot.lane.b32.xlu0 %v395_v41, %s5491_s19  ;;  %v356_v41 = vsel %vm7636_vm9, %v5860_v53, %v354_v46  ;;  %v372_v53 = vsel %vm73_vm5, %v5870_v23, %v370_v18  ;;  %vm7639_vm9 = vcmask 883712  }
 0x1d0   :  { %719 = vmatpush1.msra.mxu0 %v718_v14  ;;  %v4990_v14 = vpack.c.bf16 %v5772_v5, %v5764_v3  ;;  %v4996_v5 = vpack.c.bf16 %v5998_v55, %v5978_v32 }
 0x1d1   :  { %4985 = vmatprep.subr.bf16.mxu0 %v7634_v47  ;;  %v346_v50 = vpop.permute.xlu0 %345  ;;  %768 = vmatmul.mubr.f32.vlgmr.msra.gmra.mrb[0].mxu0 %v5933_v40  ;;  %v386_v10 = vpop.permute.xlu1 %385 }
 0x1d2   :  { %4987 = vmatpush1.bf16.msra.mxu0 %v7635_v59  ;;  %416 = vrot.lane.b32.xlu1 %v346_v50, %s5491_s19  ;;  %v348_v3 = vsel %vm7605_vm13, %v5858_v51, %v346_v50  ;;  %v7641_v50 = vand.u32 4294901760, %v5824_v25 }
 0x1d3   :  { %4989 = vmatprep.subr.bf16.mxu0 %v4988_v21  ;;  %422 = vrot.lane.b32.xlu0 %v354_v46, %s5491_s19  ;;  %v7642_v21 = vand.u32 4294901760, %v5833_v33  ;;  %v7645_v33 = vand.u32 4294901760, %v5926_v2  ;;  %v7649_v2 = vand.u32 4294901760, %v5970_v16 }
 0x1d4   :  { %874 = vmatprep.mubr.f32.mxu0 %v7633_v24 }
 0x1d5   :  { %v362_v29 = vpop.permute.xlu0 %361  ;;  %v398_v15 = vpop.permute.xlu1 %397  ;;  %v5016_v59 = vpack.c.bf16 %v7642_v21, %v7641_v50 }
 0x1d6   :  { %4991 = vmatpush1.bf16.msra.mxu0 %v4990_v14  ;;  %428 = vrot.lane.b32.xlu1 %v362_v29, %s5491_s19  ;;  %v364_v51 = vsel %vm7637_vm10, %v5868_v62, %v362_v29  ;;  %vm7640_vm10 = vcmask 752640   ;;  %v7644_v14 = vand.u32 4294901760, %v5748_v63  ;;  %v7647_v63 = vand.u32 4294901760, %v5978_v32 }
 0x1d7   :  { %4993 = vmatprep.subr.bf16.mxu0 %v4992_v45  ;;  %434 = vrot.lane.b32.xlu0 %v370_v18, %s5491_s19  ;;  %v388_v23 = vsel %vm7640_vm10, %v6043_v8, %v386_v10  ;;  %v7643_v8 = vand.u32 4294901760, %v5753_v1  ;;  %v7648_v29 = vand.u32 4294901760, %v5998_v55  ;;  %vm7599_vm10 = vcmask 261120  }
 0x1d9   :  { %v378_v48 = vpop.permute.xlu0 %377  ;;  %v402_v46 = vpop.permute.xlu1 %401  ;;  %v5018_v18 = vpack.c.bf16 %v7644_v14, %v7643_v8  ;;  %v5028_v45 = vpack.c.bf16 %v7648_v29, %v7647_v63 }
 0x1da   :  { %4995 = vmatpush1.bf16.msra.mxu0 %v4994_v42  ;;  %414 = vrot.lane.b32.xlu1 %v348_v3, %s5491_s19  ;;  %v380_v62 = vsel %vm7639_vm9, %v5976_v20, %v378_v48  ;;  %vm7601_vm9 = vmmov 0  }
 0x1db   :  { %4997 = vmatprep.subr.bf16.mxu0 %v4996_v5 }
 0x1dd   :  { %v394_v36 = vpop.permute.xlu0 %393  ;;  %v409_v55 = vpop.permute.xlu1 %408 }
 0x1de   :  { %4999 = vmatpush1.bf16.msra.mxu0 %v4998_v4  ;;  %420 = vrot.lane.b32.xlu1 %v356_v41, %s5491_s19  ;;  %v396_v20 = vsel %vm69_vm4, %v6041_v38, %v394_v36  ;;  %v7646_v38 = vand.u32 4294901760, %v5942_v56 }
 0x1df   :  { %824 = vmatprep.subr.mxu0 %v6027_v19 }
 0x1e0   :  { %v5024_v1 = vpack.c.bf16 %v7646_v38, %v7645_v33 }
 0x1e1   :  { %v400_v17 = vpop.permute.xlu0 %399 }
 0x1e2   :  { %827 = vmatpush1.msra.mxu0 %v6007_v9  ;;  %426 = vrot.lane.b32.xlu1 %v364_v51, %s5491_s19  ;;  %v403_v47 = vsel %vm7638_vm11, %v398_v15, %v400_v17  ;;  %v404_v25 = vsel %vm7638_vm11, %v400_v17, %v402_v46 }
 0x1e3   :  { %5001 = vmatprep.subr.bf16.mxu0 %v5835_v34  ;;  %454 = vrot.lane.b32.xlu0 %v403_v47, %s5491_s19 }
 0x1e4   :  { %877 = vmatmul.mubr.f32.vlgmr.msra.gmra.mrb[0].mxu0 %v5940_v37 }
 0x1e5   :  { %5003 = vmatpush1.bf16.msra.mxu0 %v5837_v35  ;;  %965 = vmatprep.mubr.f32.mxu0 %v7633_v24 }
 0x1e6   :  { %5005 = vmatprep.subr.bf16.mxu0 %v5898_v54  ;;  %432 = vrot.lane.b32.xlu1 %v372_v53, %s5491_s19 }
 0x1e7   :  { %446 = vrot.lane.b32.xlu0 %v386_v10, %s5491_s19 }
 0x1e9   :  { %5007 = vmatpush1.bf16.msra.mxu0 %v5908_v0 }
 0x1ea   :  { %5009 = vmatprep.subr.bf16.mxu0 %v5946_v31  ;;  %438 = vrot.lane.b32.xlu1 %v380_v62, %s5491_s19 }
 0x1eb   :  { %458 = vrot.lane.b32.xlu0 %v402_v46, %s5491_s19 }
 0x1ed   :  { %5011 = vmatpush1.bf16.msra.mxu0 %v5952_v12 }
 0x1ee   :  { %5013 = vmatprep.subr.bf16.mxu0 %v6002_v52  ;;  %444 = vrot.lane.b32.xlu1 %v388_v23, %s5491_s19 }
 0x1f1   :  { %5015 = vmatpush1.bf16.msra.mxu0 %v5995_v57 }
 0x1f2   :  { %916 = vmatprep.subr.mxu0 %v6015_v61  ;;  %450 = vrot.lane.b32.xlu1 %v396_v20, %s5491_s19 }
 0x1f5   :  { %918 = vmatpush1.msra.mxu0 %v5988_v30 }
 0x1f6   :  { %5017 = vmatprep.subr.bf16.mxu0 %v5016_v59  ;;  %969 = vmatmul.mubr.f32.vlgmr.msra.gmra.mrb[0].mxu0 %v5986_v28 }
 0x1f7   :  { %5019 = vmatpush1.bf16.msra.mxu0 %v5018_v18  ;;  %440 = vrot.lane.b32.xlu1 %v378_v48, %s5491_s19 }
 0x1f8   :  { %5021 = vmatprep.subr.bf16.mxu0 %v5931_v11  ;;  %1093 = vmatprep.mubr.f32.mxu0 %v7633_v24  ;;  %v7650_v11 = vand.u32 4294901760, %v5954_v60 }
 0x1fa   :  { %v5030_v56 = vpack.c.bf16 %v7650_v11, %v7649_v2 }
 0x1fb   :  { %5023 = vmatpush1.bf16.msra.mxu0 %v5790_v13  ;;  %456 = vrot.lane.b32.xlu1 %v404_v25, %s5491_s19  ;;  %v7651_v13 = vand.u32 4294901760, %v6027_v19 }
 0x1fc   :  { %5025 = vmatprep.subr.bf16.mxu0 %v5024_v1 }
 0x1ff   :  { %5027 = vmatpush1.bf16.msra.mxu0 %v5818_v22  ;;  %452 = vrot.lane.b32.xlu1 %v394_v36, %s5491_s19  ;;  %v7577_v22 = vmov 0.0|0.0  }
 0x200   :  { %5029 = vmatprep.subr.bf16.mxu0 %v5028_v45 }
 0x203   :  { %5031 = vmatpush1.bf16.msra.mxu0 %v5030_v56 }
 0x204   :  { %1042 = vmatprep.subr.mxu0 %v7651_v13 }
 0x207   :  { %1046 = vmatpush1.msra.mxu0 %v716_v58 }
 0x208   :  { %5033 = vmatprep.subr.bf16.mxu0 %v5835_v34  ;;  %1095 = vmatmul.mubr.f32.vlgmr.msra.gmra.mrb[0].mxu0 %v5933_v40 }
 0x209   :  { %5035 = vmatpush1.bf16.msra.mxu0 %v5837_v35  ;;  %1183 = vmatprep.mubr.f32.mxu0 %v7633_v24 }
 0x20a   :  { %5037 = vmatprep.subr.bf16.mxu0 %v5898_v54 }
 0x20d   :  { %5039 = vmatpush1.bf16.msra.mxu0 %v5908_v0 }
 0x20e   :  { %5041 = vmatprep.subr.bf16.mxu0 %v5946_v31  ;;  %v407_v31 = vpop.permute.xlu0 %406 }
 0x211   :  { %5043 = vmatpush1.bf16.msra.mxu0 %v5952_v12 }
 0x212   :  { %5045 = vmatprep.subr.bf16.mxu0 %v6002_v52  ;;  %v411_v34 = vpop.permute.xlu0 %410 }
 0x213   :  { %v462_v9 = vsel %vm7599_vm10, %v409_v55, %v411_v34 }
 0x214   :  { %v1865_v10 = vand.u32 4294901760, %v462_v9 }
 0x215   :  { %5047 = vmatpush1.bf16.msra.mxu0 %v5995_v57  ;;  %v461_v57 = vsel %vm7599_vm10, %v407_v31, %v409_v55 }
 0x216   :  { %1134 = vmatprep.subr.mxu0 %v6015_v61  ;;  %v413_v35 = vpop.permute.xlu0 %412  ;;  %v506_v61 = vsel %vm7599_vm10, %v5675_v39, %v407_v31  ;;  %v1191_v5 = vand.u32 4294901760, %v461_v57  ;;  %v6246_v31 = vsub.f32 %v462_v9, %v1865_v10 }
 0x217   :  { %v1193_v36 = vand.u32 4294901760, %v506_v61 }
 0x218   :  { %v6237_v2 = vsub.f32 %v461_v57, %v1191_v5 }
 0x219   :  { %1136 = vmatpush1.msra.mxu0 %v5988_v30  ;;  %v507_v30 = vsel %vm7599_vm10, %v5826_v26, %v413_v35  ;;  %v6219_v59 = vsub.f32 %v506_v61, %v1193_v36  ;;  %v7569_v61 = vand.u32 4294901760, %v6246_v31 }
 0x21a   :  { %1185 = vmatmul.mubr.f32.vlgmr.msra.gmra.mrb[0].mxu0 %v5933_v40  ;;  %5144 = vmatprep.subr.bf16.mxu0 %v7577_v22  ;;  %v419_v54 = vpop.permute.xlu0 %418  ;;  %v1197_v42 = vand.u32 4294901760, %v507_v30  ;;  %v7575_v9 = vand.u32 4294901760, %v6237_v2 }
 0x21b   :  { %4766 = vmatprep.mubr.msk.f32.mxu0 %vm7601_vm9, %v7633_v24  ;;  %v508_v51 = vsel %vm7599_vm10, %v5875_v27, %v419_v54  ;;  %v7574_v11 = vand.u32 4294901760, %v6219_v59 }
 0x21c   :  { %v6199_v17 = vpack.c.bf16 %v1197_v42, %v1193_v36  ;;  %v1201_v46 = vand.u32 4294901760, %v508_v51  ;;  %v6223_v25 = vsub.f32 %v507_v30, %v1197_v42 }
 0x21e   :  { %v425_v52 = vpop.permute.xlu0 %424  ;;  %v6225_v38 = vsub.f32 %v508_v51, %v1201_v46  ;;  %v7572_v34 = vand.u32 4294901760, %v6223_v25 }
 0x21f   :  { %v509_v47 = vsel %vm7599_vm10, %v5885_v44, %v425_v52 }
 0x220   :  { %v1205_v23 = vand.u32 4294901760, %v509_v47 }
 0x222   :  { %v431_v0 = vpop.permute.xlu0 %430  ;;  %v6227_v1 = vsub.f32 %v509_v47, %v1205_v23  ;;  %v6240_v56 = vpack.c.bf16 %v1205_v23, %v1201_v46  ;;  %v6294_v46 = vsub.f32 %v6237_v2, %v7575_v9 }
 0x223   :  { %v510_v44 = vsel %vm7599_vm10, %v5896_v49, %v431_v0 }
 0x224   :  { %v1209_v49 = vand.u32 4294901760, %v510_v44 }
 0x226   :  { %v6254_v55 = vsub.f32 %v510_v44, %v1209_v49 }
 0x239   :  { %v6171_v12 = vpop.permute.xlu0 %436 }
 0x23a   :  { %v511_v13 = vsel %vm7599_vm10, %v5928_v43, %v6171_v12 }
 0x23d   :  { %v6173_v16 = vpop.permute.xlu0 %442 }
 0x241   :  { %v6181_v19 = vpop.permute.xlu0 %448 }
 0x242   :  { %v513_v47 = vsel %vm7599_vm10, %v5980_v6, %v6181_v19 }
 0x244   :  { %v417_v60 = vpop.permute.xlu1 %416 }
 0x245   :  { %v423_v53 = vpop.permute.xlu0 %422 }
 0x248   :  { %v429_v32 = vpop.permute.xlu1 %428 }
 0x24c   :  { %v415_v58 = vpop.permute.xlu1 %414 }
 0x24d   :  { %v6184_v48 = vsel %vm7599_vm10, %v413_v35, %v415_v58  ;;  %v6187_v3 = vsel %vm7599_vm10, %v415_v58, %v417_v60  ;;  %v1213_v60 = vand.u32 4294901760, %v511_v13  ;;  %v1306_v58 = vsub.f32 %v6223_v25, %v7572_v34 }
 0x24e   :  { %v1195_v26 = vand.u32 4294901760, %v6184_v48  ;;  %v1868_v4 = vand.u32 4294901760, %v6187_v3 }
 0x250   :  { %v6193_v39 = vpack.c.bf16 %v1868_v4, %v1865_v10  ;;  %v421_v41 = vpop.permute.xlu1 %420  ;;  %v6197_v15 = vpack.c.bf16 %v1195_v26, %v1191_v5  ;;  %v7573_v5 = vand.u32 4294901760, %v6254_v55  ;;  %v6283_v51 = vsub.f32 %v6184_v48, %v1195_v26 }
 0x251   :  { %v6208_v62 = vsel %vm7599_vm10, %v421_v41, %v423_v53  ;;  %v465_v20 = vsel %vm7599_vm10, %v419_v54, %v421_v41  ;;  %v7571_v54 = vand.u32 4294901760, %v6225_v38  ;;  %v6278_v41 = vpack.c.bf16 %v1213_v60, %v1209_v49 }
 0x252   :  { %7652 = vst [vmem:[#allocation5_spill] sm:$0xff] %v6193_v39  ;;  %5049 = vmatprep.subr.bf16.mxu1 %v6197_v15  ;;  %5146 = vmatpush3.bf16.msra.mxu0 %v6193_v39  ;;  %v7576_v8 = vand.u32 4294901760, %v6208_v62  ;;  %v1199_v33 = vand.u32 4294901760, %v465_v20  ;;  %v512_v48 = vsel %vm7599_vm10, %v5944_v7, %v6173_v16  ;;  %v1307_v26 = vand.u32 4294901760, %v1306_v58 }
 0x253   :  { %5051 = vmatpush1.bf16.msra.mxu1 %v6199_v17  ;;  %5147 = vmatprep.subr.bf16.mxu0 %v7577_v22  ;;  %v1318_v42 = vsub.f32 %v6225_v38, %v7571_v54  ;;  %v6311_v44 = vsub.f32 %v6254_v55, %v7573_v5  ;;  %v6317_v7 = vsub.f32 %v511_v13, %v1213_v60  ;;  %v7580_v58 = vand.u32 4294901760, %v6283_v51 }
 0x254   :  { %v427_v27 = vpop.permute.xlu1 %426  ;;  %v1217_v54 = vand.u32 4294901760, %v512_v48 }
 0x255   :  { %v467_v50 = vsel %vm7599_vm10, %v425_v52, %v427_v27  ;;  %v6217_v21 = vsel %vm7599_vm10, %v427_v27, %v429_v32  ;;  %v7570_v52 = vand.u32 4294901760, %v6227_v1  ;;  %v6299_v27 = vsub.f32 %v6246_v31, %v7569_v61 }
 0x256   :  { %v1203_v14 = vand.u32 4294901760, %v467_v50  ;;  %v7579_v18 = vand.u32 4294901760, %v6217_v21 }
 0x258   :  { %v6233_v63 = vpack.c.bf16 %v7579_v18, %v7576_v8  ;;  %v433_v29 = vpop.permute.xlu1 %432  ;;  %v6235_v45 = vpack.c.bf16 %v1203_v14, %v1199_v33  ;;  %v6288_v53 = vsub.f32 %v467_v50, %v1203_v14  ;;  %v435_v50 = vpop.permute.xlu0 %434  ;;  %v6313_v14 = vsub.f32 %v465_v20, %v1199_v33 }
 0x259   :  { %v469_v35 = vsel %vm7599_vm10, %v431_v0, %v433_v29  ;;  %v1294_v0 = vsub.f32 %v6219_v59, %v7574_v11 }
 0x25a   :  { %7653 = vst [vmem:[#allocation6_spill] sm:$0xff] %v6233_v63  ;;  %5149 = vmatpush3.bf16.msra.mxu0 %v6233_v63  ;;  %5053 = vmatprep.subr.bf16.mxu1 %v6235_v45  ;;  %v1207_v30 = vand.u32 4294901760, %v469_v35  ;;  %v7581_v11 = vand.u32 4294901760, %v6288_v53  ;;  %v7582_v9 = vand.u32 4294901760, %v6313_v14 }
 0x25b   :  { %5150 = vmatprep.subr.bf16.mxu0 %v7577_v22  ;;  %5055 = vmatpush1.bf16.msra.mxu1 %v6240_v56  ;;  %v1295_v23 = vand.u32 4294901760, %v1294_v0  ;;  %v1319_v0 = vand.u32 4294901760, %v1318_v42  ;;  %v1289_v42 = vand.u32 4294901760, %v6294_v46 }
 0x25c   :  { %v439_v43 = vpop.permute.xlu1 %438  ;;  %v455_v60 = vpop.permute.xlu0 %454  ;;  %v6340_v18 = vsub.f32 %v469_v35, %v1207_v30  ;;  %v1324_v35 = vsub.f32 %v6288_v53, %v7581_v11 }
 0x25d   :  { %v471_v32 = vsel %vm7599_vm10, %v6171_v12, %v439_v43  ;;  %v1330_v12 = vsub.f32 %v6227_v1, %v7570_v52  ;;  %v1221_v52 = vand.u32 4294901760, %v513_v47  ;;  %v6328_v13 = vpack.c.bf16 %v1307_v26, %v1295_v23 }
 0x25e   :  { %v1211_v57 = vand.u32 4294901760, %v471_v32  ;;  %v6347_v23 = vsub.f32 %v512_v48, %v1217_v54  ;;  %v1325_v46 = vand.u32 4294901760, %v1324_v35 }
 0x25f   :  { %v1331_v61 = vand.u32 4294901760, %v1330_v12  ;;  %v6331_v12 = vsel %vm7599_vm10, %v433_v29, %v435_v50  ;;  %v6338_v22 = vpack.c.bf16 %v1221_v52, %v1217_v54  ;;  %v7583_v29 = vand.u32 4294901760, %v6317_v7 }
 0x260   :  { %v6274_v10 = vpop.permute.xlu1 %444  ;;  %v6276_v36 = vpack.c.bf16 %v1211_v57, %v1207_v30  ;;  %v6325_v33 = vsub.f32 %v471_v32, %v1211_v57  ;;  %v1300_v57 = vsub.f32 %v6283_v51, %v7580_v58  ;;  %v1877_v30 = vand.u32 4294901760, %v6331_v12 }
 0x261   :  { %v473_v6 = vsel %vm7599_vm10, %v6173_v16, %v6274_v10  ;;  %v6336_v8 = vpack.c.bf16 %v1331_v61, %v1319_v0  ;;  %7654 = vst [vmem:[#allocation7_spill] sm:$0xff] %v6338_v22  ;;  %v6359_v58 = vsub.f32 %v513_v47, %v1221_v52  ;;  %v6364_v54 = vsub.f32 %v6187_v3, %v1868_v4  ;;  %v447_v47 = vpop.permute.xlu0 %446 }
 0x262   :  { %5057 = vmatprep.subr.bf16.mxu1 %v6276_v36  ;;  %v1215_v34 = vand.u32 4294901760, %v473_v6  ;;  %v7586_v0 = vand.u32 4294901760, %v6325_v33  ;;  %v1301_v20 = vand.u32 4294901760, %v1300_v57  ;;  %v1354_v3 = vsub.f32 %v6317_v7, %v7583_v29 }
 0x263   :  { %5059 = vmatpush1.bf16.msra.mxu1 %v6278_v41  ;;  %v7658_v4 = vand.u32 4294901760, %v6217_v21 }
 0x264   :  { %v6315_v49 = vpop.permute.xlu1 %450  ;;  %v1348_v57 = vsub.f32 %v6325_v33, %v7586_v0  ;;  %v5064_v0 = vpack.c.bf16 %v1301_v20, %v1289_v42 }
 0x265   :  { %v475_v16 = vsel %vm7599_vm10, %v6181_v19, %v6315_v49 }
 0x266   :  { %v1219_v5 = vand.u32 4294901760, %v475_v16  ;;  %v1349_v28 = vand.u32 4294901760, %v1348_v57  ;;  %v459_v57 = vpop.permute.xlu0 %458 }
 0x268   :  { %v6333_v19 = vpack.c.bf16 %v1219_v5, %v1215_v34  ;;  %v6355_v61 = vsub.f32 %v475_v16, %v1219_v5  ;;  %v1312_v5 = vsub.f32 %v6313_v14, %v7582_v9  ;;  %v6371_v16 = vsub.f32 %v473_v6, %v1215_v34 }
 0x269   :  { %v441_v32 = vpop.permute.xlu1 %440  ;;  %v474_v34 = vsel %vm7599_vm10, %v6274_v10, %v447_v47  ;;  %v7660_v47 = vmov 0.0|0.0   ;;  %v7661_v9 = vand.u32 4294901760, %v6340_v18 }
 0x26a   :  { %v472_v26 = vsel %vm7599_vm10, %v439_v43, %v441_v32  ;;  %5061 = vmatprep.subr.bf16.mxu1 %v6333_v19  ;;  %v7655_v43 = vld [vmem:[#allocation3_spill] sm:$0xff]  ;;  %v1313_v10 = vand.u32 4294901760, %v1312_v5  ;;  %v1883_v5 = vand.u32 4294901760, %v474_v34 }
 0x26b   :  { %v1880_v50 = vand.u32 4294901760, %v472_v26  ;;  %5063 = vmatpush1.bf16.msra.mxu1 %v6338_v22  ;;  %v514_v48 = vsel %vm7599_vm10, %v7655_v43, %v455_v60  ;;  %v1336_v29 = vsub.f32 %v6340_v18, %v7661_v9  ;;  %v7663_v9 = vld [vmem:[#allocation4_spill] sm:$0xff]  ;;  %v7664_v22 = vand.u32 4294901760, %v6355_v61 }
 0x26c   :  { %v6396_v35 = vand.u32 4294901760, %v514_v48  ;;  %v5068_v52 = vpack.c.bf16 %v1325_v46, %v1313_v10  ;;  %v1355_v46 = vand.u32 4294901760, %v1354_v3 }
 0x26d   :  { %v6373_v32 = vpack.c.bf16 %v1880_v50, %v1877_v30  ;;  %v457_v11 = vpop.permute.xlu1 %456 }
 0x26e   :  { %v477_v43 = vsel %vm7599_vm10, %v455_v60, %v457_v11  ;;  %v6394_v60 = vsub.f32 %v6217_v21, %v7658_v4  ;;  %7659 = vst [vmem:[#allocation9_spill] sm:$0xff] %v6396_v35  ;;  %v7662_v21 = vand.u32 4294901760, %v6208_v62  ;;  %v478_v3 = vsel %vm7599_vm10, %v457_v11, %v459_v57 }
 0x26f   :  { %7656 = vst [vmem:[#allocation3_spill] sm:$0xff] %v6373_v32  ;;  %v6383_v6 = vand.u32 4294901760, %v477_v43  ;;  %5152 = vmatpush3.bf16.msra.mxu0 %v6373_v32 }
 0x270   :  { %5153 = vmatprep.subr.bf16.mxu0 %v7660_v47  ;;  %v6408_v4 = vsub.f32 %v6208_v62, %v7662_v21  ;;  %v1372_v62 = vsub.f32 %v6355_v61, %v7664_v22  ;;  %v7665_v21 = vand.u32 4294901760, %v6364_v54  ;;  %v1337_v22 = vand.u32 4294901760, %v1336_v29 }
 0x271   :  { %7657 = vst [vmem:[#allocation8_spill] sm:$0xff] %v6383_v6  ;;  %v453_v32 = vpop.permute.xlu1 %452  ;;  %1224 = vmatprep.subr.mxu1 %v6383_v6  ;;  %v6414_v20 = vsub.f32 %v477_v43, %v6383_v6 }
 0x272   :  { %v476_v63 = vsel %vm7599_vm10, %v6315_v49, %v453_v32  ;;  %1226 = vmatpush1.msra.mxu1 %v6396_v35  ;;  %v1959_v39 = vsub.f32 %v6364_v54, %v7665_v21  ;;  %v6424_v32 = vsub.f32 %v472_v26, %v1880_v50  ;;  %v7667_v21 = vand.u32 4294901760, %v6371_v16 }
 0x273   :  { %v1886_v42 = vand.u32 4294901760, %v476_v63  ;;  %5065 = vmatprep.subr.bf16.mxu1 %v5064_v0  ;;  %1279 = vmatmul.mubr.f32.vlgmr.msra.gmra.mrb[2].mxu1 %v7663_v9  ;;  %v7666_v0 = vand.u32 4294901760, %v6359_v58  ;;  %v6441_v50 = vsub.f32 %v6331_v12, %v1877_v30  ;;  %v5072_v29 = vpack.c.bf16 %v1349_v28, %v1337_v22 }
 0x274   :  { %5067 = vmatpush1.bf16.msra.mxu1 %v6328_v13  ;;  %1439 = vmatprep.mubr.f32.mxu1 %v7633_v24  ;;  %v1360_v49 = vsub.f32 %v6371_v16, %v7667_v21  ;;  %v6438_v13 = vsub.f32 %v514_v48, %v6396_v35  ;;  %v1383_v21 = vand.u32 4294901760, %v6414_v20  ;;  %v7669_v26 = vand.u32 4294901760, %v6394_v60 }
 0x275   :  { %v1378_v43 = vsub.f32 %v6359_v58, %v7666_v0  ;;  %v6431_v10 = vpack.c.bf16 %v1886_v42, %v1883_v5  ;;  %5069 = vmatprep.subr.bf16.mxu1 %v5068_v52  ;;  %v7668_v0 = vand.u32 4294901760, %v6347_v23  ;;  %v1373_v52 = vand.u32 4294901760, %v1372_v62 }
 0x276   :  { %v1973_v48 = vsub.f32 %v6394_v60, %v7669_v26  ;;  %v6453_v12 = vsub.f32 %v476_v63, %v1886_v42  ;;  %v1960_v11 = vand.u32 4294901760, %v1959_v39  ;;  %v6457_v30 = vand.u32 4294901760, %v478_v3 }
 0x277   :  { %v1366_v6 = vsub.f32 %v6347_v23, %v7668_v0  ;;  %5155 = vmatpush3.bf16.msra.mxu0 %v6431_v10  ;;  %v7670_v28 = vand.u32 4294901760, %v6311_v44  ;;  %v1361_v57 = vand.u32 4294901760, %v1360_v49  ;;  %v1379_v22 = vand.u32 4294901760, %v1378_v43 }
 0x278   :  { %5071 = vmatpush1.bf16.msra.mxu1 %v6336_v8  ;;  %4764 = vmatprep.subr.mxu0 %v7633_v24  ;;  %v7671_v0 = vand.u32 4294901760, %v6408_v4  ;;  %v1389_v63 = vand.u32 4294901760, %v6438_v13  ;;  %v1979_v42 = vand.u32 4294901760, %v6441_v50  ;;  %v6466_v8 = vsub.f32 %v474_v34, %v1883_v5 }
 0x279   :  { %5073 = vmatprep.subr.bf16.mxu1 %v5072_v29  ;;  %v5074_v62 = vpack.c.bf16 %v1355_v46, %v7670_v28  ;;  %v5076_v39 = vpack.c.bf16 %v1373_v52, %v1361_v57  ;;  %v1367_v35 = vand.u32 4294901760, %v1366_v6  ;;  %v1384_v44 = vsub.f32 %v6414_v20, %v1383_v21 }
 0x27a   :  { %v1966_v26 = vsub.f32 %v6408_v4, %v7671_v0  ;;  %v7672_v49 = vand.u32 4294901760, %v6424_v32  ;;  %v2000_v43 = vand.u32 4294901760, %v6453_v12  ;;  %v7673_v34 = vand.u32 4294901760, %v6299_v27 }
 0x27b   :  { %4765 = vmatpush3.msra.mxu0 %v6457_v30  ;;  %v1974_v29 = vand.u32 4294901760, %v1973_v48  ;;  %v5078_v6 = vpack.c.bf16 %v1379_v22, %v1367_v35  ;;  %v1980_v52 = vsub.f32 %v6441_v50, %v1979_v42  ;;  %v1993_v28 = vand.u32 4294901760, %v6466_v8 }
 0x27c   :  { %v1987_v46 = vsub.f32 %v6424_v32, %v7672_v49  ;;  %5075 = vmatpush1.bf16.msra.mxu1 %v5074_v62  ;;  %5156 = vmatprep.subr.bf16.mxu0 %v7660_v47  ;;  %v5157_v5 = vpack.c.bf16 %v1960_v11, %v7673_v34  ;;  %v1967_v57 = vand.u32 4294901760, %v1966_v26  ;;  %v1390_v62 = vsub.f32 %v6438_v13, %v1389_v63 }
 0x27d   :  { %5077 = vmatprep.subr.bf16.mxu1 %v5076_v39  ;;  %4767 = vmatmul.mubr.f32.vlgmr.msra.gmra.mrb[2].mxu0 %v7663_v9  ;;  %v1385_v27 = vand.u32 4294901760, %v1384_v44  ;;  %v6491_v35 = vsub.f32 %v478_v3, %v6457_v30  ;;  %v2001_v48 = vsub.f32 %v6453_v12, %v2000_v43  ;;  %v1994_v22 = vsub.f32 %v6466_v8, %v1993_v28 }
 0x27e   :  { %5158 = vmatpush3.bf16.msra.mxu0 %v5157_v5  ;;  %4787 = vmatprep.mubr.msk.f32.mxu0 %vm7601_vm9, %v7633_v24  ;;  %v1988_v9 = vand.u32 4294901760, %v1987_v46  ;;  %v5160_v11 = vpack.c.bf16 %v1974_v29, %v1967_v57  ;;  %v1391_v0 = vand.u32 4294901760, %v1390_v62  ;;  %v1981_v26 = vand.u32 4294901760, %v1980_v52 }
 0x27f   :  { %5159 = vmatprep.subr.bf16.mxu0 %v7660_v47  ;;  %v5080_v3 = vpack.c.bf16 %v6283_v51, %v6237_v2  ;;  %v2007_v39 = vand.u32 4294901760, %v6491_v35  ;;  %v2002_v44 = vand.u32 4294901760, %v2001_v48  ;;  %v5082_v46 = vpack.c.bf16 %v6223_v25, %v6219_v59 }
 0x280   :  { %5079 = vmatpush1.bf16.msra.mxu1 %v5078_v6  ;;  %v5163_v49 = vpack.c.bf16 %v1988_v9, %v1981_v26  ;;  %v5084_v34 = vpack.c.bf16 %v6288_v53, %v6313_v14  ;;  %v1995_v5 = vand.u32 4294901760, %v1994_v22  ;;  %v5086_v6 = vpack.c.bf16 %v6227_v1, %v6225_v38 }
 0x281   :  { %1386 = vmatprep.subr.mxu1 %v1385_v27  ;;  %v2008_v52 = vsub.f32 %v6491_v35, %v2007_v39  ;;  %v5088_v57 = vpack.c.bf16 %v6325_v33, %v6340_v18  ;;  %v5090_v27 = vpack.c.bf16 %v6317_v7, %v6254_v55  ;;  %v5092_v9 = vpack.c.bf16 %v6355_v61, %v6371_v16 }
 0x282   :  { %5161 = vmatpush3.bf16.msra.mxu0 %v5160_v11  ;;  %v5166_v29 = vpack.c.bf16 %v2002_v44, %v1995_v5  ;;  %v5169_v48 = vpack.c.bf16 %v6364_v54, %v6246_v31  ;;  %v5094_v11 = vpack.c.bf16 %v6359_v58, %v6347_v23  ;;  %v5172_v22 = vpack.c.bf16 %v6394_v60, %v6408_v4  ;;  %v7677_v5 = vld [vmem:[#allocation6_spill] sm:$0xff] }
 0x283   :  { %5162 = vmatprep.subr.bf16.mxu0 %v7660_v47  ;;  %v2009_v62 = vand.u32 4294901760, %v2008_v52  ;;  %v5178_v26 = vpack.c.bf16 %v6453_v12, %v6466_v8 }
 0x284   :  { %1392 = vmatpush1.msra.mxu1 %v1391_v0  ;;  %v5175_v0 = vpack.c.bf16 %v6424_v32, %v6441_v50 }
 0x285   :  { %5081 = vmatprep.subr.bf16.mxu1 %v5080_v3  ;;  %1441 = vmatmul.mubr.f32.vlgmr.msra.gmra.mrb[2].mxu1 %v5933_v40 }
 0x286   :  { %5164 = vmatpush3.bf16.msra.mxu0 %v5163_v49  ;;  %5083 = vmatpush1.bf16.msra.mxu1 %v5082_v46  ;;  %v7674_v49 = vld [vmem:[#allocation5_spill] sm:$0xff]  ;;  %v7675_v46 = vld [vmem:[#allocation7_spill] sm:$0xff] }
 0x287   :  { %5085 = vmatprep.subr.bf16.mxu1 %v5084_v34  ;;  %5165 = vmatprep.subr.bf16.mxu0 %v7660_v47  ;;  %v7676_v34 = vld [vmem:[#allocation8_spill] sm:$0xff] }
 0x288   :  { %1547 = vmatprep.mubr.f32.mxu1 %v7633_v24 }
 0x28a   :  { %5167 = vmatpush3.bf16.msra.mxu0 %v5166_v29  ;;  %5087 = vmatpush1.bf16.msra.mxu1 %v5086_v6  ;;  %v7678_v29 = vand.u32 4294901760, %v6237_v2  ;;  %v7679_v6 = vand.u32 4294901760, %v6283_v51  ;;  %v7686_v51 = vld [vmem:[#allocation3_spill] sm:$0xff] }
 0x28b   :  { %5089 = vmatprep.subr.bf16.mxu1 %v5088_v57  ;;  %4785 = vmatprep.subr.mxu0 %v7633_v24  ;;  %v7680_v57 = vld [vmem:[#allocation9_spill] sm:$0xff] }
 0x28c   :  { %v5112_v52 = vpack.c.bf16 %v7679_v6, %v7678_v29  ;;  %v7692_v29 = vand.u32 4294901760, %v6317_v7  ;;  %v7698_v7 = vand.u32 4294901760, %v6359_v58  ;;  %v7701_v58 = vand.u32 4294901760, %v6424_v32 }
 0x28e   :  { %4786 = vmatpush3.msra.mxu0 %v2009_v62  ;;  %5091 = vmatpush1.bf16.msra.mxu1 %v5090_v27  ;;  %v7682_v62 = vand.u32 4294901760, %v6223_v25  ;;  %v7688_v25 = vand.u32 4294901760, %v6227_v1  ;;  %v7694_v1 = vand.u32 4294901760, %v6355_v61  ;;  %v7700_v61 = vand.u32 4294901760, %v6394_v60 }
 0x28f   :  { %5168 = vmatprep.subr.bf16.mxu0 %v7660_v47  ;;  %5093 = vmatprep.subr.bf16.mxu1 %v5092_v9  ;;  %v7683_v9 = vld [vmem:[#allocation2_spill] sm:$0xff] }
 0x290   :  { %4788 = vmatmul.mubr.f32.vlgmr.msra.gmra.mrb[2].mxu0 %v5933_v40 }
 0x291   :  { %5170 = vmatpush3.bf16.msra.mxu0 %v5169_v48  ;;  %4808 = vmatprep.mubr.msk.f32.mxu0 %vm7601_vm9, %v7633_v24  ;;  %v7684_v48 = vand.u32 4294901760, %v6313_v14  ;;  %v7690_v14 = vand.u32 4294901760, %v6325_v33  ;;  %v7696_v33 = vand.u32 4294901760, %v6364_v54 }
 0x292   :  { %5095 = vmatpush1.bf16.msra.mxu1 %v5094_v11  ;;  %5171 = vmatprep.subr.bf16.mxu0 %v7660_v47  ;;  %v7685_v11 = vand.u32 4294901760, %v6288_v53  ;;  %v7691_v53 = vand.u32 4294901760, %v6254_v55  ;;  %v7697_v55 = vand.u32 4294901760, %v6347_v23  ;;  %v5199_v23 = vpack.c.bf16 %v7701_v58, %v1979_v42 }
 0x293   :  { %1497 = vmatprep.subr.mxu1 %v6414_v20 }
 0x294   :  { %v5116_v2 = vpack.c.bf16 %v7685_v11, %v7684_v48  ;;  %v5122_v6 = vpack.c.bf16 %v7692_v29, %v7691_v53 }
 0x295   :  { %5173 = vmatpush3.bf16.msra.mxu0 %v5172_v22 }
 0x296   :  { %1500 = vmatpush1.msra.mxu1 %v6438_v13  ;;  %5174 = vmatprep.subr.bf16.mxu0 %v7660_v47 }
 0x297   :  { %5097 = vmatprep.subr.bf16.mxu1 %v6197_v15  ;;  %1550 = vmatmul.mubr.f32.vlgmr.msra.gmra.mrb[2].mxu1 %v5940_v37 }
 0x298   :  { %5099 = vmatpush1.bf16.msra.mxu1 %v6199_v17  ;;  %1638 = vmatprep.mubr.f32.mxu1 %v7633_v24 }
 0x299   :  { %5176 = vmatpush3.bf16.msra.mxu0 %v5175_v0  ;;  %5101 = vmatprep.subr.bf16.mxu1 %v6235_v45  ;;  %v7689_v0 = vand.u32 4294901760, %v6340_v18  ;;  %v7695_v18 = vand.u32 4294901760, %v6246_v31  ;;  %v7699_v31 = vand.u32 4294901760, %v6408_v4 }
 0x29a   :  { %5177 = vmatprep.subr.bf16.mxu0 %v7660_v47 }
 0x29b   :  { %v5196_v54 = vpack.c.bf16 %v7700_v61, %v7699_v31 }
 0x29c   :  { %5103 = vmatpush1.bf16.msra.mxu1 %v6240_v56  ;;  %v6547_v3 = vpop.f32.mrb[0].mxu1 }
 0x29d   :  { %5179 = vmatpush3.bf16.msra.mxu0 %v5178_v26  ;;  %5105 = vmatprep.subr.bf16.mxu1 %v6276_v36  ;;  %v6550_v44 = vpop.f32.mrb[1].mxu1  ;;  %v5120_v26 = vpack.c.bf16 %v7690_v14, %v7689_v0 }
 0x29e   :  { %4806 = vmatprep.subr.mxu0 %v7633_v24 }
 0x2a0   :  { %5107 = vmatpush1.bf16.msra.mxu1 %v6278_v41 }
 0x2a1   :  { %4807 = vmatpush3.msra.mxu0 %v6491_v35  ;;  %5109 = vmatprep.subr.bf16.mxu1 %v6333_v19 }
 0x2a2   :  { %5180 = vmatprep.subr.bf16.mxu0 %v7660_v47  ;;  %4809 = vmatmul.mubr.f32.vlgmr.msra.gmra.mrb[2].mxu0 %v5940_v37  ;;  %v7681_v37 = vand.u32 4294901760, %v6219_v59  ;;  %v7687_v59 = vand.u32 4294901760, %v6225_v38  ;;  %v7693_v38 = vand.u32 4294901760, %v6371_v16  ;;  %v5126_v16 = vpack.c.bf16 %v7698_v7, %v7697_v55 }
 0x2a3   :  { %5182 = vmatpush3.bf16.msra.mxu0 %v7674_v49  ;;  %4829 = vmatprep.mubr.msk.f32.mxu0 %vm7601_vm9, %v7633_v24 }
 0x2a4   :  { %5111 = vmatpush1.bf16.msra.mxu1 %v7675_v46  ;;  %5183 = vmatprep.subr.bf16.mxu0 %v7660_v47  ;;  %v5114_v27 = vpack.c.bf16 %v7682_v62, %v7681_v37  ;;  %v5118_v22 = vpack.c.bf16 %v7688_v25, %v7687_v59  ;;  %v5193_v37 = vpack.c.bf16 %v7696_v33, %v7695_v18 }
 0x2a5   :  { %1589 = vmatprep.subr.mxu1 %v7676_v34 }
 0x2a7   :  { %5185 = vmatpush3.bf16.msra.mxu0 %v7677_v5 }
 0x2a8   :  { %1591 = vmatpush1.msra.mxu1 %v7680_v57  ;;  %5186 = vmatprep.subr.bf16.mxu0 %v7660_v47 }
 0x2a9   :  { %5113 = vmatprep.subr.bf16.mxu1 %v5112_v52  ;;  %1642 = vmatmul.mubr.f32.vlgmr.msra.gmra.mrb[2].mxu1 %v7683_v9  ;;  %v5124_v52 = vpack.c.bf16 %v7694_v1, %v7693_v38 }
 0x2aa   :  { %5115 = vmatpush1.bf16.msra.mxu1 %v5114_v27  ;;  %1766 = vmatprep.mubr.f32.mxu1 %v7633_v24 }
 0x2ab   :  { %5188 = vmatpush3.bf16.msra.mxu0 %v7686_v51  ;;  %5117 = vmatprep.subr.bf16.mxu1 %v5116_v2 }
 0x2ac   :  { %5189 = vmatprep.subr.bf16.mxu0 %v7660_v47 }
 0x2ae   :  { %5119 = vmatpush1.bf16.msra.mxu1 %v5118_v22 }
 0x2af   :  { %5191 = vmatpush3.bf16.msra.mxu0 %v6431_v10  ;;  %5121 = vmatprep.subr.bf16.mxu1 %v5120_v26 }
 0x2b0   :  { %4827 = vmatprep.subr.mxu0 %v7633_v24 }
 0x2b2   :  { %5123 = vmatpush1.bf16.msra.mxu1 %v5122_v6 }
 0x2b3   :  { %4828 = vmatpush3.msra.mxu0 %v6457_v30  ;;  %5125 = vmatprep.subr.bf16.mxu1 %v5124_v52 }
 0x2b4   :  { %5192 = vmatprep.subr.bf16.mxu0 %v7660_v47  ;;  %4830 = vmatmul.mubr.f32.vlgmr.msra.gmra.mrb[2].mxu0 %v7683_v9 }
 0x2b5   :  { %5194 = vmatpush3.bf16.msra.mxu0 %v5193_v37  ;;  %4850 = vmatprep.mubr.msk.f32.mxu0 %vm7601_vm9, %v7633_v24 }
 0x2b6   :  { %5127 = vmatpush1.bf16.msra.mxu1 %v5126_v16  ;;  %5195 = vmatprep.subr.bf16.mxu0 %v7660_v47 }
 0x2b7   :  { %1715 = vmatprep.subr.mxu1 %v1383_v21 }
 0x2b9   :  { %5197 = vmatpush3.bf16.msra.mxu0 %v5196_v54 }
 0x2ba   :  { %1719 = vmatpush1.msra.mxu1 %v1389_v63  ;;  %5198 = vmatprep.subr.bf16.mxu0 %v7660_v47 }
 0x2bb   :  { %5129 = vmatprep.subr.bf16.mxu1 %v6197_v15  ;;  %1768 = vmatmul.mubr.f32.vlgmr.msra.gmra.mrb[2].mxu1 %v5933_v40  ;;  %v5202_v15 = vpack.c.bf16 %v2000_v43, %v1993_v28 }
 0x2bc   :  { %5131 = vmatpush1.bf16.msra.mxu1 %v6199_v17  ;;  %1856 = vmatprep.mubr.f32.mxu1 %v7633_v24 }
 0x2bd   :  { %5200 = vmatpush3.bf16.msra.mxu0 %v5199_v23  ;;  %5133 = vmatprep.subr.bf16.mxu1 %v6235_v45 }
 0x2be   :  { %5201 = vmatprep.subr.bf16.mxu0 %v7660_v47 }
 0x2c0   :  { %5135 = vmatpush1.bf16.msra.mxu1 %v6240_v56 }
 0x2c1   :  { %5203 = vmatpush3.bf16.msra.mxu0 %v5202_v15  ;;  %5137 = vmatprep.subr.bf16.mxu1 %v6276_v36 }
 0x2c2   :  { %4848 = vmatprep.subr.mxu0 %v7633_v24 }
 0x2c4   :  { %5139 = vmatpush1.bf16.msra.mxu1 %v6278_v41 }
 0x2c5   :  { %4849 = vmatpush3.msra.mxu0 %v2007_v39  ;;  %5141 = vmatprep.subr.bf16.mxu1 %v6333_v19 }
 0x2c6   :  { %5204 = vmatprep.subr.bf16.mxu0 %v7660_v47  ;;  %4851 = vmatmul.mubr.f32.vlgmr.msra.gmra.mrb[2].mxu0 %v5933_v40 }
 0x2c7   :  { %5206 = vmatpush3.bf16.msra.mxu0 %v7674_v49  ;;  %4871 = vmatprep.mubr.msk.f32.mxu0 %vm7601_vm9, %v7633_v24 }
 0x2c8   :  { %5143 = vmatpush1.bf16.msra.mxu1 %v7675_v46  ;;  %5207 = vmatprep.subr.bf16.mxu0 %v7660_v47 }
 0x2c9   :  { %1807 = vmatprep.subr.mxu1 %v7676_v34 }
 0x2cb   :  { %5209 = vmatpush3.bf16.msra.mxu0 %v7677_v5 }
 0x2cc   :  { %1809 = vmatpush1.msra.mxu1 %v7680_v57  ;;  %5210 = vmatprep.subr.bf16.mxu0 %v7660_v47 }
 0x2cd   :  { %1858 = vmatmul.mubr.f32.vlgmr.msra.gmra.mrb[2].mxu1 %v5933_v40 }
 0x2ce   :  { %2911 = vmatprep.mubr.f32.mxu1 %v7633_v24 }
 0x2cf   :  { %5212 = vmatpush3.bf16.msra.mxu0 %v7686_v51 }
 0x2d0   :  { %5213 = vmatprep.subr.bf16.mxu0 %v7660_v47 }
 0x2d3   :  { %5215 = vmatpush3.bf16.msra.mxu0 %v6431_v10 }
 0x2d4   :  { %4869 = vmatprep.subr.mxu0 %v7633_v24 }
 0x2d7   :  { %4870 = vmatpush3.msra.mxu0 %v6457_v30 }
 0x2d8   :  { %4872 = vmatmul.mubr.f32.vlgmr.msra.gmra.mrb[2].mxu0 %v5933_v40  ;;  %5318 = vmatprep.subr.bf16.mxu0 %v7660_v47 }
 0x2d9   :  { %4897 = vmatprep.mubr.msk.f32.mxu0 %vm7601_vm9, %v7633_v24 }
 0x2ed   :  { %v1186_v17 = vpop.f32.mrb[0].mxu0 }
 0x2ee   :  { %v5348_v45 = vadd.f32 %v1186_v17, %v6547_v3  ;;  %v1188_v56 = vpop.f32.mrb[1].mxu0 }
 0x2ef   :  { %v5349_v36 = vadd.f32 %v1188_v56, %v6550_v44 }
 0x2f0   :  { %v2419_v12 = vmul.f32 0.01, %v5348_v45 }
 0x2f1   :  { %vm2415_vm11 = vcmp.gt.f32.partialorder %v5349_v36, 0.0  ;;  %v2420_v41 = vmul.f32 0.01, %v5349_v36 }
 0x2f3   :  { %v2425_v19 = vsel %vm2415_vm11, %v5349_v36, %v2420_v41  ;;  %vm2414_vm11 = vcmp.gt.f32.partialorder %v5348_v45, 0.0 }
 0x2f4   :  { %2453 = vrot.lane.b32.xlu1 %v2425_v19, %s5494_s2  ;;  %v2424_v63 = vsel %vm2414_vm11, %v5348_v45, %v2419_v12  ;;  %vm7705_vm11 = vcmask 302080  }
 0x2f5   :  { %vm7708_vm7 = vmmov %vm7705_vm11 }
 0x366   :  { %v2454_v8 = vpop.permute.xlu1 %2453 }
 0x3a0   :  { %v1859_v60 = vpop.f32.mrb[2].mxu1 }
 0x3a1   :  { %v1861_v4 = vpop.f32.mrb[3].mxu1  ;;  %v2421_v20 = vmul.f32 0.01, %v1859_v60  ;;  %vm2416_vm8 = vcmp.gt.f32.partialorder %v1859_v60, 0.0 }
 0x3a2   :  { %vm2417_vm10 = vcmp.gt.f32.partialorder %v1861_v4, 0.0  ;;  %v2422_v40 = vmul.f32 0.01, %v1861_v4 }
 0x3a3   :  { %v2426_v10 = vsel %vm2416_vm8, %v1859_v60, %v2421_v20  ;;  %vm7702_vm8 = vcmask 15360  }
 0x3a4   :  { %v2427_v32 = vsel %vm2417_vm10, %v1861_v4, %v2422_v40  ;;  %v2462_v28 = vsel %vm7702_vm8, 0.0, %v2454_v8  ;;  %vm7703_vm10 = vcmask 146432  }
 0x3a5   :  { %2615 = vrot.lane.b32.xlu0 %v2427_v32, %s5495_s22  ;;  %v2463_v39 = vsel %vm7703_vm10, %v2462_v28, 0.0  ;;  %vm7707_vm10 = vcmask 433152  }
 0x3a6   :  { %vm7709_vm13 = vmmov %vm7707_vm10 }
 0x3a9   :  { %2457 = vrot.lane.b32.xlu0 %v2426_v10, %s5494_s2 }
 0x3ab   :  { %v2410_v13 = vpop.f32.mrb[2].mxu0 }
 0x3ac   :  { %vm2418_vm9 = vcmp.gt.f32.partialorder %v2410_v13, 0.0  ;;  %v2423_v50 = vmul.f32 0.01, %v2410_v13  ;;  %v4873_v21 = vpop.f32.mrb[3].mxu0 }
 0x3ad   :  { %2590 = vrot.lane.b32.xlu0 %v2426_v10, %s5496_s23 }
 0x3ae   :  { %v2428_v30 = vsel %vm2418_vm9, %v2410_v13, %v2423_v50  ;;  %vm7704_vm9 = vcmask 162816  }
 0x3af   :  { %2619 = vrot.lane.b32.xlu1 %v2428_v30, %s5495_s22  ;;  %v2464_v46 = vsel %vm7704_vm9, %v2463_v39, %v2454_v8  ;;  %vm7710_vm9 = vcmask 310272  }
 0x3b0   :  { %v2465_v62 = vsel %vm7706_vm6, %v2464_v46, 0.0  ;;  %vm7715_vm6 = vcmask 162816  }
 0x3b1   :  { %2594 = vrot.lane.b32.xlu0 %v2427_v32, %s5496_s23  ;;  %v2466_v51 = vsel %vm7710_vm9, %v2465_v62, %v2454_v8 }
 0x3b3   :  { %2430 = vrot.lane.b32.xlu1 %v2424_v63, %s5474_s0 }
 0x3b7   :  { %2434 = vrot.lane.b32.xlu1 %v2425_v19, %s5474_s0  ;;  %s5503_s0 = smov 106  }
 0x417   :  { %v2616_v42 = vpop.permute.xlu0 %2615 }
 0x418   :  { %v2625_v27 = vsel %vm7702_vm8, 0.0, %v2616_v42  ;;  %vm7721_vm8 = vmmov %vm7710_vm9  ;;  %vm7724_vm9 = vcmask 736256  }
 0x41b   :  { %v6675_v43 = vpop.permute.xlu0 %2457 }
 0x41f   :  { %v2591_v35 = vpop.permute.xlu0 %2590 }
 0x420   :  { %v2600_v3 = vsel %vm7607_vm15, 0.0, %v2591_v35 }
 0x421   :  { %v6680_v44 = vpop.permute.xlu1 %2619  ;;  %v2601_v49 = vsel %vm55_vm0, %v2600_v3, 0.0 }
 0x422   :  { %v2602_v34 = vsel %vm7705_vm11, %v2601_v49, %v2591_v35  ;;  %vm7711_vm11 = vcmask 146432  }
 0x423   :  { %v2603_v9 = vsel %vm7707_vm10, %v2602_v34, 0.0  ;;  %v2626_v59 = vsel %vm7711_vm11, %v2625_v27, 0.0  ;;  %v6735_v17 = vpop.permute.xlu0 %2594 }
 0x424   :  { %v2604_v25 = vsel %vm7712_vm1, %v2603_v9, %v2591_v35  ;;  %v2627_v53 = vsel %vm7715_vm6, %v2626_v59, %v2616_v42  ;;  %vm2621_vm6 = vcmask 670720  }
 0x425   :  { %v6685_v5 = vpop.permute.xlu1 %2430  ;;  %v2605_v29 = vsel %vm63_vm2, %v2604_v25, 0.0  ;;  %v2622_v40 = vsel %vm2621_vm6, %v2616_v42, %v6680_v44 }
 0x426   :  { %v2438_v57 = vsel %vm7607_vm15, 0.0, %v6685_v5  ;;  %vm7713_vm15 = vmmov %vm7712_vm1  ;;  %vm7716_vm1 = vcmask 457728   ;;  %v2606_v33 = vsel %vm65_vm3, %v2605_v29, %v2591_v35 }
 0x427   :  { %v2439_v48 = vsel %vm55_vm0, %v2438_v57, 0.0  ;;  %vm7714_vm0 = vcmask 441344   ;;  %v2607_v61 = vsel %vm67_vm12, %v2606_v33, 0.0  ;;  %vm7725_vm11 = vmmov %vm7716_vm1 }
 0x428   :  { %v2440_v11 = vsel %vm7708_vm7, %v2439_v48, %v6685_v5  ;;  %v2467_v26 = vsel %vm7714_vm0, %v2466_v51, 0.0  ;;  %vm7720_vm7 = vcmask 588800   ;;  %vm7723_vm10 = vmmov %vm7714_vm0  ;;  %v2608_v15 = vsel %vm69_vm4, %v2607_v61, %v2591_v35 }
 0x429   :  { %v2441_v2 = vsel %vm7709_vm13, %v2440_v11, 0.0  ;;  %v2468_v52 = vsel %vm7716_vm1, %v2467_v26, %v2454_v8  ;;  %vm7717_vm13 = vcmask 293888   ;;  %vm2459_vm0 = vcmask 932864  }
 0x42a   :  { %v2442_v22 = vsel %vm7713_vm15, %v2441_v2, %v6685_v5  ;;  %v2628_v18 = vsel %vm7717_vm13, %v2627_v53, 0.0  ;;  %vm7718_vm15 = vcmask 1022976   ;;  %v2469_v16 = vsel %vm7720_vm7, %v2468_v52, 0.0  ;;  %vm7727_vm13 = vmmov %vm7720_vm7 }
 0x42b   :  { %v2443_v0 = vsel %vm63_vm2, %v2442_v22, 0.0  ;;  %vm7719_vm2 = vcmask 1039360   ;;  %v2629_v31 = vsel %vm7721_vm8, %v2628_v18, %v2616_v42  ;;  %v2609_v36 = vsel %vm71_vm14, %v2608_v15, 0.0 }
 0x42c   :  { %v2444_v14 = vsel %vm65_vm3, %v2443_v0, %v6685_v5  ;;  %vm7722_vm3 = vcmask 605184   ;;  %v2630_v23 = vsel %vm7723_vm10, %v2629_v31, 0.0  ;;  %vm7726_vm1 = vcmask 752640   ;;  %vm7734_vm10 = vmmov %vm7724_vm9 }
 0x42d   :  { %v2445_v6 = vsel %vm67_vm12, %v2444_v14, 0.0  ;;  %v2470_v58 = vsel %vm7722_vm3, %v2469_v16, %v2454_v8  ;;  %vm2596_vm12 = vcmask 941056   ;;  %v2631_v56 = vsel %vm7725_vm11, %v2630_v23, %v2616_v42 }
 0x42e   :  { %v2446_v38 = vsel %vm69_vm4, %v2445_v6, %v6685_v5  ;;  %v2471_v45 = vsel %vm7724_vm9, %v2470_v58, 0.0  ;;  %v2597_v41 = vsel %vm2596_vm12, %v2591_v35, %v6735_v17  ;;  %v2632_v60 = vsel %vm7727_vm13, %v2631_v56, 0.0  ;;  %vm7735_vm12 = vmmov %vm7726_vm1  ;;  %v2435_v35 = vpop.permute.xlu1 %2434 }
 0x42f   :  { %v2447_v1 = vsel %vm71_vm14, %v2446_v38, 0.0  ;;  %v2472_v19 = vsel %vm7726_vm1, %v2471_v45, %v2454_v8  ;;  %v2460_v4 = vsel %vm2459_vm0, %v2454_v8, %v6675_v43  ;;  %v2610_v20 = vsel %vm73_vm5, %v2609_v36, %v2597_v41  ;;  %vm7729_vm14 = vmmov %vm7722_vm3 }
 0x430   :  { %v2448_v37 = vsel %vm73_vm5, %v2447_v1, %v6685_v5  ;;  %v2633_v10 = vsel %vm7729_vm14, %v2632_v60, %v2622_v40  ;;  %vm7731_vm7 = vcmask 1022976   ;;  %vm7732_vm8 = vcmask 1031168  }
 0x431   :  { %v2449_v55 = vsel %vm7718_vm15, %v2448_v37, 0.0  ;;  %vm7728_vm15 = vcmask 883712   ;;  %v2611_v50 = vsel %vm7731_vm7, %v2610_v20, 0.0  ;;  %vm7733_vm3 = vcmask 1039360   ;;  %vm7738_vm6 = vmmov %vm7732_vm8 }
 0x432   :  { %v6719_v7 = vsel %vm7719_vm2, %v2449_v55, %v6685_v5  ;;  %v2473_v32 = vsel %vm7728_vm15, %v2472_v19, 0.0  ;;  %vm7730_vm2 = vcmask 900096   ;;  %v6759_v12 = vsel %vm7733_vm3, %v2611_v50, %v6735_v17  ;;  %vm7736_vm9 = vmmov %vm7728_vm15 }
 0x433   :  { %2525 = vrot.lane.b32.xlu1 %v6719_v7, %s5484_s13  ;;  %2503 = vrot.lane.b32.xlu0 %v6719_v7, %s5482_s11  ;;  %v2489_v54 = vrot.slane %v6719_v7, 4  ;;  %v2474_v13 = vsel %vm7730_vm2, %v2473_v32, %v2460_v4  ;;  %v2634_v30 = vsel %vm7734_vm10, %v2633_v10, 0.0  ;;  %v2652_v63 = vrot.slane %v6759_v12, 4  ;;  %vm7737_vm11 = vmmov %vm7730_vm2 }
 0x434   :  { %v2475_v21 = vsel %vm7732_vm8, %v2474_v13, 0.0  ;;  %v2635_v42 = vsel %vm7735_vm12, %v2634_v30, %v6680_v44  ;;  %vm7739_vm1 = vcmask 154624   ;;  %vm7740_vm13 = vcmask 121856  }
 0x435   :  { %v2636_v8 = vsel %vm7736_vm9, %v2635_v42, 0.0  ;;  %v2436_v27 = vsel %vm7739_vm1, %v6685_v5, %v2435_v35  ;;  %v2451_v9 = vsel %vm7740_vm13, %v6685_v5, 0.0  ;;  %vm7741_vm15 = vcmask 138240   ;;  %vm7745_vm8 = vmmov %vm7740_vm13 }
 0x436   :  { %v2452_v48 = vsel %vm7741_vm15, %v2451_v9, %v2436_v27  ;;  %vm7742_vm14 = vcmask 269312   ;;  %vm7744_vm7 = vcmask 400384   ;;  %v2613_v53 = vsel %vm7745_vm8, %v6735_v17, 0.0  ;;  %vm7747_vm10 = vmmov %vm7741_vm15 }
 0x437   :  { %2547 = vrot.lane.b32.xlu1 %v6719_v7, %s5486_s15  ;;  %2536 = vrot.lane.b32.xlu0 %v2489_v54, %s5487_s16  ;;  %vm7743_vm2 = vmmov %vm7742_vm14  ;;  %v2614_v6 = vsel %vm7747_vm10, %v2613_v53, %v6735_v17  ;;  %vm7752_vm1 = vcmask 1031168   ;;  %vm7754_vm15 = vcmask 900096  }
 0x438   :  { %vm7746_vm3 = vmmov %vm7743_vm2 }
 0x439   :  { %vm7748_vm12 = vmmov %vm7744_vm7 }
 0x43a   :  { %vm7749_vm9 = vmmov %vm7743_vm2 }
 0x43b   :  { %2558 = vrot.lane.b32.xlu0 %v2489_v54, %s5488_s17  ;;  %2492 = vrot.lane.b32.xlu1 %v2489_v54, %s5483_s12  ;;  %vm7753_vm13 = vmmov %vm7752_vm1 }
 0x43f   :  { %2642 = vrot.lane.b32.xlu0 %v6680_v44, %s5481_s10  ;;  %2514 = vrot.lane.b32.xlu1 %v2489_v54, %s5485_s14 }
 0x443   :  { %2477 = vrot.lane.b32.xlu1 %v2475_v21, %s5481_s10  ;;  %2479 = vrot.lane.b32.xlu0 %v6675_v43, %s5481_s10  ;;  %v2637_v43 = vsel %vm7737_vm11, %v2636_v8, %v6680_v44  ;;  %vm7750_vm11 = vcmask 1039360  }
 0x444   :  { %v2638_v28 = vsel %vm7738_vm6, %v2637_v43, 0.0  ;;  %vm7751_vm6 = vmmov %vm7750_vm11 }
 0x447   :  { %2666 = vrot.lane.b32.xlu1 %v6759_v12, %s5482_s11  ;;  %2655 = vrot.lane.b32.xlu0 %v2652_v63, %s5483_s12 }
 0x44b   :  { %2688 = vrot.lane.b32.xlu1 %v6759_v12, %s5484_s13  ;;  %2677 = vrot.lane.b32.xlu0 %v2652_v63, %s5485_s14 }
 0x44f   :  { %2640 = vrot.lane.b32.xlu1 %v2638_v28, %s5481_s10  ;;  %2699 = vrot.lane.b32.xlu0 %v2652_v63, %s5487_s16  ;;  %s5510_s10 = smov 98  }
 0x453   :  { %2710 = vrot.lane.b32.xlu1 %v6759_v12, %s5486_s15  ;;  %2721 = vrot.lane.b32.xlu0 %v2652_v63, %s5488_s17 }
 0x4a5   :  { %v6783_v39 = vpop.permute.xlu1 %2525  ;;  %v6785_v3 = vpop.permute.xlu0 %2503 }
 0x4a9   :  { %v6787_v49 = vpop.permute.xlu1 %2547  ;;  %v6789_v46 = vpop.permute.xlu0 %2536 }
 0x4ad   :  { %v6791_v44 = vpop.permute.xlu1 %2492  ;;  %v6793_v34 = vpop.permute.xlu0 %2558 }
 0x4b1   :  { %v6795_v57 = vpop.permute.xlu1 %2514  ;;  %v2643_v62 = vpop.permute.xlu0 %2642 }
 0x4b5   :  { %v2478_v11 = vpop.permute.xlu1 %2477  ;;  %v2480_v2 = vpop.permute.xlu0 %2479 }
 0x4b6   :  { %v6803_v51 = vsel %vm7742_vm14, %v2452_v48, %v2478_v11  ;;  %v2481_v59 = vsel %vm7743_vm2, %v2478_v11, %v2480_v2  ;;  %vm7755_vm14 = vcmask 1043456  }
 0x4b7   :  { %v6807_v25 = vsel %vm7744_vm7, %v2481_v59, 0.0  ;;  %2505 = vrot.lane.b32.xlu1 %v6803_v51, %s5482_s11  ;;  %v2490_v22 = vrot.slane %v6803_v51, 4  ;;  %vm7756_vm2 = vmmov %vm7755_vm14 }
 0x4b8   :  { %2507 = vrot.lane.b32.xlu0 %v6807_v25, %s5482_s11  ;;  %v2491_v0 = vrot.slane %v6807_v25, 4  ;;  %vm7757_vm7 = vmmov %vm7754_vm15 }
 0x4b9   :  { %v6823_v5 = vpop.permute.xlu1 %2666  ;;  %v6880_v33 = vpop.permute.xlu0 %2655  ;;  %vm7758_vm8 = vmmov %vm7756_vm2 }
 0x4ba   :  { %vm7760_vm10 = vmmov %vm7756_vm2 }
 0x4bb   :  { %2527 = vrot.lane.b32.xlu1 %v6803_v51, %s5484_s13 }
 0x4bc   :  { %2529 = vrot.lane.b32.xlu0 %v6807_v25, %s5484_s13 }
 0x4bd   :  { %v6831_v14 = vpop.permute.xlu1 %2688  ;;  %v6882_v37 = vpop.permute.xlu0 %2677 }
 0x4bf   :  { %2549 = vrot.lane.b32.xlu1 %v6803_v51, %s5486_s15 }
 0x4c0   :  { %2551 = vrot.lane.b32.xlu0 %v6807_v25, %s5486_s15 }
 0x4c1   :  { %v2641_v26 = vpop.permute.xlu1 %2640  ;;  %v6884_v55 = vpop.permute.xlu0 %2699 }
 0x4c2   :  { %v2644_v29 = vsel %vm7746_vm3, %v2641_v26, %v2643_v62  ;;  %v6848_v1 = vsel %vm7749_vm9, %v2614_v6, %v2641_v26  ;;  %vm7759_vm3 = vmmov %vm7756_vm2 }
 0x4c3   :  { %2571 = vrot.lane.b32.xlu1 %v6803_v51, %s5489_s18  ;;  %v6845_v38 = vsel %vm7748_vm12, %v2644_v29, 0.0  ;;  %v2653_v52 = vrot.slane %v6848_v1, 4  ;;  %vm7761_vm12 = vcmask 883712   ;;  %vm7762_vm9 = vmmov %vm7756_vm2 }
 0x4c4   :  { %2573 = vrot.lane.b32.xlu0 %v6807_v25, %s5489_s18  ;;  %v2654_v18 = vrot.slane %v6845_v38, 4 }
 0x4c5   :  { %v6886_v16 = vpop.permute.xlu1 %2710  ;;  %v6888_v31 = vpop.permute.xlu0 %2721 }
 0x4c7   :  { %2494 = vrot.lane.b32.xlu1 %v2490_v22, %s5483_s12 }
 0x4c8   :  { %2496 = vrot.lane.b32.xlu0 %v2491_v0, %s5483_s12 }
 0x4cb   :  { %2516 = vrot.lane.b32.xlu1 %v2490_v22, %s5485_s14 }
 0x4cc   :  { %2518 = vrot.lane.b32.xlu0 %v2491_v0, %s5485_s14 }
 0x4cf   :  { %2538 = vrot.lane.b32.xlu1 %v2490_v22, %s5487_s16 }
 0x4d0   :  { %2540 = vrot.lane.b32.xlu0 %v2491_v0, %s5487_s16 }
 0x4d3   :  { %2560 = vrot.lane.b32.xlu1 %v2490_v22, %s5488_s17 }
 0x4d4   :  { %2562 = vrot.lane.b32.xlu0 %v2491_v0, %s5488_s17 }
 0x4d7   :  { %2670 = vrot.lane.b32.xlu1 %v6845_v38, %s5482_s11 }
 0x4d8   :  { %2668 = vrot.lane.b32.xlu0 %v6848_v1, %s5482_s11 }
 0x4db   :  { %2692 = vrot.lane.b32.xlu1 %v6845_v38, %s5484_s13 }
 0x4dc   :  { %2690 = vrot.lane.b32.xlu0 %v6848_v1, %s5484_s13  ;;  %s5513_s13 = smov 76  }
 0x4df   :  { %2714 = vrot.lane.b32.xlu1 %v6845_v38, %s5486_s15 }
 0x4e0   :  { %2712 = vrot.lane.b32.xlu0 %v6848_v1, %s5486_s15 }
 0x4e3   :  { %2657 = vrot.lane.b32.xlu1 %v2653_v52, %s5483_s12 }
 0x4e4   :  { %2659 = vrot.lane.b32.xlu0 %v2654_v18, %s5483_s12  ;;  %s5512_s12 = smov 80  }
 0x4e7   :  { %2679 = vrot.lane.b32.xlu1 %v2653_v52, %s5485_s14 }
 0x4e8   :  { %2681 = vrot.lane.b32.xlu0 %v2654_v18, %s5485_s14 }
 0x4eb   :  { %2701 = vrot.lane.b32.xlu1 %v2653_v52, %s5487_s16 }
 0x4ec   :  { %2703 = vrot.lane.b32.xlu0 %v2654_v18, %s5487_s16 }
 0x4ef   :  { %2723 = vrot.lane.b32.xlu1 %v2653_v52, %s5488_s17 }
 0x4f0   :  { %2725 = vrot.lane.b32.xlu0 %v2654_v18, %s5488_s17  ;;  %s5517_s17 = smov 84  }
 0x4f3   :  { %2569 = vrot.lane.b32.xlu1 %v6719_v7, %s5489_s18 }
 0x4f4   :  { %2732 = vrot.lane.b32.xlu0 %v6759_v12, %s5489_s18 }
 0x4f7   :  { %2734 = vrot.lane.b32.xlu1 %v6848_v1, %s5489_s18 }
 0x4f8   :  { %2736 = vrot.lane.b32.xlu0 %v6845_v38, %s5489_s18 }
 0x529   :  { %v2506_v61 = vpop.permute.xlu1 %2505 }
 0x52a   :  { %v2508_v54 = vpop.permute.xlu0 %2507  ;;  %v2509_v40 = vsel %vm7752_vm1, %v6785_v3, %v2506_v61 }
 0x52b   :  { %v2510_v20 = vsel %vm7753_vm13, %v2506_v61, %v2508_v54  ;;  %vm7766_vm13 = vcmask 736256  }
 0x52d   :  { %v2528_v58 = vpop.permute.xlu1 %2527 }
 0x52e   :  { %v2530_v23 = vpop.permute.xlu0 %2529  ;;  %v2531_v9 = vsel %vm73_vm5, %v6783_v39, %v2528_v58 }
 0x52f   :  { %v2532_v48 = vsel %vm73_vm5, %v2528_v58, %v2530_v23 }
 0x531   :  { %v2550_v15 = vpop.permute.xlu1 %2549 }
 0x532   :  { %v2552_v17 = vpop.permute.xlu0 %2551 }
 0x535   :  { %v6890_v45 = vpop.permute.xlu1 %2571 }
 0x536   :  { %v6892_v56 = vpop.permute.xlu0 %2573 }
 0x539   :  { %v2495_v36 = vpop.permute.xlu1 %2494 }
 0x53a   :  { %v6894_v41 = vpop.permute.xlu0 %2496  ;;  %v2498_v60 = vsel %vm7751_vm6, %v6791_v44, %v2495_v36  ;;  %vm7764_vm6 = vcmask 752640  }
 0x53b   :  { %v2499_v19 = vsel %vm7750_vm11, %v2495_v36, %v6894_v41  ;;  %v6916_v63 = vsel %vm7759_vm3, %v6719_v7, %v2498_v60  ;;  %vm7763_vm11 = vmmov %vm7761_vm12  ;;  %v2553_v11 = vsel %vm7764_vm6, %v6787_v49, %v2550_v15 }
 0x53c   :  { %v2579_v13 = vsel %vm7755_vm14, %v6803_v51, %v2499_v19  ;;  %v2839_v44 = vand.u32 4294901760, %v6916_v63  ;;  %vm7765_vm1 = vmmov %vm7764_vm6 }
 0x53d   :  { %v2517_v4 = vpop.permute.xlu1 %2516  ;;  %v2837_v35 = vand.u32 4294901760, %v2579_v13  ;;  %v2554_v59 = vsel %vm7765_vm1, %v2550_v15, %v2552_v17  ;;  %vm7768_vm14 = vmmov %vm7756_vm2  ;;  %vm7777_vm1 = vcmask 1031168  }
 0x53e   :  { %v2520_v32 = vsel %vm7754_vm15, %v6795_v57, %v2517_v4  ;;  %v2519_v10 = vpop.permute.xlu0 %2518  ;;  %vm7767_vm15 = vmmov %vm7756_vm2 }
 0x53f   :  { %v6908_v50 = vsel %vm7756_vm2, %v2509_v40, %v2520_v32  ;;  %v2521_v21 = vsel %vm7757_vm7, %v2517_v4, %v2519_v10  ;;  %v6912_v30 = vsel %vm7758_vm8, %v2508_v54, %v2519_v10  ;;  %vm7769_vm7 = vmmov %vm7756_vm2  ;;  %v2752_v40 = vld [vmem:[%s7532_s3] sm:$0xf]  ;;  %s5497_s3 = smov 124  }
 0x540   :  { %v2582_v42 = vsel %vm7760_vm10, %v2510_v20, %v2521_v21  ;;  %v2843_v8 = vand.u32 4294901760, %v6908_v50  ;;  %vm7770_vm8 = vmmov %vm7756_vm2  ;;  %vm7772_vm10 = vcmask 293888  }
 0x541   :  { %v2841_v43 = vand.u32 4294901760, %v2582_v42  ;;  %v2539_v28 = vpop.permute.xlu1 %2538  ;;  %vm7771_vm3 = vmmov %vm7756_vm2  ;;  %v2824_v32 = vsel %vm7772_vm10, %v2752_v40, 0 }
 0x542   :  { %v2541_v3 = vpop.permute.xlu0 %2540  ;;  %v2542_v27 = vsel %vm7763_vm11, %v6789_v46, %v2539_v28  ;;  %v6936_v2 = vpack.c.bf16 %v2843_v8, %v2839_v44  ;;  %v2576_v46 = vsel %vm7766_vm13, %v6890_v45, %v6892_v56  ;;  %vm7775_vm11 = vmmov %vm7756_vm2  ;;  %vm7778_vm13 = vcmask 900096  }
 0x543   :  { %v2543_v57 = vsel %vm7761_vm12, %v2539_v28, %v2541_v3  ;;  %v6923_v62 = vsel %vm7762_vm9, %v2530_v23, %v2541_v3  ;;  %v6927_v7 = vpack.c.bf16 %v2841_v43, %v2837_v35  ;;  %v6947_v49 = vsel %vm7768_vm14, %v2531_v9, %v2542_v27  ;;  %vm7776_vm6 = vmmov %vm7756_vm2 }
 0x544   :  { %v2585_v22 = vsel %vm7767_vm15, %v2532_v48, %v2543_v57  ;;  %v6959_v54 = vsel %vm7771_vm3, %v2576_v46, 0  ;;  %v2847_v58 = vand.u32 4294901760, %v6947_v49  ;;  %vm7773_vm12 = vcmask 1039360   ;;  %vm7779_vm15 = vmmov %vm7777_vm1 }
 0x545   :  { %v2561_v51 = vpop.permute.xlu1 %2560  ;;  %5217 = vmatprep.subr.bf16.mxu1 %v6927_v7  ;;  %v2845_v18 = vand.u32 4294901760, %v2585_v22  ;;  %vm7774_vm9 = vmmov %vm7773_vm12  ;;  %v6988_v27 = vand.u32 4294901760, %v2824_v32  ;;  %v6993_v48 = vsub.f32 %v2579_v13, %v2837_v35 }
 0x546   :  { %v2564_v39 = vsel %vm69_vm4, %v6793_v34, %v2561_v51  ;;  %v2563_v0 = vpop.permute.xlu0 %2562  ;;  %5219 = vmatpush1.bf16.msra.mxu1 %v6936_v2  ;;  %vm7780_vm14 = vmmov %vm7778_vm13 }
 0x547   :  { %v2587_v26 = vsel %vm7756_vm2, %v2553_v11, %v2564_v39  ;;  %v2565_v53 = vsel %vm69_vm4, %v2561_v51, %v2563_v0  ;;  %v6953_v29 = vsel %vm7769_vm7, %v2552_v17, %v2563_v0  ;;  %v6967_v17 = vand.u32 4294901760, %v6959_v54  ;;  %vm7781_vm7 = vmmov %vm7756_vm2 }
 0x548   :  { %v2851_v6 = vand.u32 4294901760, %v2587_v26  ;;  %v2588_v52 = vsel %vm7770_vm8, %v2554_v59, %v2565_v53  ;;  %v6995_v11 = vsub.f32 %v2582_v42, %v2841_v43  ;;  %v6999_v51 = vsub.f32 %v6908_v50, %v2843_v8  ;;  %vm7784_vm10 = vmmov %vm7756_vm2 }
 0x549   :  { %v2849_v34 = vand.u32 4294901760, %v2588_v52  ;;  %v6956_v61 = vpop.permute.xlu1 %2670  ;;  %v7013_v43 = vsub.f32 %v2824_v32, %v6988_v27  ;;  %v2925_v35 = vand.u32 4294901760, %v6993_v48  ;;  %v7028_v53 = vsub.f32 %v2585_v22, %v2845_v18 }
 0x54a   :  { %v2669_v23 = vpop.permute.xlu0 %2668  ;;  %v6964_v36 = vpack.c.bf16 %v2851_v6, %v2847_v58  ;;  %v2937_v39 = vand.u32 4294901760, %v6995_v11  ;;  %v2943_v0 = vand.u32 4294901760, %v6999_v51  ;;  %vm7782_vm8 = vcmask 883712  }
 0x54b   :  { %v6962_v15 = vpack.c.bf16 %v2849_v34, %v2845_v18  ;;  %v7015_v50 = vsub.f32 %v2588_v52, %v2849_v34  ;;  %vm7783_vm3 = vmmov %vm7782_vm8 }
 0x54d   :  { %v6969_v19 = vpop.permute.xlu1 %2692  ;;  %5221 = vmatprep.subr.bf16.mxu1 %v6962_v15 }
 0x54e   :  { %5223 = vmatpush1.bf16.msra.mxu1 %v6964_v36  ;;  %v2691_v60 = vpop.permute.xlu0 %2690 }
 0x54f   :  { %2854 = vmatprep.subr.mxu1 %v6967_v17  ;;  %v2694_v52 = vsel %vm73_vm5, %v6831_v14, %v2691_v60  ;;  %v7046_v14 = vand.u32 4294901760, %v7013_v43 }
 0x551   :  { %v6974_v4 = vpop.permute.xlu1 %2714 }
 0x552   :  { %v2713_v20 = vpop.permute.xlu0 %2712 }
 0x555   :  { %v2658_v10 = vpop.permute.xlu1 %2657 }
 0x556   :  { %v2661_v21 = vsel %vm7773_vm12, %v6880_v33, %v2658_v10  ;;  %v6982_v28 = vpop.permute.xlu0 %2659  ;;  %vm7785_vm12 = vmmov %vm7756_vm2 }
 0x557   :  { %v2662_v3 = vsel %vm7774_vm9, %v2658_v10, %v6982_v28  ;;  %v2740_v57 = vsel %vm7775_vm11, %v6759_v12, %v2661_v21  ;;  %v2672_v12 = vsel %vm7777_vm1, %v6823_v5, %v2669_v23  ;;  %v2938_v10 = vsub.f32 %v6995_v11, %v2937_v39  ;;  %vm7788_vm11 = vmmov %vm7756_vm2 }
 0x558   :  { %2765 = vrot.lane.b32.xlu1 %v2740_v57, %s5491_s19  ;;  %v2741_v9 = vsel %vm7776_vm6, %v6848_v1, %v2662_v3  ;;  %v2673_v1 = vsel %vm7779_vm15, %v2669_v23, %v6956_v61  ;;  %v2944_v21 = vsub.f32 %v6999_v51, %v2943_v0  ;;  %v2949_v57 = vand.u32 4294901760, %v7028_v53  ;;  %vm7789_vm6 = vmmov %vm7756_vm2 }
 0x559   :  { %v2680_v33 = vpop.permute.xlu1 %2679  ;;  %2767 = vrot.lane.b32.xlu0 %v2741_v9, %s5491_s19  ;;  %vm7791_vm1 = vmmov %vm7756_vm2 }
 0x55a   :  { %v2683_v59 = vsel %vm7778_vm13, %v6882_v37, %v2680_v33  ;;  %v7005_v46 = vpop.permute.xlu0 %2681  ;;  %v7022_v37 = vsub.f32 %v6916_v63, %v2839_v44  ;;  %v7036_v63 = vsub.f32 %v2587_v26, %v2851_v6  ;;  %v2695_v44 = vsel %vm73_vm5, %v2691_v60, %v6969_v19 }
 0x55b   :  { %v2684_v13 = vsel %vm7780_vm14, %v2680_v33, %v7005_v46  ;;  %v2743_v42 = vsel %vm7756_vm2, %v2672_v12, %v2683_v59  ;;  %v7051_v6 = vsub.f32 %v6947_v49, %v2847_v58  ;;  %v2926_v60 = vsub.f32 %v6993_v48, %v2925_v35  ;;  %vm7794_vm14 = vmmov %vm7791_vm1 }
 0x55c   :  { %2771 = vrot.lane.b32.xlu1 %v2743_v42, %s5491_s19  ;;  %v2744_v5 = vsel %vm7781_vm7, %v2673_v1, %v2684_v13  ;;  %v2931_v26 = vand.u32 4294901760, %v7022_v37  ;;  %vm7786_vm5 = vcmask 752640   ;;  %v7608_v9 = vand.u32 4294901760, %v7036_v63  ;;  %vm7795_vm2 = vmmov %vm7791_vm1 }
 0x55d   :  { %v2702_v8 = vpop.permute.xlu1 %2701  ;;  %2773 = vrot.lane.b32.xlu0 %v2744_v5, %s5491_s19  ;;  %v2716_v3 = vsel %vm7786_vm5, %v6886_v16, %v2713_v20  ;;  %vm7787_vm9 = vmmov %vm7786_vm5  ;;  %v7075_v1 = vsub.f32 %v6959_v54, %v6967_v17  ;;  %v2955_v42 = vand.u32 4294901760, %v7051_v6  ;;  %v2939_v54 = vand.u32 4294901760, %v2938_v10 }
 0x55e   :  { %v2705_v34 = vsel %vm7782_vm8, %v6884_v55, %v2702_v8  ;;  %v7034_v23 = vpop.permute.xlu0 %2703  ;;  %v2961_v55 = vand.u32 4294901760, %v7015_v50  ;;  %v2717_v33 = vsel %vm7787_vm9, %v2713_v20, %v6974_v4  ;;  %v2932_v20 = vsub.f32 %v7022_v37, %v2931_v26  ;;  %vm7796_vm7 = vmmov %vm7791_vm1 }
 0x55f   :  { %v2706_v40 = vsel %vm7783_vm3, %v2702_v8, %v7034_v23  ;;  %v2746_v32 = vsel %vm7784_vm10, %v2694_v52, %v2705_v34  ;;  %v2950_v34 = vsub.f32 %v7028_v53, %v2949_v57  ;;  %vm7797_vm8 = vmmov %vm7791_vm1  ;;  %vm7800_vm10 = vcmask 261120  }
 0x560   :  { %2777 = vrot.lane.b32.xlu1 %v2746_v32, %s5491_s19  ;;  %v2747_v22 = vsel %vm7785_vm12, %v2695_v44, %v2706_v40  ;;  %v2962_v13 = vsub.f32 %v7015_v50, %v2961_v55  ;;  %v2968_v44 = vsub.f32 %v7036_v63, %v7608_v9  ;;  %v2927_v32 = vand.u32 4294901760, %v2926_v60  ;;  %vm7799_vm3 = vmmov %vm7791_vm1 }
 0x561   :  { %v2724_v18 = vpop.permute.xlu1 %2723  ;;  %2779 = vrot.lane.b32.xlu0 %v2747_v22, %s5491_s19  ;;  %v2945_v22 = vand.u32 4294901760, %v2944_v21  ;;  %vm7801_vm12 = vmmov %vm7800_vm10 }
 0x562   :  { %v2727_v49 = vsel %vm69_vm4, %v6888_v31, %v2724_v18  ;;  %v2726_v58 = vpop.permute.xlu0 %2725  ;;  %v2915_v31 = vsub.f32 %v7013_v43, %v7046_v14  ;;  %v2963_v10 = vand.u32 4294901760, %v2962_v13  ;;  %vm7802_vm5 = vmmov %vm7800_vm10 }
 0x563   :  { %v2728_v12 = vsel %vm69_vm4, %v2724_v18, %v2726_v58  ;;  %v2749_v59 = vsel %vm7788_vm11, %v2716_v3, %v2727_v49  ;;  %vm7790_vm4 = vcmask 736256   ;;  %v2956_v49 = vsub.f32 %v7051_v6, %v2955_v42  ;;  %vm7803_vm9 = vmmov %vm7802_vm5 }
 0x564   :  { %2783 = vrot.lane.b32.xlu1 %v2749_v59, %s5491_s19  ;;  %v2750_v16 = vsel %vm7789_vm6, %v2717_v33, %v2728_v12  ;;  %v7100_v3 = vand.u32 4294901760, %v2915_v31  ;;  %v5224_v12 = vpack.c.bf16 %v2939_v54, %v2927_v32  ;;  %v2933_v59 = vand.u32 4294901760, %v2932_v20  ;;  %vm7792_vm13 = vmmov %vm7790_vm4 }
 0x565   :  { %v2570_v5 = vpop.permute.xlu1 %2569  ;;  %2785 = vrot.lane.b32.xlu0 %v2750_v16, %s5491_s19  ;;  %v2951_v31 = vand.u32 4294901760, %v2950_v34  ;;  %vm7793_vm15 = vmmov %vm7790_vm4  ;;  %v2742_v34 = vsel %vm7794_vm14, %v6845_v38, %v6982_v28  ;;  %v2751_v38 = vsel %vm7797_vm8, %v6974_v4, %v2726_v58  ;;  %v5232_v28 = vpack.c.bf16 %v6995_v11, %v6993_v48 }
 0x566   :  { %v2575_v8 = vsel %vm7790_vm4, %v2570_v5, %v6890_v45  ;;  %v2733_v52 = vpop.permute.xlu0 %2732  ;;  %v2973_v45 = vand.u32 4294901760, %v7075_v1  ;;  %v5226_v5 = vpack.c.bf16 %v2945_v22, %v2933_v59  ;;  %v5238_v4 = vpack.c.bf16 %v7036_v63, %v7051_v6  ;;  %vm7804_vm11 = vmmov %vm7802_vm5 }
 0x567   :  { %v2826_v40 = vsel %vm7791_vm1, %v2575_v8, 0  ;;  %v2969_v8 = vand.u32 4294901760, %v2968_v44  ;;  %v5228_v20 = vpack.c.bf16 %v2963_v10, %v2951_v31  ;;  %v2745_v44 = vsel %vm7795_vm2, %v6956_v61, %v7005_v46  ;;  %vm7805_vm6 = vmmov %vm7802_vm5 }
 0x568   :  { %v7098_v18 = vand.u32 4294901760, %v2826_v40  ;;  %v2974_v54 = vsub.f32 %v7075_v1, %v2973_v45  ;;  %v2748_v10 = vsel %vm7796_vm7, %v6969_v19, %v7034_v23  ;;  %v5234_v46 = vpack.c.bf16 %v6999_v51, %v7022_v37  ;;  %vm7806_vm4 = vmmov %vm7802_vm5 }
 0x569   :  { %v2735_v33 = vpop.permute.xlu1 %2734  ;;  %v5236_v19 = vpack.c.bf16 %v7015_v50, %v7028_v53  ;;  %v5248_v23 = vpack.c.bf16 %v2937_v39, %v2925_v35  ;;  %v5250_v58 = vpack.c.bf16 %v2943_v0, %v2931_v26  ;;  %v7798_v48 = vand.u32 4294901760, %v7036_v63  ;;  %vm7807_vm1 = vmmov %vm7806_vm4 }
 0x56a   :  { %v7107_v16 = vsub.f32 %v2826_v40, %v7098_v18  ;;  %v2738_v60 = vsel %vm7792_vm13, %v2733_v52, %v2735_v33  ;;  %2856 = vmatpush1.msra.mxu1 %v7098_v18  ;;  %v2737_v21 = vpop.permute.xlu0 %2736  ;;  %v2957_v52 = vand.u32 4294901760, %v2956_v49  ;;  %v2975_v22 = vand.u32 4294901760, %v2974_v54  ;;  %vm7808_vm13 = vmmov %vm7807_vm1 }
 0x56b   :  { %v2739_v13 = vsel %vm7793_vm15, %v2735_v33, %v2737_v21  ;;  %5225 = vmatprep.subr.bf16.mxu1 %v5224_v12  ;;  %2789 = vrot.lane.b32.xlu1 %v2738_v60, %s5491_s19  ;;  %v5252_v49 = vpack.c.bf16 %v2961_v55, %v2949_v57  ;;  %v5254_v11 = vpack.c.bf16 %v7798_v48, %v2955_v42  ;;  %vm7809_vm15 = vmmov %vm7795_vm2 }
 0x56c   :  { %v2979_v9 = vand.u32 4294901760, %v7107_v16  ;;  %2917 = vmatmul.mubr.f32.vlgmr.msra.gmra.mrb[4].mxu1 %v7100_v3  ;;  %2791 = vrot.lane.b32.xlu0 %v2739_v13, %s5491_s19  ;;  %v5230_v40 = vpack.c.bf16 %v2969_v8, %v2957_v52  ;;  %vm7810_vm14 = vmmov %vm7807_vm1 }
 0x56d   :  { %5227 = vmatpush1.bf16.msra.mxu1 %v5226_v5  ;;  %3037 = vmatprep.mubr.f32.mxu1 %v7633_v24  ;;  %vm7811_vm7 = vmmov %vm7807_vm1 }
 0x56e   :  { %5229 = vmatprep.subr.bf16.mxu1 %v5228_v20  ;;  %v2980_v32 = vsub.f32 %v7107_v16, %v2979_v9  ;;  %vm7812_vm8 = vmmov %vm7807_vm1 }
 0x56f   :  { %2769 = vrot.lane.b32.xlu1 %v2742_v34, %s5491_s19 }
 0x570   :  { %2775 = vrot.lane.b32.xlu0 %v2745_v44, %s5491_s19  ;;  %v2981_v61 = vand.u32 4294901760, %v2980_v32 }
 0x571   :  { %5231 = vmatpush1.bf16.msra.mxu1 %v5230_v40 }
 0x572   :  { %2976 = vmatprep.subr.mxu1 %v2975_v22 }
 0x573   :  { %2781 = vrot.lane.b32.xlu1 %v2748_v10, %s5491_s19 }
 0x574   :  { %2787 = vrot.lane.b32.xlu0 %v2751_v38, %s5491_s19 }
 0x575   :  { %2982 = vmatpush1.msra.mxu1 %v2981_v61 }
 0x576   :  { %5233 = vmatprep.subr.bf16.mxu1 %v5232_v28  ;;  %3039 = vmatmul.mubr.f32.vlgmr.msra.gmra.mrb[4].mxu1 %v6988_v27 }
 0x577   :  { %5235 = vmatpush1.bf16.msra.mxu1 %v5234_v46  ;;  %2793 = vrot.lane.b32.xlu1 %v2737_v21, %s5491_s19  ;;  %s5519_s19 = smov 70  }
 0x578   :  { %5237 = vmatprep.subr.bf16.mxu1 %v5236_v19  ;;  %3129 = vmatprep.mubr.f32.mxu1 %v7633_v24 }
 0x57b   :  { %5239 = vmatpush1.bf16.msra.mxu1 %v5238_v4 }
 0x57c   :  { %3071 = vmatprep.subr.mxu1 %v7075_v1 }
 0x57f   :  { %3074 = vmatpush1.msra.mxu1 %v7107_v16 }
 0x580   :  { %5241 = vmatprep.subr.bf16.mxu1 %v6927_v7  ;;  %3132 = vmatmul.mubr.f32.vlgmr.msra.gmra.mrb[4].mxu1 %v7013_v43 }
 0x581   :  { %5243 = vmatpush1.bf16.msra.mxu1 %v6936_v2  ;;  %3212 = vmatprep.mubr.f32.mxu1 %v7633_v24 }
 0x582   :  { %5245 = vmatprep.subr.bf16.mxu1 %v6962_v15 }
 0x585   :  { %5247 = vmatpush1.bf16.msra.mxu1 %v6964_v36 }
 0x586   :  { %3155 = vmatprep.subr.mxu1 %v6967_v17 }
 0x589   :  { %3157 = vmatpush1.msra.mxu1 %v7098_v18 }
 0x58a   :  { %5249 = vmatprep.subr.bf16.mxu1 %v5248_v23  ;;  %3216 = vmatmul.mubr.f32.vlgmr.msra.gmra.mrb[4].mxu1 %v7046_v14 }
 0x58b   :  { %5251 = vmatpush1.bf16.msra.mxu1 %v5250_v58  ;;  %3316 = vmatprep.mubr.f32.mxu1 %v7633_v24 }
 0x58c   :  { %5253 = vmatprep.subr.bf16.mxu1 %v5252_v49 }
 0x58f   :  { %5255 = vmatpush1.bf16.msra.mxu1 %v5254_v11 }
 0x590   :  { %3257 = vmatprep.subr.mxu1 %v2973_v45 }
 0x593   :  { %3261 = vmatpush1.msra.mxu1 %v2979_v9 }
 0x594   :  { %5257 = vmatprep.subr.bf16.mxu1 %v6927_v7  ;;  %3318 = vmatmul.mubr.f32.vlgmr.msra.gmra.mrb[4].mxu1 %v6988_v27  ;;  %v2580_v7 = vsel %vm7799_vm3, %v6807_v25, %v6894_v41  ;;  %vm7813_vm3 = vmmov %vm7807_vm1 }
 0x595   :  { %5259 = vmatpush1.bf16.msra.mxu1 %v6936_v2  ;;  %3398 = vmatprep.mubr.f32.mxu1 %v7633_v24 }
 0x596   :  { %5261 = vmatprep.subr.bf16.mxu1 %v6962_v15 }
 0x599   :  { %5263 = vmatpush1.bf16.msra.mxu1 %v6964_v36 }
 0x59a   :  { %3341 = vmatprep.subr.mxu1 %v6967_v17 }
 0x59d   :  { %3343 = vmatpush1.msra.mxu1 %v7098_v18 }
 0x59e   :  { %3400 = vmatmul.mubr.f32.vlgmr.msra.gmra.mrb[4].mxu1 %v6988_v27 }
 0x59f   :  { %3480 = vmatprep.mubr.f32.mxu1 %v7633_v24 }
 0x5ca   :  { %v2766_v51 = vpop.permute.xlu1 %2765 }
 0x5cb   :  { %v2818_v2 = vsel %vm7800_vm10, %v2580_v7, %v2766_v51  ;;  %v7191_v50 = vpop.permute.xlu0 %2767  ;;  %vm7814_vm10 = vmmov %vm7807_vm1 }
 0x5cc   :  { %v3408_v15 = vand.u32 4294901760, %v2818_v2  ;;  %v2795_v36 = vsel %vm7801_vm12, %v2766_v51, %v7191_v50  ;;  %vm7815_vm12 = vmmov %vm7807_vm1 }
 0x5cd   :  { %v3406_v35 = vand.u32 4294901760, %v2795_v36 }
 0x5ce   :  { %v7195_v17 = vsub.f32 %v2818_v2, %v3408_v15  ;;  %v2772_v37 = vpop.permute.xlu1 %2771 }
 0x5cf   :  { %v2819_v39 = vsel %vm7802_vm5, %v6912_v30, %v2772_v37  ;;  %v7199_v0 = vpop.permute.xlu0 %2773  ;;  %v7208_v57 = vsub.f32 %v2795_v36, %v3406_v35  ;;  %vm7816_vm5 = vmmov %vm7795_vm2 }
 0x5d0   :  { %v3412_v53 = vand.u32 4294901760, %v2819_v39  ;;  %v2797_v25 = vsel %vm7803_vm9, %v2772_v37, %v7199_v0  ;;  %v3500_v41 = vand.u32 4294901760, %v7195_v17  ;;  %vm7817_vm9 = vmmov 0  }
 0x5d1   :  { %v3410_v63 = vand.u32 4294901760, %v2797_v25  ;;  %v3494_v5 = vand.u32 4294901760, %v7208_v57 }
 0x5d2   :  { %v7204_v55 = vpack.c.bf16 %v3412_v53, %v3408_v15  ;;  %v7206_v26 = vsub.f32 %v2819_v39, %v3412_v53  ;;  %v2778_v6 = vpop.permute.xlu1 %2777  ;;  %v3501_v12 = vsub.f32 %v7195_v17, %v3500_v41 }
 0x5d3   :  { %v7210_v9 = vsub.f32 %v2797_v25, %v3410_v63  ;;  %v2820_v30 = vsel %vm7804_vm11, %v6923_v62, %v2778_v6  ;;  %v7214_v1 = vpop.permute.xlu0 %2779  ;;  %v7216_v42 = vpack.c.bf16 %v3410_v63, %v3406_v35  ;;  %v3495_v28 = vsub.f32 %v7208_v57, %v3494_v5 }
 0x5d4   :  { %v3512_v18 = vand.u32 4294901760, %v7206_v26  ;;  %v5282_v45 = vpack.c.bf16 %v7206_v26, %v7195_v17  ;;  %v3416_v33 = vand.u32 4294901760, %v2820_v30  ;;  %v2799_v16 = vsel %vm7805_vm6, %v2778_v6, %v7214_v1 }
 0x5d5   :  { %v3506_v59 = vand.u32 4294901760, %v7210_v9  ;;  %5265 = vmatprep.subr.bf16.mxu1 %v7216_v42  ;;  %v3414_v21 = vand.u32 4294901760, %v2799_v16  ;;  %v3502_v40 = vand.u32 4294901760, %v3501_v12  ;;  %v3496_v53 = vand.u32 4294901760, %v3495_v28 }
 0x5d6   :  { %v3513_v62 = vsub.f32 %v7206_v26, %v3512_v18  ;;  %v7227_v60 = vsub.f32 %v2820_v30, %v3416_v33  ;;  %v2784_v31 = vpop.permute.xlu1 %2783  ;;  %5267 = vmatpush1.bf16.msra.mxu1 %v7204_v55  ;;  %v7230_v13 = vpack.c.bf16 %v3512_v18, %v3500_v41 }
 0x5d7   :  { %v2821_v8 = vsel %vm7806_vm4, %v6953_v29, %v2784_v31  ;;  %v7235_v20 = vpop.permute.xlu0 %2785  ;;  %v7238_v34 = vsub.f32 %v2799_v16, %v3414_v21  ;;  %v3507_v22 = vsub.f32 %v7210_v9, %v3506_v59 }
 0x5d8   :  { %v3514_v54 = vand.u32 4294901760, %v3513_v62  ;;  %v3524_v52 = vand.u32 4294901760, %v7227_v60  ;;  %v3420_v44 = vand.u32 4294901760, %v2821_v8  ;;  %v2801_v32 = vsel %vm7807_vm1, %v2784_v31, %v7235_v20 }
 0x5d9   :  { %v3518_v10 = vand.u32 4294901760, %v7238_v34  ;;  %v3418_v61 = vand.u32 4294901760, %v2801_v32  ;;  %v3508_v11 = vand.u32 4294901760, %v3507_v22 }
 0x5da   :  { %v7246_v38 = vpack.c.bf16 %v3420_v44, %v3416_v33  ;;  %v7248_v29 = vsub.f32 %v2821_v8, %v3420_v44  ;;  %v5274_v46 = vpack.c.bf16 %v3514_v54, %v3502_v40  ;;  %v3525_v19 = vsub.f32 %v7227_v60, %v3524_v52 }
 0x5db   :  { %v7257_v58 = vsub.f32 %v2801_v32, %v3418_v61  ;;  %v7259_v48 = vpack.c.bf16 %v3418_v61, %v3414_v21  ;;  %v3519_v15 = vsub.f32 %v7238_v34, %v3518_v10  ;;  %v5272_v18 = vpack.c.bf16 %v3508_v11, %v3496_v53 }
 0x5dc   :  { %v3536_v4 = vand.u32 4294901760, %v7248_v29  ;;  %v5286_v23 = vpack.c.bf16 %v7248_v29, %v7227_v60  ;;  %v3526_v25 = vand.u32 4294901760, %v3525_v19  ;;  %v5296_v60 = vpack.c.bf16 %v3506_v59, %v3494_v5 }
 0x5dd   :  { %v2790_v49 = vpop.permute.xlu1 %2789  ;;  %v3530_v37 = vand.u32 4294901760, %v7257_v58  ;;  %5269 = vmatprep.subr.bf16.mxu1 %v7259_v48  ;;  %v3520_v21 = vand.u32 4294901760, %v3519_v15 }
 0x5de   :  { %v3537_v7 = vsub.f32 %v7248_v29, %v3536_v4  ;;  %v2822_v51 = vsel %vm7808_vm13, %v6892_v56, %v2790_v49  ;;  %v2792_v2 = vpop.permute.xlu0 %2791  ;;  %v7267_v36 = vpack.c.bf16 %v3536_v4, %v3524_v52  ;;  %5271 = vmatpush1.bf16.msra.mxu1 %v7246_v38 }
 0x5df   :  { %v2831_v35 = vsel %vm7809_vm15, %v2822_v51, 0  ;;  %v2803_v39 = vsel %vm7810_vm14, %v2790_v49, %v2792_v2  ;;  %v3531_v33 = vsub.f32 %v7257_v58, %v3530_v37  ;;  %vm4543_vm15 = vcmask 130048  }
 0x5e0   :  { %v3538_v41 = vand.u32 4294901760, %v3537_v7  ;;  %v7273_v63 = vand.u32 4294901760, %v2831_v35  ;;  %v2833_v56 = vsel %vm7795_vm2, %v2803_v39, 0  ;;  %vm4546_vm14 = vcmask 392192  }
 0x5e1   :  { %v7277_v6 = vand.u32 4294901760, %v2833_v56  ;;  %v2770_v30 = vpop.permute.xlu1 %2769  ;;  %v3532_v44 = vand.u32 4294901760, %v3531_v33  ;;  %vm4548_vm2 = vcmask 523264  }
 0x5e2   :  { %v7283_v12 = vsub.f32 %v2831_v35, %v7273_v63  ;;  %v7287_v16 = vsel %vm7811_vm7, %v7191_v50, %v2770_v30  ;;  %v2776_v62 = vpop.permute.xlu0 %2775  ;;  %v5278_v31 = vpack.c.bf16 %v3538_v41, %v3526_v25  ;;  %vm7818_vm7 = vmmov %vm7813_vm3 }
 0x5e3   :  { %v7290_v8 = vsub.f32 %v2833_v56, %v7277_v6  ;;  %v3976_v54 = vand.u32 4294901760, %v7287_v16  ;;  %v7295_v52 = vsel %vm7812_vm8, %v7199_v0, %v2776_v62  ;;  %3423 = vmatprep.subr.mxu1 %v7277_v6  ;;  %v5276_v0 = vpack.c.bf16 %v3532_v44, %v3520_v21  ;;  %vm7819_vm8 = vmmov %vm7813_vm3 }
 0x5e4   :  { %v3548_v40 = vand.u32 4294901760, %v7283_v12  ;;  %v3979_v50 = vand.u32 4294901760, %v7295_v52  ;;  %3425 = vmatpush1.msra.mxu1 %v7273_v63 }
 0x5e5   :  { %v7304_v32 = vsub.f32 %v7287_v16, %v3976_v54  ;;  %v2782_v22 = vpop.permute.xlu1 %2781  ;;  %5273 = vmatprep.subr.bf16.mxu1 %v5272_v18  ;;  %3486 = vmatmul.mubr.f32.vlgmr.msra.gmra.mrb[6].mxu1 %v7100_v3  ;;  %v3542_v61 = vand.u32 4294901760, %v7290_v8 }
 0x5e6   :  { %v7311_v28 = vsub.f32 %v7295_v52, %v3979_v50  ;;  %v7315_v19 = vsel %vm7813_vm3, %v7214_v1, %v2782_v22  ;;  %5275 = vmatpush1.bf16.msra.mxu1 %v5274_v46  ;;  %v2788_v4 = vpop.permute.xlu0 %2787  ;;  %3606 = vmatprep.mubr.f32.mxu1 %v7633_v24  ;;  %v3549_v15 = vsub.f32 %v7283_v12, %v3548_v40  ;;  %vm4550_vm3 = vcmask 654336  }
 0x5e7   :  { %v4058_v49 = vand.u32 4294901760, %v7304_v32  ;;  %v3982_v11 = vand.u32 4294901760, %v7315_v19  ;;  %v7321_v7 = vsel %vm7814_vm10, %v7235_v20, %v2788_v4  ;;  %5277 = vmatprep.subr.bf16.mxu1 %v5276_v0  ;;  %v3543_v51 = vsub.f32 %v7290_v8, %v3542_v61 }
 0x5e8   :  { %v4065_v1 = vand.u32 4294901760, %v7311_v28  ;;  %v3985_v46 = vand.u32 4294901760, %v7321_v7  ;;  %v3550_v22 = vand.u32 4294901760, %v3549_v15  ;;  %v5284_v15 = vpack.c.bf16 %v7257_v58, %v7238_v34 }
 0x5e9   :  { %v4059_v20 = vsub.f32 %v7304_v32, %v4058_v49  ;;  %v7338_v35 = vsub.f32 %v7315_v19, %v3982_v11  ;;  %v2794_v39 = vpop.permute.xlu1 %2793  ;;  %v3544_v53 = vand.u32 4294901760, %v3543_v51  ;;  %v5325_v26 = vpack.c.bf16 %v7311_v28, %v7304_v32 }
 0x5ea   :  { %v4066_v25 = vsub.f32 %v7311_v28, %v4065_v1  ;;  %v7346_v41 = vsub.f32 %v7321_v7, %v3985_v46  ;;  %v2804_v56 = vsel %vm7815_vm12, %v2792_v2, %v2794_v39  ;;  %5279 = vmatpush1.bf16.msra.mxu1 %v5278_v31  ;;  %v5280_v2 = vpack.c.bf16 %v7210_v9, %v7208_v57 }
 0x5eb   :  { %v4060_v30 = vand.u32 4294901760, %v4059_v20  ;;  %v4072_v18 = vand.u32 4294901760, %v7338_v35  ;;  %v2835_v33 = vsel %vm7816_vm5, %v2804_v56, 0  ;;  %3545 = vmatprep.subr.mxu1 %v3544_v53  ;;  %v5313_v29 = vpack.c.bf16 %v3979_v50, %v3976_v54 }
 0x5ec   :  { %v4067_v62 = vand.u32 4294901760, %v4066_v25  ;;  %v4079_v21 = vand.u32 4294901760, %v7346_v41  ;;  %v7352_v44 = vand.u32 4294901760, %v2835_v33  ;;  %v5300_v57 = vpack.c.bf16 %v3530_v37, %v3518_v10 }
 0x5ed   :  { %v4073_v0 = vsub.f32 %v7338_v35, %v4072_v18  ;;  %v5316_v9 = vpack.c.bf16 %v3985_v46, %v3982_v11  ;;  %vm4537_vm10 = vcmask 818176   ;;  %vm4552_vm12 = vcmask 785408  }
 0x5ee   :  { %v4080_v31 = vsub.f32 %v7346_v41, %v4079_v21  ;;  %v7363_v4 = vsub.f32 %v2835_v33, %v7352_v44  ;;  %3551 = vmatpush1.msra.mxu1 %v3550_v22  ;;  %v5319_v51 = vpack.c.bf16 %v4067_v62, %v4060_v30  ;;  %vm4554_vm5 = vcmask 916480  }
 0x5ef   :  { %v4074_v20 = vand.u32 4294901760, %v4073_v0  ;;  %5281 = vmatprep.subr.bf16.mxu1 %v5280_v2  ;;  %3608 = vmatmul.mubr.f32.vlgmr.msra.gmra.mrb[6].mxu1 %v6988_v27 }
 0x5f0   :  { %v4081_v39 = vand.u32 4294901760, %v4080_v31  ;;  %v4086_v53 = vand.u32 4294901760, %v7363_v4  ;;  %5283 = vmatpush1.bf16.msra.mxu1 %v5282_v45  ;;  %5320 = vmatpush3.bf16.msra.mxu0 %v5319_v51  ;;  %v5328_v45 = vpack.c.bf16 %v7346_v41, %v7338_v35 }
 0x5f1   :  { %5285 = vmatprep.subr.bf16.mxu1 %v5284_v15  ;;  %5321 = vmatprep.subr.bf16.mxu0 %v7660_v47 }
 0x5f2   :  { %v5322_v25 = vpack.c.bf16 %v4081_v39, %v4074_v20  ;;  %v4087_v56 = vsub.f32 %v7363_v4, %v4086_v53  ;;  %3698 = vmatprep.mubr.f32.mxu1 %v7633_v24 }
 0x5f4   :  { %5287 = vmatpush1.bf16.msra.mxu1 %v5286_v23  ;;  %5323 = vmatpush3.bf16.msra.mxu0 %v5322_v25  ;;  %v4088_v17 = vand.u32 4294901760, %v4087_v56 }
 0x5f5   :  { %3640 = vmatprep.subr.mxu1 %v7290_v8  ;;  %4895 = vmatprep.subr.mxu0 %v7633_v24 }
 0x5f8   :  { %3643 = vmatpush1.msra.mxu1 %v7283_v12  ;;  %4896 = vmatpush3.msra.mxu0 %v4088_v17 }
 0x5f9   :  { %5289 = vmatprep.subr.bf16.mxu1 %v7216_v42  ;;  %5324 = vmatprep.subr.bf16.mxu0 %v7660_v47 }
 0x5fa   :  { %3701 = vmatmul.mubr.f32.vlgmr.msra.gmra.mrb[6].mxu1 %v7013_v43  ;;  %4898 = vmatmul.mubr.f32.vlgmr.msra.gmra.mrb[4].mxu0 %v6988_v27 }
 0x5fb   :  { %5291 = vmatpush1.bf16.msra.mxu1 %v7204_v55  ;;  %5326 = vmatpush3.bf16.msra.mxu0 %v5325_v26 }
 0x5fc   :  { %5293 = vmatprep.subr.bf16.mxu1 %v7259_v48  ;;  %5327 = vmatprep.subr.bf16.mxu0 %v7660_v47 }
 0x5fd   :  { %3781 = vmatprep.mubr.f32.mxu1 %v7633_v24  ;;  %4910 = vmatprep.mubr.msk.f32.mxu0 %vm7817_vm9, %v7633_v24 }
 0x5ff   :  { %5295 = vmatpush1.bf16.msra.mxu1 %v7246_v38  ;;  %5329 = vmatpush3.bf16.msra.mxu0 %v5328_v45 }
 0x600   :  { %3724 = vmatprep.subr.mxu1 %v7277_v6  ;;  %4908 = vmatprep.subr.mxu0 %v7633_v24 }
 0x603   :  { %3726 = vmatpush1.msra.mxu1 %v7273_v63  ;;  %4909 = vmatpush3.msra.mxu0 %v7363_v4 }
 0x604   :  { %5297 = vmatprep.subr.bf16.mxu1 %v5296_v60  ;;  %5330 = vmatprep.subr.bf16.mxu0 %v7660_v47 }
 0x605   :  { %3785 = vmatmul.mubr.f32.vlgmr.msra.gmra.mrb[6].mxu1 %v7046_v14  ;;  %4911 = vmatmul.mubr.f32.vlgmr.msra.gmra.mrb[4].mxu0 %v7013_v43  ;;  %v5337_v43 = vpack.c.bf16 %v4065_v1, %v4058_v49 }
 0x606   :  { %5299 = vmatpush1.bf16.msra.mxu1 %v7230_v13  ;;  %5332 = vmatpush3.bf16.msra.mxu0 %v5313_v29 }
 0x607   :  { %5301 = vmatprep.subr.bf16.mxu1 %v5300_v57  ;;  %5333 = vmatprep.subr.bf16.mxu0 %v7660_v47 }
 0x608   :  { %3885 = vmatprep.mubr.f32.mxu1 %v7633_v24  ;;  %4923 = vmatprep.mubr.msk.f32.mxu0 %vm7817_vm9, %v7633_v24 }
 0x60a   :  { %5303 = vmatpush1.bf16.msra.mxu1 %v7267_v36  ;;  %5335 = vmatpush3.bf16.msra.mxu0 %v5316_v9 }
 0x60b   :  { %3826 = vmatprep.subr.mxu1 %v3542_v61  ;;  %4921 = vmatprep.subr.mxu0 %v7633_v24 }
 0x60e   :  { %3830 = vmatpush1.msra.mxu1 %v3548_v40  ;;  %4922 = vmatpush3.msra.mxu0 %v7352_v44 }
 0x60f   :  { %5305 = vmatprep.subr.bf16.mxu1 %v7216_v42  ;;  %5336 = vmatprep.subr.bf16.mxu0 %v7660_v47  ;;  %v5340_v42 = vpack.c.bf16 %v4079_v21, %v4072_v18 }
 0x610   :  { %3887 = vmatmul.mubr.f32.vlgmr.msra.gmra.mrb[6].mxu1 %v6988_v27  ;;  %4924 = vmatmul.mubr.f32.vlgmr.msra.gmra.mrb[4].mxu0 %v7046_v14 }
 0x611   :  { %5307 = vmatpush1.bf16.msra.mxu1 %v7204_v55  ;;  %5338 = vmatpush3.bf16.msra.mxu0 %v5337_v43 }
 0x612   :  { %5309 = vmatprep.subr.bf16.mxu1 %v7259_v48  ;;  %5339 = vmatprep.subr.bf16.mxu0 %v7660_v47 }
 0x613   :  { %3967 = vmatprep.mubr.f32.mxu1 %v7633_v24  ;;  %4936 = vmatprep.mubr.msk.f32.mxu0 %vm7817_vm9, %v7633_v24 }
 0x615   :  { %5311 = vmatpush1.bf16.msra.mxu1 %v7246_v38  ;;  %5341 = vmatpush3.bf16.msra.mxu0 %v5340_v42 }
 0x616   :  { %3910 = vmatprep.subr.mxu1 %v7277_v6  ;;  %4934 = vmatprep.subr.mxu0 %v7633_v24 }
 0x619   :  { %3912 = vmatpush1.msra.mxu1 %v7273_v63  ;;  %4935 = vmatpush3.msra.mxu0 %v4086_v53 }
 0x61a   :  { %3969 = vmatmul.mubr.f32.vlgmr.msra.gmra.mrb[6].mxu1 %v6988_v27  ;;  %5312 = vmatprep.subr.bf16.mxu1 %v7660_v47 }
 0x61b   :  { %5342 = vmatprep.subr.bf16.mxu0 %v7660_v47  ;;  %5314 = vmatpush3.bf16.msra.mxu1 %v5313_v29 }
 0x61c   :  { %4937 = vmatmul.mubr.f32.vlgmr.msra.gmra.mrb[4].mxu0 %v6988_v27  ;;  %5315 = vmatprep.subr.bf16.mxu1 %v7660_v47 }
 0x61d   :  { %5344 = vmatpush3.bf16.msra.mxu0 %v5313_v29  ;;  %4884 = vmatprep.mubr.msk.f32.mxu1 %vm7817_vm9, %v7633_v24 }
 0x61e   :  { %5345 = vmatprep.subr.bf16.mxu0 %v7660_v47  ;;  %4949 = vmatprep.mubr.msk.f32.mxu0 %vm7817_vm9, %v7633_v24  ;;  %vm7820_vm9 = vmmov %vm7818_vm7 }
 0x61f   :  { %5317 = vmatpush3.bf16.msra.mxu1 %v5316_v9 }
 0x620   :  { %4882 = vmatprep.subr.mxu1 %v7633_v24 }
 0x621   :  { %5347 = vmatpush3.bf16.msra.mxu0 %v5316_v9 }
 0x622   :  { %4947 = vmatprep.subr.mxu0 %v7633_v24 }
 0x623   :  { %4883 = vmatpush3.msra.mxu1 %v7352_v44 }
 0x624   :  { %4885 = vmatmul.mubr.f32.vlgmr.msra.gmra.mrb[8].mxu1 %v7100_v3 }
 0x625   :  { %4948 = vmatpush3.msra.mxu0 %v7352_v44 }
 0x626   :  { %4950 = vmatmul.mubr.f32.vlgmr.msra.gmra.mrb[4].mxu0 %v6988_v27 }
 0x671   :  { %v3401_v14 = vpop.f32.mrb[4].mxu1 }
 0x672   :  { %vm4473_vm11 = vcmp.gt.f32.partialorder %v3401_v14, 0.0  ;;  %v4478_v47 = vmul.f32 0.01, %v3401_v14  ;;  %v3403_v55 = vpop.f32.mrb[5].mxu1 }
 0x673   :  { %v4479_v24 = vmul.f32 0.01, %v3403_v55  ;;  %vm4474_vm6 = vcmp.gt.f32.partialorder %v3403_v55, 0.0 }
 0x674   :  { %v7473_v59 = vsel %vm4473_vm11, %v3401_v14, %v4478_v47  ;;  %vm7821_vm11 = vcmask 588800  }
 0x675   :  { %4489 = vrot.lane.b32.xlu0 %v7473_v59, %s5482_s11  ;;  %4492 = vrot.lane.b32.xlu1 %v7473_v59, %s5497_s3  ;;  %v4484_v27 = vsel %vm4474_vm6, %v3403_v55, %v4479_v24  ;;  %s5511_s11 = smov 88   ;;  %vm7822_vm6 = vmmov %vm7818_vm7 }
 0x679   :  { %4501 = vrot.lane.b32.xlu0 %v7473_v59, %s5498_s26  ;;  %4495 = vrot.lane.b32.xlu1 %v7473_v59, %s5499_s27 }
 0x67d   :  { %4508 = vrot.lane.b32.xlu0 %v7473_v59, %s5494_s2  ;;  %4498 = vrot.lane.b32.xlu1 %v7473_v59, %s5500_s28 }
 0x681   :  { %4514 = vrot.lane.b32.xlu0 %v4484_v27, %s5501_s29  ;;  %4504 = vrot.lane.b32.xlu1 %v7473_v59, %s5502_s30 }
 0x685   :  { %4520 = vrot.lane.b32.xlu0 %v4484_v27, %s5487_s16  ;;  %4517 = vrot.lane.b32.xlu1 %v4484_v27, %s5485_s14  ;;  %s5514_s14 = smov 78   ;;  %s5516_s16 = smov 72  }
 0x689   :  { %4523 = vrot.lane.b32.xlu0 %v4484_v27, %s5503_s0  ;;  %4529 = vrot.lane.b32.xlu1 %v4484_v27, %s5504_s1 }
 0x68d   :  { %4526 = vrot.lane.b32.xlu0 %v4484_v27, %s5505_s5  ;;  %4510 = vrot.lane.b32.xlu1 %v4484_v27, %s5494_s2 }
 0x691   :  { %4533 = vrot.lane.b32.xlu0 %v4484_v27, %s5506_s6 }
 0x6e7   :  { %v4490_v12 = vpop.permute.xlu0 %4489  ;;  %v4493_v16 = vpop.permute.xlu1 %4492 }
 0x6e8   :  { %v4544_v62 = vsel %vm4543_vm15, %v7473_v59, %v4490_v12 }
 0x6e9   :  { %v4545_v44 = vsel %vm7818_vm7, %v4544_v62, %v4493_v16 }
 0x6eb   :  { %v4502_v8 = vpop.permute.xlu0 %4501  ;;  %v4496_v54 = vpop.permute.xlu1 %4495 }
 0x6ec   :  { %v4547_v31 = vsel %vm4546_vm14, %v4545_v44, %v4496_v54 }
 0x6ed   :  { %v3970_v3 = vpop.f32.mrb[6].mxu1 }
 0x6ee   :  { %vm4475_vm4 = vcmp.gt.f32.partialorder %v3970_v3, 0.0  ;;  %v4480_v13 = vmul.f32 0.01, %v3970_v3  ;;  %v3972_v5 = vpop.f32.mrb[7].mxu1 }
 0x6ef   :  { %v4481_v38 = vmul.f32 0.01, %v3972_v5  ;;  %vm4476_vm1 = vcmp.gt.f32.partialorder %v3972_v5, 0.0  ;;  %v4509_v52 = vpop.permute.xlu0 %4508  ;;  %v4499_v40 = vpop.permute.xlu1 %4498 }
 0x6f0   :  { %v4485_v34 = vsel %vm4475_vm4, %v3970_v3, %v4480_v13  ;;  %v4549_v51 = vsel %vm4548_vm2, %v4547_v31, %v4499_v40 }
 0x6f1   :  { %4571 = vrot.lane.b32.xlu1 %v4485_v34, %s5507_s7  ;;  %4568 = vrot.lane.b32.xlu0 %v4485_v34, %s5508_s8  ;;  %v4486_v37 = vsel %vm4476_vm1, %v3972_v5, %v4481_v38  ;;  %v4551_v25 = vsel %vm4550_vm3, %v4549_v51, %v4502_v8 }
 0x6f3   :  { %v4515_v50 = vpop.permute.xlu0 %4514  ;;  %v4505_v32 = vpop.permute.xlu1 %4504 }
 0x6f4   :  { %v4553_v26 = vsel %vm4552_vm12, %v4551_v25, %v4505_v32 }
 0x6f5   :  { %4574 = vrot.lane.b32.xlu1 %v4485_v34, %s5486_s15  ;;  %4584 = vrot.lane.b32.xlu0 %v4485_v34, %s5509_s9  ;;  %s5515_s15 = smov 74  }
 0x6f7   :  { %v4051_v10 = vpop.f32.mrb[8].mxu1  ;;  %v4521_v61 = vpop.permute.xlu0 %4520 }
 0x6f8   :  { %v4886_v23 = vpop.f32.mrb[9].mxu1  ;;  %v4518_v28 = vpop.permute.xlu1 %4517 }
 0x6f9   :  { %v4469_v58 = vpop.f32.mrb[4].mxu0  ;;  %4577 = vrot.lane.b32.xlu1 %v4485_v34, %s5489_s18  ;;  %4540 = vrot.lane.b32.xlu0 %v4485_v34, %s5510_s10  ;;  %s5518_s18 = smov 68   ;;  %v4556_v21 = vsel %vm4543_vm15, %v4515_v50, %v4518_v28 }
 0x6fa   :  { %v5350_v48 = vadd.f32 %v4469_v58, %v4051_v10  ;;  %v4951_v36 = vpop.f32.mrb[5].mxu0  ;;  %v4557_v22 = vsel %vm7819_vm8, %v4556_v21, %v4521_v61 }
 0x6fb   :  { %v4524_v19 = vpop.permute.xlu0 %4523 }
 0x6fc   :  { %v4482_v63 = vmul.f32 0.01, %v5350_v48  ;;  %vm4477_vm13 = vcmp.gt.f32.partialorder %v5350_v48, 0.0  ;;  %v4530_v49 = vpop.permute.xlu1 %4529  ;;  %v4558_v4 = vsel %vm4546_vm14, %v4557_v22, %v4524_v19 }
 0x6fd   :  { %4580 = vrot.lane.b32.xlu1 %v4485_v34, %s5511_s11  ;;  %4597 = vrot.lane.b32.xlu0 %v4486_v37, %s5512_s12 }
 0x6fe   :  { %v4487_v6 = vsel %vm4477_vm13, %v5350_v48, %v4482_v63 }
 0x6ff   :  { %v4527_v11 = vpop.permute.xlu0 %4526 }
 0x700   :  { %v4511_v7 = vpop.permute.xlu1 %4510  ;;  %v4559_v20 = vsel %vm4548_vm2, %v4558_v4, %v4527_v11 }
 0x701   :  { %4535 = vrot.lane.b32.xlu1 %v4485_v34, %s5506_s6  ;;  %4603 = vrot.lane.b32.xlu0 %v4486_v37, %s5513_s13  ;;  %v4512_v15 = vsel %vm2459_vm0, %v4509_v52, %v4511_v7  ;;  %v4560_v56 = vsel %vm4550_vm3, %v4559_v20, %v4530_v49  ;;  %vm4588_vm0 = vcmask 703488  }
 0x702   :  { %v4555_v60 = vsel %vm4554_vm5, %v4553_v26, %v4512_v15 }
 0x703   :  { %v4534_v1 = vpop.permute.xlu0 %4533 }
 0x705   :  { %4600 = vrot.lane.b32.xlu1 %v4486_v37, %s5514_s14  ;;  %4606 = vrot.lane.b32.xlu0 %v4486_v37, %s5515_s15 }
 0x709   :  { %4610 = vrot.lane.b32.xlu1 %v4486_v37, %s5516_s16  ;;  %4591 = vrot.lane.b32.xlu0 %v4486_v37, %s5517_s17 }
 0x70d   :  { %4586 = vrot.lane.b32.xlu1 %v4486_v37, %s5509_s9  ;;  %4612 = vrot.lane.b32.xlu0 %v4487_v6, %s5516_s16 }
 0x711   :  { %4619 = vrot.lane.b32.xlu1 %v4487_v6, %s5518_s18  ;;  %4616 = vrot.lane.b32.xlu0 %v4487_v6, %s5519_s19 }
 0x715   :  { %4594 = vrot.lane.b32.xlu1 %v4486_v37, %s5495_s22  ;;  %4622 = vrot.lane.b32.xlu0 %v4487_v6, %s5520_s20 }
 0x763   :  { %v4572_v46 = vpop.permute.xlu1 %4571  ;;  %v4569_v35 = vpop.permute.xlu0 %4568 }
 0x764   :  { %v4625_v27 = vsel %vm4543_vm15, %v4569_v35, %v4572_v46 }
 0x767   :  { %v4575_v41 = vpop.permute.xlu1 %4574  ;;  %v4585_v30 = vpop.permute.xlu0 %4584 }
 0x768   :  { %v4626_v13 = vsel %vm7822_vm6, %v4625_v27, %v4575_v41 }
 0x76b   :  { %v4578_v18 = vpop.permute.xlu1 %4577  ;;  %v4541_v33 = vpop.permute.xlu0 %4540 }
 0x76c   :  { %v4627_v34 = vsel %vm4546_vm14, %v4626_v13, %v4578_v18 }
 0x76f   :  { %v4581_v0 = vpop.permute.xlu1 %4580  ;;  %v4598_v2 = vpop.permute.xlu0 %4597 }
 0x770   :  { %v4628_v38 = vsel %vm4548_vm2, %v4627_v34, %v4581_v0 }
 0x773   :  { %v4536_v39 = vpop.permute.xlu1 %4535  ;;  %v4604_v53 = vpop.permute.xlu0 %4603 }
 0x774   :  { %v4538_v17 = vsel %vm4537_vm10, %v4534_v1, %v4536_v39 }
 0x775   :  { %v4561_v45 = vsel %vm4552_vm12, %v4560_v56, %v4538_v17 }
 0x776   :  { %v4562_v29 = vsel %vm4554_vm5, %v4561_v45, %v4541_v33 }
 0x777   :  { %v4565_v57 = vcombine.low %v4555_v60, %v4562_v29  ;;  %v4601_v9 = vpop.permute.xlu1 %4600  ;;  %v4607_v43 = vpop.permute.xlu0 %4606 }
 0x778   :  { %v4632_v47 = vsel %vm4543_vm15, %v4598_v2, %v4601_v9 }
 0x779   :  { %4567 = vst [vmem:[%s7533_s4] sm:$0xff] %v4565_v57  ;;  %v4633_v55 = vsel %vm7820_vm9, %v4632_v47, %v4604_v53 }
 0x77a   :  { %v4634_v10 = vsel %vm4546_vm14, %v4633_v55, %v4607_v43 }
 0x77b   :  { %v4611_v42 = vpop.permute.xlu1 %4610  ;;  %v4592_v14 = vpop.permute.xlu0 %4591 }
 0x77f   :  { %v4587_v59 = vpop.permute.xlu1 %4586  ;;  %v4613_v24 = vpop.permute.xlu0 %4612 }
 0x780   :  { %v4614_v3 = vsel %vm7821_vm11, %v4611_v42, %v4613_v24  ;;  %v4589_v5 = vsel %vm4588_vm0, %v4585_v30, %v4587_v59 }
 0x781   :  { %v4635_v58 = vsel %vm4548_vm2, %v4634_v10, %v4614_v3  ;;  %v4629_v36 = vsel %vm4550_vm3, %v4628_v38, %v4589_v5 }
 0x782   :  { %v4630_v6 = vsel %vm4552_vm12, %v4629_v36, %v4592_v14 }
 0x783   :  { %v4620_v23 = vpop.permute.xlu1 %4619  ;;  %v4617_v48 = vpop.permute.xlu0 %4616 }
 0x784   :  { %v4636_v37 = vsel %vm4550_vm3, %v4635_v58, %v4617_v48 }
 0x785   :  { %v4637_v12 = vsel %vm4552_vm12, %v4636_v37, %v4620_v23 }
 0x787   :  { %v4595_v63 = vpop.permute.xlu1 %4594  ;;  %v4623_v16 = vpop.permute.xlu0 %4622 }
 0x788   :  { %v4631_v8 = vsel %vm4554_vm5, %v4630_v6, %v4595_v63  ;;  %v4638_v54 = vsel %vm4554_vm5, %v4637_v12, %v4623_v16 }
 0x789   :  { %v4641_v52 = vcombine.low %v4631_v8, %v4638_v54 }
 0x78b   :  { %4651 = vst [vmem:[%s7533_s4 + $0x8] sm:$0xff] %v4641_v52 }

</bundles_post_ra>
